<compile_context>
chip_gen: v7x
topology: tpu7x:2x2x1
jax: 0.10.0
libtpu: 0.0.40
codegen_flags: <defaults>
</compile_context>

<pallas_src>
import functools

import jax
import jax.numpy as jnp
from jax.experimental import pallas as pl
from jax.experimental.pallas import tpu as pltpu


# ----------------------------------------------------------------------------
# Static per-position tables (built once per call in the wrapper, tiny).
# ----------------------------------------------------------------------------
def _upsample_weights(oh, ow, n_img):
    """(6, n_img*oh*ow) f32: separable 3-tap bilinear-x2 weights per position.

    Rows [wL, wC, wR, vU, vC, vD]:
        t  = wL*shift(x,-1)  + wC*x + wR*shift(x,+1)      (W stage)
        up = vU*shift(t,-OW) + vC*t + vD*shift(t,+OW)     (H stage)
    applied to the nearest-neighbour-duplicated input.  Matches
    F.interpolate(scale_factor=2, mode='bilinear', align_corners=False)
    exactly (src>=0 clamp and right/bottom edge clamp included).  Weights are
    zero wherever a roll would cross a row or image boundary, so wrap-around
    lanes are never used.
    """
    p = jnp.arange(n_img * oh * ow)
    r = (p // ow) % oh
    c = p % ow

    def taps(idx, n_out):
        even = (idx % 2) == 0
        w_prev = jnp.where(even & (idx > 0), 0.25, 0.0)
        w_next = jnp.where((~even) & (idx < n_out - 1), 0.25, 0.0)
        w_cent = 1.0 - w_prev - w_next
        return w_prev, w_cent, w_next

    wl, wc, wr = taps(c, ow)
    vu, vc, vd = taps(r, oh)
    return jnp.stack([wl, wc, wr, vu, vc, vd], axis=0).astype(jnp.float32)


def _shift_masks(oh, ow, n_img):
    """(9, n_img*oh*ow) f32 validity masks for the 3x3 conv taps.

    Built from within-image row/col so they also zero the taps that would
    leak across image boundaries when the batch is folded onto the lane axis.
    """
    p = jnp.arange(n_img * oh * ow)
    r = (p // ow) % oh
    c = p % ow
    rows = []
    for dy in (-1, 0, 1):
        for dx in (-1, 0, 1):
            ok = (r + dy >= 0) & (r + dy < oh) & (c + dx >= 0) & (c + dx < ow)
            rows.append(ok.astype(jnp.float32))
    return jnp.stack(rows, axis=0)


def _flatten_conv_weight(w_oihw):
    """torch (O, I, 3, 3) -> (O, 9*I), tap-major / channel-minor (im2col)."""
    o, i, kh, kw = w_oihw.shape
    return jnp.transpose(w_oihw, (0, 2, 3, 1)).reshape(o, kh * kw * i)


# ----------------------------------------------------------------------------
# Fused kernel: upsample + conv1 + lrelu + (fused concat) + conv2 + lrelu.
# All features are (C, NB*OH*OW) with the folded batch on the lane axis.
# ----------------------------------------------------------------------------
def _make_fused_kernel(ow: int, nbp: int, cin: int, cout: int):
    c2 = 2 * cout

    def kernel(xd_ref, skp_ref, uw_ref, mask_ref, w1_ref, b1_ref,
               w2_ref, b2_ref, o_ref, tap1_ref, tap2_ref):
        def shifted(a, off):
            # result[:, p] = a[:, p + off]; wrap-around lanes are always
            # multiplied by a zero mask / zero upsample weight.
            return pltpu.roll(a, (-off) % nbp, axis=1)

        def fill_taps(feat, tap_ref, c):
            # Write the nine 3x3 taps straight into the VMEM scratch
            # (tap-major, channel-minor) -- no jnp.concatenate relayout.
            k = 0
            for dy in (-1, 0, 1):
                for dx in (-1, 0, 1):
                    off = dy * ow + dx
                    if off == 0:
                        piece = feat                          # centre tap
                    else:
                        piece = shifted(feat, off) * mask_ref[k:k + 1, :]
                    tap_ref[k * c:(k + 1) * c, :] = piece.astype(tap_ref.dtype)
                    k += 1

        # (1) bilinear x2 upsample: separable 3-tap FIR (rolls + FMA, f32) on
        #     the nearest-neighbour-duplicated input.  No stencil matmul.
        xd = xd_ref[...].astype(jnp.float32)                  # (Cin, NBP)
        t = (uw_ref[0:1, :] * shifted(xd, -1) + uw_ref[1:2, :] * xd
             + uw_ref[2:3, :] * shifted(xd, 1))
        up = (uw_ref[3:4, :] * shifted(t, -ow) + uw_ref[4:5, :] * t
              + uw_ref[5:6, :] * shifted(t, ow))

        # (2) conv1 (3x3, pad 1) + bias + leaky_relu(0.1): one K=9*Cin matmul
        #     with the whole folded batch on the 2048-wide lane axis.
        fill_taps(up, tap1_ref, cin)
        h1 = jnp.dot(w1_ref[...], tap1_ref[...],
                     preferred_element_type=jnp.float32) + b1_ref[...]
        h1 = jnp.where(h1 >= 0, h1, 0.1 * h1)                 # (Cout, NBP)

        # (3) conv2 on concat([h1, skp], channels): a SINGLE K=9*2*Cout matmul
        #     on the sublane-concatenated feature (weights unsplit).
        feat2 = jnp.concatenate(
            [h1, skp_ref[...].astype(jnp.float32)], axis=0)   # (2Cout, NBP)
        fill_taps(feat2, tap2_ref, c2)
        h2 = jnp.dot(w2_ref[...], tap2_ref[...],
                     preferred_element_type=jnp.float32) + b2_ref[...]
        h2 = jnp.where(h2 >= 0, h2, 0.1 * h2)

        o_ref[...] = h2.astype(o_ref.dtype)

    return kernel


# ----------------------------------------------------------------------------
# Wrapper.
# ----------------------------------------------------------------------------
@functools.partial(jax.jit, static_argnames=("compute_dtype", "batch_block"))
def up_forward(x_nchw, skp_nchw, w1_flat, b1, w2_flat, b2, *,
               compute_dtype=jnp.bfloat16, batch_block=None):
    """x: (N,Cin,H,W), skp: (N,Cout,2H,2W) -> (N,Cout,2H,2W) float32."""
    n, cin, h, w = x_nchw.shape
    cout = w1_flat.shape[0]
    oh, ow = 2 * h, 2 * w
    pout = oh * ow
    assert skp_nchw.shape == (n, cout, oh, ow), skp_nchw.shape
    assert w2_flat.shape == (cout, 9 * 2 * cout), w2_flat.shape

    nb = n if batch_block is None else batch_block
    assert n % nb == 0, (n, nb)
    num_steps = n // nb
    nbp = nb * pout

    # Nearest-neighbour 2x duplication of x (XLA side), channel-major and
    # lane-flattened per image: (Cin, N*OH*OW).  The bilinear weighting itself
    # happens inside the kernel.
    xdup = jnp.repeat(jnp.repeat(x_nchw, 2, axis=2), 2, axis=3)
    xdup = xdup.transpose(1, 0, 2, 3).reshape(cin, n * pout).astype(compute_dtype)
    skp_f = skp_nchw.transpose(1, 0, 2, 3).reshape(cout, n * pout)
    skp_f = skp_f.astype(compute_dtype)

    uw = _upsample_weights(oh, ow, nb)                 # (6, NBP) f32
    masks = _shift_masks(oh, ow, nb)                   # (9, NBP) f32
    w1c = w1_flat.astype(compute_dtype)
    w2c = w2_flat.astype(compute_dtype)
    b1c = b1.reshape(cout, 1).astype(jnp.float32)
    b2c = b2.reshape(cout, 1).astype(jnp.float32)

    # Grid-invariant operands: single-buffer them when there is more than one
    # grid step (with one step multi-buffering is moot anyway).
    use_single_buffer = num_steps > 1 and hasattr(pl, "Buffered")

    def const_spec(shape):
        if use_single_buffer:
            try:
                return pl.BlockSpec(shape, lambda g: (0, 0),
                                    pipeline_mode=pl.Buffered(1))
            except TypeError:                      # older BlockSpec signature
                pass
        return pl.BlockSpec(shape, lambda g: (0, 0))

    def batch_spec(rows):
        return pl.BlockSpec((rows, nbp), lambda g: (0, g))

    out2d = pl.pallas_call(
        _make_fused_kernel(ow, nbp, cin, cout),
        out_shape=jax.ShapeDtypeStruct((cout, n * pout), jnp.float32),
        grid=(num_steps,),
        in_specs=[
            batch_spec(cin),                       # NN-duplicated x
            batch_spec(cout),                      # skip connection
            const_spec((6, nbp)),                  # upsample FIR weights
            const_spec((9, nbp)),                  # conv border masks
            const_spec((cout, 9 * cin)),           # conv1 weight (im2col)
            const_spec((cout, 1)),                 # conv1 bias
            const_spec((cout, 9 * 2 * cout)),      # conv2 weight (unsplit)
            const_spec((cout, 1)),                 # conv2 bias
        ],
        out_specs=pl.BlockSpec((cout, nbp), lambda g: (0, g)),
        scratch_shapes=[
            pltpu.VMEM((9 * cin, nbp), compute_dtype),        # conv1 taps
            pltpu.VMEM((9 * 2 * cout, nbp), compute_dtype),   # conv2 taps
        ],
        compiler_params=pltpu.CompilerParams(
            dimension_semantics=("parallel",),
            vmem_limit_bytes=48 * 1024 * 1024),
    )(xdup, skp_f, uw, masks, w1c, b1c, w2c, b2c)

    out = out2d.reshape(cout, n, oh, ow).transpose(1, 0, 2, 3)
    return out.astype(x_nchw.dtype)


# ----------------------------------------------------------------------------
# The `up` module (PyTorch-default-style init, torch OIHW weight layout).
# ----------------------------------------------------------------------------
class UpPallas:
    def __init__(self, in_channels, out_channels, key):
        k1, k2, k3, k4 = jax.random.split(key, 4)
        fan1 = in_channels * 9
        bound1 = 1.0 / (fan1 ** 0.5)
        self.w1 = jax.random.uniform(
            k1, (out_channels, in_channels, 3, 3), jnp.float32, -bound1, bound1)
        self.b1 = jax.random.uniform(
            k2, (out_channels,), jnp.float32, -bound1, bound1)
        fan2 = 2 * out_channels * 9
        bound2 = 1.0 / (fan2 ** 0.5)
        self.w2 = jax.random.uniform(
            k3, (out_channels, 2 * out_channels, 3, 3), jnp.float32,
            -bound2, bound2)
        self.b2 = jax.random.uniform(
            k4, (out_channels,), jnp.float32, -bound2, bound2)

        # im2col layouts (tap-major).  w2 stays UNSPLIT: its input-channel
        # order [conv1_out ; skip] matches torch.cat((x, skpCn), 1).
        self.w1_flat = _flatten_conv_weight(self.w1)
        self.w2_flat = _flatten_conv_weight(self.w2)

    def __call__(self, x_nchw, skp_nchw, *, compute_dtype=jnp.bfloat16,
                 batch_block=None):
        return up_forward(x_nchw, skp_nchw, self.w1_flat, self.b1,
                          self.w2_flat, self.b2,
                          compute_dtype=compute_dtype, batch_block=batch_block)


# ----------------------------------------------------------------------------
# Pure-JAX (XLA) reference of the PyTorch forward, for runtime checks.
# ----------------------------------------------------------------------------
def _bilinear_up2_ref(x):                      # NCHW
    n, c, h, w = x.shape

    def iw(n_in, n_out):
        o = jnp.arange(n_out, dtype=jnp.float32)
        src = jnp.maximum((o + 0.5) / 2.0 - 0.5, 0.0)
        i0 = jnp.floor(src).astype(jnp.int32)
        i1 = jnp.minimum(i0 + 1, n_in - 1)
        return i0, i1, src - i0.astype(jnp.float32)

    y0, y1, wy = iw(h, 2 * h)
    x0, x1, wx = iw(w, 2 * w)
    g00 = x[:, :, y0][:, :, :, x0]
    g01 = x[:, :, y0][:, :, :, x1]
    g10 = x[:, :, y1][:, :, :, x0]
    g11 = x[:, :, y1][:, :, :, x1]
    wy_ = wy[None, None, :, None]
    wx_ = wx[None, None, None, :]
    return (g00 * (1 - wy_) * (1 - wx_) + g01 * (1 - wy_) * wx_ +
            g10 * wy_ * (1 - wx_) + g11 * wy_ * wx_)


def _ref_forward(x, skp, w1, b1, w2, b2):
    dn = ('NCHW', 'OIHW', 'NCHW')
    y = _bilinear_up2_ref(x)
    y = jax.lax.conv_general_dilated(y, w1, (1, 1), 'SAME',
                                     dimension_numbers=dn)
    y = y + b1[None, :, None, None]
    y = jnp.where(y >= 0, y, 0.1 * y)
    y = jnp.concatenate([y, skp], axis=1)
    y = jax.lax.conv_general_dilated(y, w2, (1, 1), 'SAME',
                                     dimension_numbers=dn)
    y = y + b2[None, :, None, None]
    y = jnp.where(y >= 0, y, 0.1 * y)
    return y


if __name__ == "__main__":
    key = jax.random.PRNGKey(0)
    k_params, k_x, k_skip = jax.random.split(key, 3)

    in_channels, out_channels = 4, 8
    N, H, W = 2, 16, 16

    model = UpPallas(in_channels, out_channels, k_params)

    x = jax.random.normal(k_x, (N, in_channels, H, W), jnp.float32)
    skp = jax.random.normal(k_skip, (N, out_channels, 2 * H, 2 * W),
                            jnp.float32)

    ref = jax.block_until_ready(
        _ref_forward(x, skp, model.w1, model.b1, model.w2, model.b2))

    # (a) f32 MXU path: must match the XLA reference tightly.
    out_f32 = jax.block_until_ready(model(x, skp, compute_dtype=jnp.float32))
    assert out_f32.shape == (N, out_channels, 2 * H, 2 * W), out_f32.shape
    err_f32 = float(jnp.max(jnp.abs(out_f32 - ref)))
    assert err_f32 < 1e-4, f"f32 max abs err {err_f32}"

    # (b) bf16 MXU operands (default perf mode), f32 accumulate/elementwise.
    out_bf16 = jax.block_until_ready(model(x, skp))
    assert out_bf16.shape == (N, out_channels, 2 * H, 2 * W), out_bf16.shape
    rel_rms = float(jnp.linalg.norm(out_bf16 - ref) /
                    (jnp.linalg.norm(ref) + 1e-12))
    max_abs = float(jnp.max(jnp.abs(out_bf16 - ref)))
    assert rel_rms < 1e-2, f"bf16 rel rms err {rel_rms}"
    assert max_abs < 1e-1, f"bf16 max abs err {max_abs}"

    print("KERNEL_OK")
</pallas_src>

<mosaic_0001>
module attributes {stable_mosaic.version = 11 : i64} {
  func.func @kernel(%arg0: i32, %arg1: memref<4x2048xf32, #tpu.memory_space<vmem>>, %arg2: memref<8x2048xf32, #tpu.memory_space<vmem>>, %arg3: memref<6x2048xf32, #tpu.memory_space<vmem>>, %arg4: memref<9x2048xf32, #tpu.memory_space<vmem>>, %arg5: memref<8x36xf32, #tpu.memory_space<vmem>>, %arg6: memref<8x1xf32, #tpu.memory_space<vmem>>, %arg7: memref<8x144xf32, #tpu.memory_space<vmem>>, %arg8: memref<8x1xf32, #tpu.memory_space<vmem>>, %arg9: memref<8x2048xf32, #tpu.memory_space<vmem>>, %arg10: memref<36x2048xf32, #tpu.memory_space<vmem>>, %arg11: memref<144x2048xf32, #tpu.memory_space<vmem>>) attributes {dimension_semantics = [#tpu.dimension_semantics<parallel>], iteration_bounds = array<i64: 1>, scalar_prefetch = 0 : i64, scratch_operands = 2 : i64, tpu.core_type = #tpu.core_type<tc>, window_params = [{transform_indices = @transform_0, window_bounds = array<i64: 4, 2048>}, {transform_indices = @transform_1, window_bounds = array<i64: 8, 2048>}, {pipeline_mode = #tpu.pipeline_mode<synchronous>, transform_indices = @transform_2, window_bounds = array<i64: 6, 2048>}, {pipeline_mode = #tpu.pipeline_mode<synchronous>, transform_indices = @transform_3, window_bounds = array<i64: 9, 2048>}, {pipeline_mode = #tpu.pipeline_mode<synchronous>, transform_indices = @transform_4, window_bounds = array<i64: 8, 36>}, {pipeline_mode = #tpu.pipeline_mode<synchronous>, transform_indices = @transform_5, window_bounds = array<i64: 8, 1>}, {pipeline_mode = #tpu.pipeline_mode<synchronous>, transform_indices = @transform_6, window_bounds = array<i64: 8, 144>}, {pipeline_mode = #tpu.pipeline_mode<synchronous>, transform_indices = @transform_7, window_bounds = array<i64: 8, 1>}, {transform_indices = @transform_8, window_bounds = array<i64: 8, 2048>}]} {
    %c0 = arith.constant 0 : index
    %c0_0 = arith.constant 0 : index
    %0 = vector.load %arg1[%c0, %c0_0] : memref<4x2048xf32, #tpu.memory_space<vmem>>, vector<4x2048xf32>
    %c0_1 = arith.constant 0 : index
    %c0_2 = arith.constant 0 : index
    %1 = vector.load %arg3[%c0_1, %c0_2] : memref<6x2048xf32, #tpu.memory_space<vmem>>, vector<1x2048xf32>
    %c1_i32 = arith.constant 1 : i32
    %2 = tpu.dynamic_rotate %0 by %c1_i32 dim 1 : vector<4x2048xf32>, i32 -> vector<4x2048xf32>
    %3 = vector.broadcast %1 : vector<1x2048xf32> to vector<4x2048xf32>
    %4 = arith.mulf %3, %2 : vector<4x2048xf32>
    %c1 = arith.constant 1 : index
    %c0_3 = arith.constant 0 : index
    %5 = vector.load %arg3[%c1, %c0_3] : memref<6x2048xf32, #tpu.memory_space<vmem>>, vector<1x2048xf32>
    %6 = vector.broadcast %5 : vector<1x2048xf32> to vector<4x2048xf32>
    %7 = arith.mulf %6, %0 : vector<4x2048xf32>
    %8 = arith.addf %4, %7 : vector<4x2048xf32>
    %c2 = arith.constant 2 : index
    %c0_4 = arith.constant 0 : index
    %9 = vector.load %arg3[%c2, %c0_4] : memref<6x2048xf32, #tpu.memory_space<vmem>>, vector<1x2048xf32>
    %c2047_i32 = arith.constant 2047 : i32
    %10 = tpu.dynamic_rotate %0 by %c2047_i32 dim 1 : vector<4x2048xf32>, i32 -> vector<4x2048xf32>
    %11 = vector.broadcast %9 : vector<1x2048xf32> to vector<4x2048xf32>
    %12 = arith.mulf %11, %10 : vector<4x2048xf32>
    %13 = arith.addf %8, %12 : vector<4x2048xf32>
    %c3 = arith.constant 3 : index
    %c0_5 = arith.constant 0 : index
    %14 = vector.load %arg3[%c3, %c0_5] : memref<6x2048xf32, #tpu.memory_space<vmem>>, vector<1x2048xf32>
    %c32_i32 = arith.constant 32 : i32
    %15 = tpu.dynamic_rotate %13 by %c32_i32 dim 1 : vector<4x2048xf32>, i32 -> vector<4x2048xf32>
    %16 = vector.broadcast %14 : vector<1x2048xf32> to vector<4x2048xf32>
    %17 = arith.mulf %16, %15 : vector<4x2048xf32>
    %c4 = arith.constant 4 : index
    %c0_6 = arith.constant 0 : index
    %18 = vector.load %arg3[%c4, %c0_6] : memref<6x2048xf32, #tpu.memory_space<vmem>>, vector<1x2048xf32>
    %19 = vector.broadcast %18 : vector<1x2048xf32> to vector<4x2048xf32>
    %20 = arith.mulf %19, %13 : vector<4x2048xf32>
    %21 = arith.addf %17, %20 : vector<4x2048xf32>
    %c5 = arith.constant 5 : index
    %c0_7 = arith.constant 0 : index
    %22 = vector.load %arg3[%c5, %c0_7] : memref<6x2048xf32, #tpu.memory_space<vmem>>, vector<1x2048xf32>
    %c2016_i32 = arith.constant 2016 : i32
    %23 = tpu.dynamic_rotate %13 by %c2016_i32 dim 1 : vector<4x2048xf32>, i32 -> vector<4x2048xf32>
    %24 = vector.broadcast %22 : vector<1x2048xf32> to vector<4x2048xf32>
    %25 = arith.mulf %24, %23 : vector<4x2048xf32>
    %26 = arith.addf %21, %25 : vector<4x2048xf32>
    %c33_i32 = arith.constant 33 : i32
    %27 = tpu.dynamic_rotate %26 by %c33_i32 dim 1 : vector<4x2048xf32>, i32 -> vector<4x2048xf32>
    %c0_8 = arith.constant 0 : index
    %c0_9 = arith.constant 0 : index
    %28 = vector.load %arg4[%c0_8, %c0_9] : memref<9x2048xf32, #tpu.memory_space<vmem>>, vector<1x2048xf32>
    %29 = vector.broadcast %28 : vector<1x2048xf32> to vector<4x2048xf32>
    %30 = arith.mulf %27, %29 : vector<4x2048xf32>
    %c0_10 = arith.constant 0 : index
    %c0_11 = arith.constant 0 : index
    %31 = vector.load %arg10[%c0_10, %c0_11] : memref<36x2048xf32, #tpu.memory_space<vmem>>, vector<4x2048xf32>
    tpu.vector_store %arg10[%c0_10, %c0_11], %30 {strides = array<i32>} : memref<36x2048xf32, #tpu.memory_space<vmem>>, vector<4x2048xf32>,
    %c32_i32_12 = arith.constant 32 : i32
    %32 = tpu.dynamic_rotate %26 by %c32_i32_12 dim 1 : vector<4x2048xf32>, i32 -> vector<4x2048xf32>
    %c1_13 = arith.constant 1 : index
    %c0_14 = arith.constant 0 : index
    %33 = vector.load %arg4[%c1_13, %c0_14] : memref<9x2048xf32, #tpu.memory_space<vmem>>, vector<1x2048xf32>
    %34 = vector.broadcast %33 : vector<1x2048xf32> to vector<4x2048xf32>
    %35 = arith.mulf %32, %34 : vector<4x2048xf32>
    %c4_15 = arith.constant 4 : index
    %c0_16 = arith.constant 0 : index
    %36 = vector.load %arg10[%c4_15, %c0_16] : memref<36x2048xf32, #tpu.memory_space<vmem>>, vector<4x2048xf32>
    tpu.vector_store %arg10[%c4_15, %c0_16], %35 {strides = array<i32>} : memref<36x2048xf32, #tpu.memory_space<vmem>>, vector<4x2048xf32>,
    %c31_i32 = arith.constant 31 : i32
    %37 = tpu.dynamic_rotate %26 by %c31_i32 dim 1 : vector<4x2048xf32>, i32 -> vector<4x2048xf32>
    %c2_17 = arith.constant 2 : index
    %c0_18 = arith.constant 0 : index
    %38 = vector.load %arg4[%c2_17, %c0_18] : memref<9x2048xf32, #tpu.memory_space<vmem>>, vector<1x2048xf32>
    %39 = vector.broadcast %38 : vector<1x2048xf32> to vector<4x2048xf32>
    %40 = arith.mulf %37, %39 : vector<4x2048xf32>
    %c8 = arith.constant 8 : index
    %c0_19 = arith.constant 0 : index
    %41 = vector.load %arg10[%c8, %c0_19] : memref<36x2048xf32, #tpu.memory_space<vmem>>, vector<4x2048xf32>
    tpu.vector_store %arg10[%c8, %c0_19], %40 {strides = array<i32>} : memref<36x2048xf32, #tpu.memory_space<vmem>>, vector<4x2048xf32>,
    %c1_i32_20 = arith.constant 1 : i32
    %42 = tpu.dynamic_rotate %26 by %c1_i32_20 dim 1 : vector<4x2048xf32>, i32 -> vector<4x2048xf32>
    %c3_21 = arith.constant 3 : index
    %c0_22 = arith.constant 0 : index
    %43 = vector.load %arg4[%c3_21, %c0_22] : memref<9x2048xf32, #tpu.memory_space<vmem>>, vector<1x2048xf32>
    %44 = vector.broadcast %43 : vector<1x2048xf32> to vector<4x2048xf32>
    %45 = arith.mulf %42, %44 : vector<4x2048xf32>
    %c12 = arith.constant 12 : index
    %c0_23 = arith.constant 0 : index
    %46 = vector.load %arg10[%c12, %c0_23] : memref<36x2048xf32, #tpu.memory_space<vmem>>, vector<4x2048xf32>
    tpu.vector_store %arg10[%c12, %c0_23], %45 {strides = array<i32>} : memref<36x2048xf32, #tpu.memory_space<vmem>>, vector<4x2048xf32>,
    %c16 = arith.constant 16 : index
    %c0_24 = arith.constant 0 : index
    %47 = vector.load %arg10[%c16, %c0_24] : memref<36x2048xf32, #tpu.memory_space<vmem>>, vector<4x2048xf32>
    tpu.vector_store %arg10[%c16, %c0_24], %26 {strides = array<i32>} : memref<36x2048xf32, #tpu.memory_space<vmem>>, vector<4x2048xf32>,
    %c2047_i32_25 = arith.constant 2047 : i32
    %48 = tpu.dynamic_rotate %26 by %c2047_i32_25 dim 1 : vector<4x2048xf32>, i32 -> vector<4x2048xf32>
    %c5_26 = arith.constant 5 : index
    %c0_27 = arith.constant 0 : index
    %49 = vector.load %arg4[%c5_26, %c0_27] : memref<9x2048xf32, #tpu.memory_space<vmem>>, vector<1x2048xf32>
    %50 = vector.broadcast %49 : vector<1x2048xf32> to vector<4x2048xf32>
    %51 = arith.mulf %48, %50 : vector<4x2048xf32>
    %c20 = arith.constant 20 : index
    %c0_28 = arith.constant 0 : index
    %52 = vector.load %arg10[%c20, %c0_28] : memref<36x2048xf32, #tpu.memory_space<vmem>>, vector<4x2048xf32>
    tpu.vector_store %arg10[%c20, %c0_28], %51 {strides = array<i32>} : memref<36x2048xf32, #tpu.memory_space<vmem>>, vector<4x2048xf32>,
    %c2017_i32 = arith.constant 2017 : i32
    %53 = tpu.dynamic_rotate %26 by %c2017_i32 dim 1 : vector<4x2048xf32>, i32 -> vector<4x2048xf32>
    %c6 = arith.constant 6 : index
    %c0_29 = arith.constant 0 : index
    %54 = vector.load %arg4[%c6, %c0_29] : memref<9x2048xf32, #tpu.memory_space<vmem>>, vector<1x2048xf32>
    %55 = vector.broadcast %54 : vector<1x2048xf32> to vector<4x2048xf32>
    %56 = arith.mulf %53, %55 : vector<4x2048xf32>
    %c24 = arith.constant 24 : index
    %c0_30 = arith.constant 0 : index
    %57 = vector.load %arg10[%c24, %c0_30] : memref<36x2048xf32, #tpu.memory_space<vmem>>, vector<4x2048xf32>
    tpu.vector_store %arg10[%c24, %c0_30], %56 {strides = array<i32>} : memref<36x2048xf32, #tpu.memory_space<vmem>>, vector<4x2048xf32>,
    %c2016_i32_31 = arith.constant 2016 : i32
    %58 = tpu.dynamic_rotate %26 by %c2016_i32_31 dim 1 : vector<4x2048xf32>, i32 -> vector<4x2048xf32>
    %c7 = arith.constant 7 : index
    %c0_32 = arith.constant 0 : index
    %59 = vector.load %arg4[%c7, %c0_32] : memref<9x2048xf32, #tpu.memory_space<vmem>>, vector<1x2048xf32>
    %60 = vector.broadcast %59 : vector<1x2048xf32> to vector<4x2048xf32>
    %61 = arith.mulf %58, %60 : vector<4x2048xf32>
    %c28 = arith.constant 28 : index
    %c0_33 = arith.constant 0 : index
    %62 = vector.load %arg10[%c28, %c0_33] : memref<36x2048xf32, #tpu.memory_space<vmem>>, vector<4x2048xf32>
    tpu.vector_store %arg10[%c28, %c0_33], %61 {strides = array<i32>} : memref<36x2048xf32, #tpu.memory_space<vmem>>, vector<4x2048xf32>,
    %c2015_i32 = arith.constant 2015 : i32
    %63 = tpu.dynamic_rotate %26 by %c2015_i32 dim 1 : vector<4x2048xf32>, i32 -> vector<4x2048xf32>
    %c8_34 = arith.constant 8 : index
    %c0_35 = arith.constant 0 : index
    %64 = vector.load %arg4[%c8_34, %c0_35] : memref<9x2048xf32, #tpu.memory_space<vmem>>, vector<1x2048xf32>
    %65 = vector.broadcast %64 : vector<1x2048xf32> to vector<4x2048xf32>
    %66 = arith.mulf %63, %65 : vector<4x2048xf32>
    %c32 = arith.constant 32 : index
    %c0_36 = arith.constant 0 : index
    %67 = vector.load %arg10[%c32, %c0_36] : memref<36x2048xf32, #tpu.memory_space<vmem>>, vector<4x2048xf32>
    tpu.vector_store %arg10[%c32, %c0_36], %66 {strides = array<i32>} : memref<36x2048xf32, #tpu.memory_space<vmem>>, vector<4x2048xf32>,
    %c0_37 = arith.constant 0 : index
    %c0_38 = arith.constant 0 : index
    %68 = vector.load %arg5[%c0_37, %c0_38] : memref<8x36xf32, #tpu.memory_space<vmem>>, vector<8x36xf32>
    %c0_39 = arith.constant 0 : index
    %c0_40 = arith.constant 0 : index
    %69 = vector.load %arg10[%c0_39, %c0_40] : memref<36x2048xf32, #tpu.memory_space<vmem>>, vector<36x2048xf32>
    %cst = arith.constant dense<0.000000e+00> : vector<8x2048xf32>
    %70 = tpu.matmul %68, %69, %cst {dimension_numbers = #tpu.dot_dimension_numbers<[1], [0], [0], [1], [0, 0, 1, 1], [], []>} : vector<8x36xf32>, vector<36x2048xf32>, vector<8x2048xf32> -> vector<8x2048xf32>
    %c0_41 = arith.constant 0 : index
    %c0_42 = arith.constant 0 : index
    %71 = vector.load %arg6[%c0_41, %c0_42] : memref<8x1xf32, #tpu.memory_space<vmem>>, vector<8x1xf32>
    %72 = vector.broadcast %71 : vector<8x1xf32> to vector<8x2048xf32>
    %73 = arith.addf %70, %72 : vector<8x2048xf32>
    %cst_43 = arith.constant 0.000000e+00 : f32
    %74 = vector.broadcast %cst_43 : f32 to vector<8x2048xf32>
    %75 = arith.cmpf oge, %73, %74 : vector<8x2048xf32>
    %cst_44 = arith.constant 1.000000e-01 : f32
    %76 = vector.broadcast %cst_44 : f32 to vector<8x2048xf32>
    %77 = arith.mulf %76, %73 : vector<8x2048xf32>
    %78 = arith.select %75, %73, %77 : vector<8x2048xi1>, vector<8x2048xf32>
    %c0_45 = arith.constant 0 : index
    %c0_46 = arith.constant 0 : index
    %79 = vector.load %arg2[%c0_45, %c0_46] : memref<8x2048xf32, #tpu.memory_space<vmem>>, vector<8x2048xf32>
    %80 = tpu.concatenate %78, %79 in 0 : vector<8x2048xf32>, vector<8x2048xf32> -> vector<16x2048xf32>
    %c33_i32_47 = arith.constant 33 : i32
    %81 = tpu.dynamic_rotate %80 by %c33_i32_47 dim 1 : vector<16x2048xf32>, i32 -> vector<16x2048xf32>
    %c0_48 = arith.constant 0 : index
    %c0_49 = arith.constant 0 : index
    %82 = vector.load %arg4[%c0_48, %c0_49] : memref<9x2048xf32, #tpu.memory_space<vmem>>, vector<1x2048xf32>
    %83 = vector.broadcast %82 : vector<1x2048xf32> to vector<16x2048xf32>
    %84 = arith.mulf %81, %83 : vector<16x2048xf32>
    %c0_50 = arith.constant 0 : index
    %c0_51 = arith.constant 0 : index
    %85 = vector.load %arg11[%c0_50, %c0_51] : memref<144x2048xf32, #tpu.memory_space<vmem>>, vector<16x2048xf32>
    tpu.vector_store %arg11[%c0_50, %c0_51], %84 {strides = array<i32>} : memref<144x2048xf32, #tpu.memory_space<vmem>>, vector<16x2048xf32>,
    %c32_i32_52 = arith.constant 32 : i32
    %86 = tpu.dynamic_rotate %80 by %c32_i32_52 dim 1 : vector<16x2048xf32>, i32 -> vector<16x2048xf32>
    %c1_53 = arith.constant 1 : index
    %c0_54 = arith.constant 0 : index
    %87 = vector.load %arg4[%c1_53, %c0_54] : memref<9x2048xf32, #tpu.memory_space<vmem>>, vector<1x2048xf32>
    %88 = vector.broadcast %87 : vector<1x2048xf32> to vector<16x2048xf32>
    %89 = arith.mulf %86, %88 : vector<16x2048xf32>
    %c16_55 = arith.constant 16 : index
    %c0_56 = arith.constant 0 : index
    %90 = vector.load %arg11[%c16_55, %c0_56] : memref<144x2048xf32, #tpu.memory_space<vmem>>, vector<16x2048xf32>
    tpu.vector_store %arg11[%c16_55, %c0_56], %89 {strides = array<i32>} : memref<144x2048xf32, #tpu.memory_space<vmem>>, vector<16x2048xf32>,
    %c31_i32_57 = arith.constant 31 : i32
    %91 = tpu.dynamic_rotate %80 by %c31_i32_57 dim 1 : vector<16x2048xf32>, i32 -> vector<16x2048xf32>
    %c2_58 = arith.constant 2 : index
    %c0_59 = arith.constant 0 : index
    %92 = vector.load %arg4[%c2_58, %c0_59] : memref<9x2048xf32, #tpu.memory_space<vmem>>, vector<1x2048xf32>
    %93 = vector.broadcast %92 : vector<1x2048xf32> to vector<16x2048xf32>
    %94 = arith.mulf %91, %93 : vector<16x2048xf32>
    %c32_60 = arith.constant 32 : index
    %c0_61 = arith.constant 0 : index
    %95 = vector.load %arg11[%c32_60, %c0_61] : memref<144x2048xf32, #tpu.memory_space<vmem>>, vector<16x2048xf32>
    tpu.vector_store %arg11[%c32_60, %c0_61], %94 {strides = array<i32>} : memref<144x2048xf32, #tpu.memory_space<vmem>>, vector<16x2048xf32>,
    %c1_i32_62 = arith.constant 1 : i32
    %96 = tpu.dynamic_rotate %80 by %c1_i32_62 dim 1 : vector<16x2048xf32>, i32 -> vector<16x2048xf32>
    %c3_63 = arith.constant 3 : index
    %c0_64 = arith.constant 0 : index
    %97 = vector.load %arg4[%c3_63, %c0_64] : memref<9x2048xf32, #tpu.memory_space<vmem>>, vector<1x2048xf32>
    %98 = vector.broadcast %97 : vector<1x2048xf32> to vector<16x2048xf32>
    %99 = arith.mulf %96, %98 : vector<16x2048xf32>
    %c48 = arith.constant 48 : index
    %c0_65 = arith.constant 0 : index
    %100 = vector.load %arg11[%c48, %c0_65] : memref<144x2048xf32, #tpu.memory_space<vmem>>, vector<16x2048xf32>
    tpu.vector_store %arg11[%c48, %c0_65], %99 {strides = array<i32>} : memref<144x2048xf32, #tpu.memory_space<vmem>>, vector<16x2048xf32>,
    %c64 = arith.constant 64 : index
    %c0_66 = arith.constant 0 : index
    %101 = vector.load %arg11[%c64, %c0_66] : memref<144x2048xf32, #tpu.memory_space<vmem>>, vector<16x2048xf32>
    tpu.vector_store %arg11[%c64, %c0_66], %80 {strides = array<i32>} : memref<144x2048xf32, #tpu.memory_space<vmem>>, vector<16x2048xf32>,
    %c2047_i32_67 = arith.constant 2047 : i32
    %102 = tpu.dynamic_rotate %80 by %c2047_i32_67 dim 1 : vector<16x2048xf32>, i32 -> vector<16x2048xf32>
    %c5_68 = arith.constant 5 : index
    %c0_69 = arith.constant 0 : index
    %103 = vector.load %arg4[%c5_68, %c0_69] : memref<9x2048xf32, #tpu.memory_space<vmem>>, vector<1x2048xf32>
    %104 = vector.broadcast %103 : vector<1x2048xf32> to vector<16x2048xf32>
    %105 = arith.mulf %102, %104 : vector<16x2048xf32>
    %c80 = arith.constant 80 : index
    %c0_70 = arith.constant 0 : index
    %106 = vector.load %arg11[%c80, %c0_70] : memref<144x2048xf32, #tpu.memory_space<vmem>>, vector<16x2048xf32>
    tpu.vector_store %arg11[%c80, %c0_70], %105 {strides = array<i32>} : memref<144x2048xf32, #tpu.memory_space<vmem>>, vector<16x2048xf32>,
    %c2017_i32_71 = arith.constant 2017 : i32
    %107 = tpu.dynamic_rotate %80 by %c2017_i32_71 dim 1 : vector<16x2048xf32>, i32 -> vector<16x2048xf32>
    %c6_72 = arith.constant 6 : index
    %c0_73 = arith.constant 0 : index
    %108 = vector.load %arg4[%c6_72, %c0_73] : memref<9x2048xf32, #tpu.memory_space<vmem>>, vector<1x2048xf32>
    %109 = vector.broadcast %108 : vector<1x2048xf32> to vector<16x2048xf32>
    %110 = arith.mulf %107, %109 : vector<16x2048xf32>
    %c96 = arith.constant 96 : index
    %c0_74 = arith.constant 0 : index
    %111 = vector.load %arg11[%c96, %c0_74] : memref<144x2048xf32, #tpu.memory_space<vmem>>, vector<16x2048xf32>
    tpu.vector_store %arg11[%c96, %c0_74], %110 {strides = array<i32>} : memref<144x2048xf32, #tpu.memory_space<vmem>>, vector<16x2048xf32>,
    %c2016_i32_75 = arith.constant 2016 : i32
    %112 = tpu.dynamic_rotate %80 by %c2016_i32_75 dim 1 : vector<16x2048xf32>, i32 -> vector<16x2048xf32>
    %c7_76 = arith.constant 7 : index
    %c0_77 = arith.constant 0 : index
    %113 = vector.load %arg4[%c7_76, %c0_77] : memref<9x2048xf32, #tpu.memory_space<vmem>>, vector<1x2048xf32>
    %114 = vector.broadcast %113 : vector<1x2048xf32> to vector<16x2048xf32>
    %115 = arith.mulf %112, %114 : vector<16x2048xf32>
    %c112 = arith.constant 112 : index
    %c0_78 = arith.constant 0 : index
    %116 = vector.load %arg11[%c112, %c0_78] : memref<144x2048xf32, #tpu.memory_space<vmem>>, vector<16x2048xf32>
    tpu.vector_store %arg11[%c112, %c0_78], %115 {strides = array<i32>} : memref<144x2048xf32, #tpu.memory_space<vmem>>, vector<16x2048xf32>,
    %c2015_i32_79 = arith.constant 2015 : i32
    %117 = tpu.dynamic_rotate %80 by %c2015_i32_79 dim 1 : vector<16x2048xf32>, i32 -> vector<16x2048xf32>
    %c8_80 = arith.constant 8 : index
    %c0_81 = arith.constant 0 : index
    %118 = vector.load %arg4[%c8_80, %c0_81] : memref<9x2048xf32, #tpu.memory_space<vmem>>, vector<1x2048xf32>
    %119 = vector.broadcast %118 : vector<1x2048xf32> to vector<16x2048xf32>
    %120 = arith.mulf %117, %119 : vector<16x2048xf32>
    %c128 = arith.constant 128 : index
    %c0_82 = arith.constant 0 : index
    %121 = vector.load %arg11[%c128, %c0_82] : memref<144x2048xf32, #tpu.memory_space<vmem>>, vector<16x2048xf32>
    tpu.vector_store %arg11[%c128, %c0_82], %120 {strides = array<i32>} : memref<144x2048xf32, #tpu.memory_space<vmem>>, vector<16x2048xf32>,
    %c0_83 = arith.constant 0 : index
    %c0_84 = arith.constant 0 : index
    %122 = vector.load %arg7[%c0_83, %c0_84] : memref<8x144xf32, #tpu.memory_space<vmem>>, vector<8x144xf32>
    %c0_85 = arith.constant 0 : index
    %c0_86 = arith.constant 0 : index
    %123 = vector.load %arg11[%c0_85, %c0_86] : memref<144x2048xf32, #tpu.memory_space<vmem>>, vector<144x2048xf32>
    %cst_87 = arith.constant dense<0.000000e+00> : vector<8x2048xf32>
    %124 = tpu.matmul %122, %123, %cst_87 {dimension_numbers = #tpu.dot_dimension_numbers<[1], [0], [0], [1], [0, 0, 1, 1], [], []>} : vector<8x144xf32>, vector<144x2048xf32>, vector<8x2048xf32> -> vector<8x2048xf32>
    %c0_88 = arith.constant 0 : index
    %c0_89 = arith.constant 0 : index
    %125 = vector.load %arg8[%c0_88, %c0_89] : memref<8x1xf32, #tpu.memory_space<vmem>>, vector<8x1xf32>
    %126 = vector.broadcast %125 : vector<8x1xf32> to vector<8x2048xf32>
    %127 = arith.addf %124, %126 : vector<8x2048xf32>
    %cst_90 = arith.constant 0.000000e+00 : f32
    %128 = vector.broadcast %cst_90 : f32 to vector<8x2048xf32>
    %129 = arith.cmpf oge, %127, %128 : vector<8x2048xf32>
    %cst_91 = arith.constant 1.000000e-01 : f32
    %130 = vector.broadcast %cst_91 : f32 to vector<8x2048xf32>
    %131 = arith.mulf %130, %127 : vector<8x2048xf32>
    %132 = arith.select %129, %127, %131 : vector<8x2048xi1>, vector<8x2048xf32>
    %c0_92 = arith.constant 0 : index
    %c0_93 = arith.constant 0 : index
    %133 = vector.load %arg9[%c0_92, %c0_93] : memref<8x2048xf32, #tpu.memory_space<vmem>>, vector<8x2048xf32>
    tpu.vector_store %arg9[%c0_92, %c0_93], %132 {strides = array<i32>} : memref<8x2048xf32, #tpu.memory_space<vmem>>, vector<8x2048xf32>,
    return
  }
  func.func @transform_0(%arg0: i32) -> (i32, i32) {
    %c0_i32 = arith.constant 0 : i32
    %c0_i32_0 = arith.constant 0 : i32
    return %c0_i32, %arg0 : i32, i32
  }
  func.func @transform_1(%arg0: i32) -> (i32, i32) {
    %c0_i32 = arith.constant 0 : i32
    %c0_i32_0 = arith.constant 0 : i32
    return %c0_i32, %arg0 : i32, i32
  }
  func.func @transform_2(%arg0: i32) -> (i32, i32) {
    %c0_i32 = arith.constant 0 : i32
    %c0_i32_0 = arith.constant 0 : i32
    %c0_i32_1 = arith.constant 0 : i32
    return %c0_i32, %c0_i32_0 : i32, i32
  }
  func.func @transform_3(%arg0: i32) -> (i32, i32) {
    %c0_i32 = arith.constant 0 : i32
    %c0_i32_0 = arith.constant 0 : i32
    %c0_i32_1 = arith.constant 0 : i32
    return %c0_i32, %c0_i32_0 : i32, i32
  }
  func.func @transform_4(%arg0: i32) -> (i32, i32) {
    %c0_i32 = arith.constant 0 : i32
    %c0_i32_0 = arith.constant 0 : i32
    %c0_i32_1 = arith.constant 0 : i32
    return %c0_i32, %c0_i32_0 : i32, i32
  }
  func.func @transform_5(%arg0: i32) -> (i32, i32) {
    %c0_i32 = arith.constant 0 : i32
    %c0_i32_0 = arith.constant 0 : i32
    %c0_i32_1 = arith.constant 0 : i32
    return %c0_i32, %c0_i32_0 : i32, i32
  }
  func.func @transform_6(%arg0: i32) -> (i32, i32) {
    %c0_i32 = arith.constant 0 : i32
    %c0_i32_0 = arith.constant 0 : i32
    %c0_i32_1 = arith.constant 0 : i32
    return %c0_i32, %c0_i32_0 : i32, i32
  }
  func.func @transform_7(%arg0: i32) -> (i32, i32) {
    %c0_i32 = arith.constant 0 : i32
    %c0_i32_0 = arith.constant 0 : i32
    %c0_i32_1 = arith.constant 0 : i32
    return %c0_i32, %c0_i32_0 : i32, i32
  }
  func.func @transform_8(%arg0: i32) -> (i32, i32) {
    %c0_i32 = arith.constant 0 : i32
    %c0_i32_0 = arith.constant 0 : i32
    return %c0_i32, %arg0 : i32, i32
  }
}

</mosaic_0001>

<bundles_post_ra>
// kernel: up_forward.1
= control target key start
LH: loop header
LB: loop body
LE: loop exit
PB: predicated region body
PF: predicated region fallthrough
CT: control target
= control target key end

     0   :  { %s6772_s9 = smov 1   ;;  %s6773_s18 = smov 127   ;;  %v100_v18 = vlaneseq  ;;  %vm2620_vm8 = vcmask 1043456   ;;  %vm2616_vm9 = vcmask 293888   ;;  %s11590_s0 = inlined_call_operand.vmem [shape: f32[4,2048], index: 0, kind: input, shape index: {}]   ;;  %s11591_s2 = inlined_call_operand.vmem [shape: f32[6,2048], index: 2, kind: input, shape index: {}]   ;;  %s11592_s3 = inlined_call_operand.vmem [shape: f32[9,2048], index: 3, kind: input, shape index: {}]   ;;  %s11593_s4 = inlined_call_operand.vmem [shape: f32[8,36], index: 4, kind: input, shape index: {}]   ;;  %s11594_s1 = inlined_call_operand.vmem [shape: f32[8,2048], index: 1, kind: input, shape index: {}]   ;;  %s11595_s5 = inlined_call_operand.vmem [shape: f32[8,1], index: 5, kind: input, shape index: {}]   ;;  %s11596_s6 = inlined_call_operand.vmem [shape: f32[8,144], index: 6, kind: input, shape index: {}]   ;;  %s11597_s7 = inlined_call_operand.vmem [shape: f32[8,1], index: 7, kind: input, shape index: {}]   ;;  %s11598_s8 = inlined_call_operand.vmem [shape: f32[8,2048], index: 8, kind: output, shape index: {}]  }
   0x1   :  { %v6830_v0 = vld [vmem:[%s11590_s0 + $0x8] sm:$0xff]  ;;  %v6835_v1 = vld [vmem:[%s11590_s0] sm:$0xff]  ;;  %v6852_v4 = vld [vmem:[%s11590_s0 + $0x10] sm:$0xff]  ;;  %s6774_s25 = smov 32   ;;  %s6775_s26 = smov 96  }
   0x2   :  { %72 = vrot.lane.b32.xlu1 %v6830_v0, %s6772_s9  ;;  %68 = vrot.lane.b32.xlu0 %v6835_v1, %s6772_s9  ;;  %v6843_v2 = vcombine.high %v6830_v0, %v6830_v0  ;;  %v6847_v3 = vcombine.high %v6835_v1, %v6835_v1  ;;  %v6860_v5 = vcombine.high %v6852_v4, %v6852_v4  ;;  %v6865_v6 = vld [vmem:[%s11590_s0 + $0x18] sm:$0xff]  ;;  %v6878_v8 = vld [vmem:[%s11590_s0 + $0x20] sm:$0xff]  ;;  %v122_v21 = vshrl.u32 %v100_v18, 7  ;;  %s6777_s11 = smov 31   ;;  %s6778_s12 = smov 97  }
   0x3   :  { %v6873_v7 = vcombine.high %v6865_v6, %v6865_v6  ;;  %v6886_v9 = vcombine.high %v6878_v8, %v6878_v8  ;;  %v6891_v10 = vld [vmem:[%s11590_s0 + $0x38] sm:$0xff]  ;;  %v6924_v12 = vld [vmem:[%s11590_s0 + $0x28] sm:$0xff]  ;;  %v6941_v14 = vld [vmem:[%s11590_s0 + $0x30] sm:$0xff]  ;;  %v6998_v33 = vand.u32 127, %v100_v18  ;;  %s6779_s13 = smov 95  }
   0x4   :  { %11788 = vst [vmem:[#allocation4_spill] sm:$0xff] %v6891_v10  ;;  %v6899_v11 = vcombine.high %v6891_v10, %v6891_v10  ;;  %v6932_v13 = vcombine.high %v6924_v12, %v6924_v12  ;;  %11790 = vst [vmem:[#allocation6_spill] sm:$0xff] %v6941_v14  ;;  %v6949_v15 = vcombine.high %v6941_v14, %v6941_v14  ;;  %v6255_v22 = vld [vmem:[%s11591_s2 + $0x1] ss:$8 sm:$0xf]  ;;  %v6981_v26 = vsub.s32 2, %v122_v21 }
   0x5   :  { %v6256_v23 = vld [vmem:[%s11591_s2 + $0x1] ss:$8 sm:$0xf0]  ;;  %v6985_v28 = vsub.s32 0, %v122_v21  ;;  %v6996_v32 = vsub.s32 4, %v122_v21  ;;  %v7011_v39 = vsub.s32 3, %v122_v21 }
   0x6   :  { %74 = vrot.lane.b32.xlu1 %v6843_v2, %s6772_s9  ;;  %70 = vrot.lane.b32.xlu0 %v6847_v3, %s6772_s9  ;;  %11789 = vst [vmem:[#allocation5_spill] sm:$0xff] %v6899_v11  ;;  %11791 = vst [vmem:[#allocation7_spill] sm:$0xff] %v6949_v15  ;;  %v6983_v27 = vor.u32 %v6256_v23, %v6255_v22  ;;  %v37_v29 = vld [vmem:[%s11591_s2] ss:$8 sm:$0xf]  ;;  %v7013_v40 = vsub.s32 1, %v122_v21 }
   0x7   :  { %11792 = vst [vmem:[#allocation8_spill] sm:$0xff] %v6981_v26  ;;  %11793 = vst [vmem:[#allocation9_spill] sm:$0xff] %v6985_v28  ;;  %v38_v30 = vld [vmem:[%s11591_s2] ss:$8 sm:$0xf0]  ;;  %vm102_vm0 = vcmp.lt.s32.totalorder %v6998_v33, 1 }
   0x8   :  { %v6257_v31 = vld [vmem:[%s11591_s2 + $0x41] ss:$8 sm:$0xf]  ;;  %11794 = vst [vmem:[#allocation10_spill] sm:$0xff] %v6996_v32  ;;  %v238_v36 = vrot.slane %v6983_v27, %v6981_v26  ;;  %v230_v37 = vrot.slane %v6983_v27, %v6985_v28  ;;  %11795 = vst [vmem:[#allocation11_spill] sm:$0xff] %v7011_v39  ;;  %v7015_v41 = vor.u32 %v38_v30, %v37_v29  ;;  %v7032_v47 = vsub.s32 5, %v122_v21 }
   0x9   :  { %v6258_v38 = vld [vmem:[%s11591_s2 + $0x41] ss:$8 sm:$0xf0]  ;;  %11796 = vst [vmem:[#allocation12_spill] sm:$0xff] %v7013_v40  ;;  %v7034_v48 = vsub.s32 6, %v122_v21  ;;  %v7046_v53 = vsub.s32 7, %v122_v21  ;;  %v234_v58 = vrot.slane %v6983_v27, %v7013_v40  ;;  %v242_v21 = vrot.slane %v6983_v27, %v7011_v39 }
   0xa   :  { %78 = vrot.lane.b32.xlu1 %v6860_v5, %s6772_s9  ;;  %76 = vrot.lane.b32.xlu0 %v6852_v4, %s6772_s9  ;;  %v6253_v42 = vld [vmem:[%s11591_s2 + $0x40] ss:$8 sm:$0xf]  ;;  %v6259_v44 = vld [vmem:[%s11591_s2 + $0x2] ss:$8 sm:$0xf]  ;;  %v7029_v46 = vor.u32 %v6258_v38, %v6257_v31  ;;  %v7041_v51 = vmul.f32 %v238_v36, %v6830_v0  ;;  %v7044_v52 = vmul.f32 %v230_v37, %v6835_v1 }
   0xb   :  { %v6254_v43 = vld [vmem:[%s11591_s2 + $0x40] ss:$8 sm:$0xf0]  ;;  %v6260_v45 = vld [vmem:[%s11591_s2 + $0x2] ss:$8 sm:$0xf0]  ;;  %v136_v55 = vrot.slane %v7015_v41, %v7011_v39  ;;  %v128_v56 = vrot.slane %v7015_v41, %v7013_v40  ;;  %v132_v59 = vrot.slane %v7015_v41, %v6981_v26  ;;  %v124_v62 = vrot.slane %v7015_v41, %v6985_v28 }
   0xc   :  { %11797 = vst [vmem:[#allocation13_spill] sm:$0xff] %v7032_v47  ;;  %11798 = vst [vmem:[#allocation14_spill] sm:$0xff] %v7034_v48  ;;  %v7048_v54 = vor.u32 %v6254_v43, %v6253_v42  ;;  %v7054_v57 = vor.u32 %v6260_v45, %v6259_v44  ;;  %v144_v63 = vrot.slane %v7015_v41, %v7032_v47  ;;  %vm379_vm1 = vcmp.lt.s32.totalorder %v6998_v33, 127 }
   0xd   :  { %11799 = vst [vmem:[#allocation15_spill] sm:$0xff] %v7046_v53  ;;  %v308_v38 = vmul.f32 %v234_v58, %v6847_v3  ;;  %v250_v43 = vrot.slane %v6983_v27, %v7032_v47  ;;  %v246_v44 = vrot.slane %v6983_v27, %v6996_v32  ;;  %v258_v45 = vrot.slane %v6983_v27, %v7046_v53 }
   0xe   :  { %82 = vrot.lane.b32.xlu1 %v6873_v7, %s6772_s9  ;;  %80 = vrot.lane.b32.xlu0 %v6865_v6, %s6772_s9  ;;  %v405_v36 = vrot.slane %v7054_v57, %v7013_v40  ;;  %v409_v37 = vrot.slane %v7054_v57, %v6981_v26  ;;  %v413_v58 = vrot.slane %v7054_v57, %v7011_v39  ;;  %vm550_vm2 = vcmp.lt.s32.totalorder %v6998_v33, 32 }
   0xf   :  { %vm827_vm3 = vcmp.lt.s32.totalorder %v6998_v33, 96  ;;  %vm990_vm4 = vcmp.lt.s32.totalorder %v6998_v33, 33  ;;  %vm1378_vm5 = vcmp.lt.s32.totalorder %v6998_v33, 31  ;;  %vm2001_vm6 = vcmp.lt.s32.totalorder %v6998_v33, 97 }
  0x10   :  { %vm2390_vm7 = vcmp.lt.s32.totalorder %v6998_v33, 95 }
  0x12   :  { %86 = vrot.lane.b32.xlu1 %v6886_v9, %s6772_s9  ;;  %84 = vrot.lane.b32.xlu0 %v6878_v8, %s6772_s9 }
  0x16   :  { %349 = vrot.lane.b32.xlu1 %v6847_v3, %s6773_s18  ;;  %98 = vrot.lane.b32.xlu0 %v6899_v11, %s6772_s9  ;;  %v401_v3 = vrot.slane %v7054_v57, %v6985_v28 }
  0x1a   :  { %353 = vrot.lane.b32.xlu1 %v6843_v2, %s6773_s18  ;;  %351 = vrot.lane.b32.xlu0 %v6830_v0, %s6773_s18 }
  0x1e   :  { %347 = vrot.lane.b32.xlu1 %v6835_v1, %s6773_s18  ;;  %355 = vrot.lane.b32.xlu0 %v6852_v4, %s6773_s18 }
  0x22   :  { %359 = vrot.lane.b32.xlu1 %v6865_v6, %s6773_s18  ;;  %357 = vrot.lane.b32.xlu0 %v6860_v5, %s6773_s18 }
  0x26   :  { %363 = vrot.lane.b32.xlu1 %v6878_v8, %s6773_s18  ;;  %361 = vrot.lane.b32.xlu0 %v6873_v7, %s6773_s18 }
  0x2a   :  { %367 = vrot.lane.b32.xlu1 %v6924_v12, %s6773_s18  ;;  %365 = vrot.lane.b32.xlu0 %v6886_v9, %s6773_s18 }
  0x2e   :  { %90 = vrot.lane.b32.xlu1 %v6932_v13, %s6772_s9  ;;  %88 = vrot.lane.b32.xlu0 %v6924_v12, %s6772_s9 }
  0x32   :  { %369 = vrot.lane.b32.xlu1 %v6932_v13, %s6773_s18  ;;  %92 = vrot.lane.b32.xlu0 %v6941_v14, %s6772_s9 }
  0x36   :  { %373 = vrot.lane.b32.xlu1 %v6949_v15, %s6773_s18  ;;  %371 = vrot.lane.b32.xlu0 %v6941_v14, %s6773_s18 }
  0x3a   :  { %375 = vrot.lane.b32.xlu1 %v6891_v10, %s6773_s18  ;;  %94 = vrot.lane.b32.xlu0 %v6949_v15, %s6772_s9 }
  0x3e   :  { %377 = vrot.lane.b32.xlu1 %v6899_v11, %s6773_s18  ;;  %96 = vrot.lane.b32.xlu0 %v6891_v10, %s6772_s9  ;;  %v312_v10 = vmul.f32 %v250_v43, %v6860_v5  ;;  %v6261_v5 = vld [vmem:[%s11591_s2 + $0x42] ss:$8 sm:$0xf] }
  0x74   :  { %v6963_v16 = vpop.permute.xlu1 %72  ;;  %v6965_v17 = vpop.permute.xlu0 %68 }
  0x78   :  { %v6967_v19 = vpop.permute.xlu1 %74  ;;  %v6969_v20 = vpop.permute.xlu0 %70 }
  0x79   :  { %v117_v60 = vsel %vm102_vm0, %v6965_v17, %v6969_v20  ;;  %v115_v22 = vsel %vm102_vm0, %v6963_v16, %v6967_v19  ;;  %v116_v30 = vsel %vm102_vm0, %v6969_v20, %v6963_v16  ;;  %v311_v16 = vmul.f32 %v246_v44, %v6852_v4  ;;  %v6262_v4 = vld [vmem:[%s11591_s2 + $0x42] ss:$8 sm:$0xf0] }
  0x7a   :  { %v202_v31 = vmul.f32 %v128_v56, %v117_v60  ;;  %v204_v56 = vmul.f32 %v136_v55, %v115_v22  ;;  %v254_v55 = vrot.slane %v6983_v27, %v7034_v48  ;;  %v266_v22 = vrot.slane %v7029_v46, %v7013_v40 }
  0x7b   :  { %v314_v20 = vmul.f32 %v258_v45, %v6873_v7  ;;  %v262_v27 = vrot.slane %v7029_v46, %v6985_v28  ;;  %v203_v11 = vmul.f32 %v132_v59, %v116_v30 }
  0x7c   :  { %v6977_v24 = vpop.permute.xlu1 %78  ;;  %v6979_v25 = vpop.permute.xlu0 %76  ;;  %v324_v61 = vadd.f32 %v308_v38, %v202_v31 }
  0x7d   :  { %v113_v23 = vsel %vm102_vm0, %v6979_v25, %v6977_v24  ;;  %v114_v31 = vsel %vm102_vm0, %v6967_v19, %v6979_v25  ;;  %v7160_v19 = vor.u32 %v6262_v4, %v6261_v5 }
  0x7e   :  { %v206_v7 = vmul.f32 %v144_v63, %v113_v23  ;;  %v417_v23 = vrot.slane %v7054_v57, %v6996_v32 }
  0x80   :  { %v7000_v34 = vpop.permute.xlu1 %82  ;;  %v7002_v35 = vpop.permute.xlu0 %80 }
  0x84   :  { %v7036_v49 = vpop.permute.xlu1 %86  ;;  %v7038_v50 = vpop.permute.xlu0 %84 }
  0x88   :  { %v350_v1 = vpop.permute.xlu1 %349  ;;  %v7072_v18 = vpop.permute.xlu0 %98 }
  0x89   :  { %11800 = vst [vmem:[#allocation16_spill] sm:$0xff] %v7072_v18  ;;  %v118_v42 = vsel %vm102_vm0, %v7072_v18, %v6965_v17  ;;  %v310_v17 = vmul.f32 %v242_v21, %v6843_v2 }
  0x8a   :  { %v201_v2 = vmul.f32 %v124_v62, %v118_v42  ;;  %v421_v62 = vrot.slane %v7054_v57, %v7032_v47 }
  0x8c   :  { %v354_v60 = vpop.permute.xlu1 %353  ;;  %v352_v29 = vpop.permute.xlu0 %351  ;;  %v323_v63 = vadd.f32 %v7044_v52, %v201_v2  ;;  %v325_v52 = vadd.f32 %v7041_v51, %v203_v11  ;;  %v11802_v2 = vrot.slane %v7015_v41, %v7046_v53 }
  0x8d   :  { %v393_v0 = vsel %vm379_vm1, %v350_v1, %v352_v29  ;;  %v392_v59 = vsel %vm379_vm1, %v352_v29, %v354_v60  ;;  %v429_v29 = vrot.slane %v7054_v57, %v7046_v53 }
  0x8e   :  { %v479_v21 = vmul.f32 %v405_v36, %v393_v0  ;;  %v326_v0 = vadd.f32 %v310_v17, %v204_v56  ;;  %v480_v25 = vmul.f32 %v409_v37, %v392_v59  ;;  %v11801_v56 = vrot.slane %v7015_v41, %v6996_v32 }
  0x8f   :  { %v328_v17 = vadd.f32 %v312_v10, %v206_v7  ;;  %v112_v37 = vsel %vm102_vm0, %v6977_v24, %v7002_v35  ;;  %v109_v10 = vsel %vm102_vm0, %v7038_v50, %v7036_v49  ;;  %v313_v24 = vmul.f32 %v254_v55, %v6865_v6 }
  0x90   :  { %v7126_v18 = vpop.permute.xlu1 %347  ;;  %v356_v15 = vpop.permute.xlu0 %355  ;;  %v7128_v14 = vadd.f32 %v479_v21, %v324_v61  ;;  %v7193_v5 = vadd.f32 %v480_v25, %v325_v52  ;;  %v437_v7 = vrot.slane %v7160_v19, %v7013_v40  ;;  %v11803_v59 = vrot.slane %v7015_v41, %v7034_v48 }
  0x91   :  { %v394_v61 = vsel %vm379_vm1, %v7126_v18, %v350_v1  ;;  %v391_v30 = vsel %vm379_vm1, %v354_v60, %v356_v15  ;;  %v111_v1 = vsel %vm102_vm0, %v7002_v35, %v7000_v34  ;;  %v205_v60 = vmul.f32 %v11801_v56, %v114_v31 }
  0x92   :  { %v478_v36 = vmul.f32 %v401_v3, %v394_v61  ;;  %v481_v38 = vmul.f32 %v413_v58, %v391_v30  ;;  %520 = vrot.lane.b32.xlu1 %v7128_v14, %s6774_s25  ;;  %v208_v11 = vmul.f32 %v11802_v2, %v111_v1  ;;  %v316_v35 = vmul.f32 %v266_v22, %v6886_v9 }
  0x93   :  { %v207_v61 = vmul.f32 %v11803_v59, %v112_v37  ;;  %v327_v9 = vadd.f32 %v311_v16, %v205_v60  ;;  %v11804_v55 = vrot.slane %v7048_v54, %v7013_v40  ;;  %v270_v31 = vrot.slane %v7029_v46, %v6981_v26 }
  0x94   :  { %v360_v42 = vpop.permute.xlu1 %359  ;;  %v358_v43 = vpop.permute.xlu0 %357  ;;  %v7162_v44 = vadd.f32 %v478_v36, %v323_v63  ;;  %v7164_v45 = vadd.f32 %v481_v38, %v326_v0  ;;  %v330_v41 = vadd.f32 %v314_v20, %v208_v11  ;;  %v110_v16 = vsel %vm102_vm0, %v7000_v34, %v7038_v50 }
  0x95   :  { %v389_v3 = vsel %vm379_vm1, %v358_v43, %v360_v42  ;;  %v390_v58 = vsel %vm379_vm1, %v356_v15, %v358_v43  ;;  %v425_v15 = vrot.slane %v7054_v57, %v7034_v48  ;;  %v210_v22 = vmul.f32 %v11804_v55, %v109_v10 }
  0x96   :  { %v483_v51 = vmul.f32 %v421_v62, %v389_v3  ;;  %518 = vrot.lane.b32.xlu0 %v7162_v44, %s6774_s25  ;;  %524 = vrot.lane.b32.xlu1 %v7164_v45, %s6774_s25  ;;  %v482_v21 = vmul.f32 %v417_v23, %v390_v58  ;;  %v315_v36 = vmul.f32 %v262_v27, %v6878_v8 }
  0x97   :  { %v433_v1 = vrot.slane %v7160_v19, %v6985_v28  ;;  %v164_v34 = vrot.slane %v7048_v54, %v6981_v26  ;;  %v329_v8 = vadd.f32 %v313_v24, %v207_v61  ;;  %v11805_v50 = vrot.slane %v7048_v54, %v6985_v28 }
  0x98   :  { %v364_v62 = vpop.permute.xlu1 %363  ;;  %v362_v0 = vpop.permute.xlu0 %361  ;;  %v7195_v4 = vadd.f32 %v483_v51, %v328_v17  ;;  %v332_v52 = vadd.f32 %v316_v35, %v210_v22  ;;  %v317_v37 = vmul.f32 %v270_v31, %v6924_v12  ;;  %v441_v51 = vrot.slane %v7160_v19, %v6981_v26 }
  0x99   :  { %v387_v57 = vsel %vm379_vm1, %v362_v0, %v364_v62  ;;  %v388_v6 = vsel %vm379_vm1, %v360_v42, %v362_v0  ;;  %v209_v27 = vmul.f32 %v11805_v50, %v110_v16  ;;  %v274_v59 = vrot.slane %v7029_v46, %v7011_v39 }
  0x9a   :  { %v485_v30 = vmul.f32 %v429_v29, %v387_v57  ;;  %522 = vrot.lane.b32.xlu0 %v7193_v5, %s6774_s25  ;;  %528 = vrot.lane.b32.xlu1 %v7195_v4, %s6774_s25  ;;  %v484_v38 = vmul.f32 %v425_v15, %v388_v6  ;;  %v7222_v29 = vadd.f32 %v482_v21, %v327_v9 }
  0x9b   :  { %v331_v10 = vadd.f32 %v315_v36, %v209_v27  ;;  %v278_v61 = vrot.slane %v7029_v46, %v6996_v32  ;;  %v172_v6 = vrot.slane %v7048_v54, %v6996_v32  ;;  %v445_v22 = vrot.slane %v7160_v19, %v7011_v39 }
  0x9c   :  { %v368_v63 = vpop.permute.xlu1 %367  ;;  %v366_v23 = vpop.permute.xlu0 %365  ;;  %v7224_v25 = vadd.f32 %v485_v30, %v330_v41  ;;  %v7239_v58 = vadd.f32 %v484_v38, %v329_v8  ;;  %v449_v41 = vrot.slane %v7160_v19, %v6996_v32  ;;  %v176_v16 = vrot.slane %v7048_v54, %v7032_v47 }
  0x9d   :  { %v385_v20 = vsel %vm379_vm1, %v366_v23, %v368_v63  ;;  %v386_v42 = vsel %vm379_vm1, %v364_v62, %v366_v23  ;;  %v282_v36 = vrot.slane %v7029_v46, %v7032_v47  ;;  %v318_v23 = vmul.f32 %v274_v59, %v6932_v13 }
  0x9e   :  { %v487_v43 = vmul.f32 %v437_v7, %v385_v20  ;;  %526 = vrot.lane.b32.xlu0 %v7222_v29, %s6774_s25  ;;  %532 = vrot.lane.b32.xlu1 %v7224_v25, %s6774_s25  ;;  %v486_v56 = vmul.f32 %v433_v1, %v386_v42  ;;  %v168_v7 = vrot.slane %v7048_v54, %v7011_v39  ;;  %v11806_v20 = vld [vmem:[#allocation6_spill] sm:$0xff] }
  0x9f   :  { %v319_v42 = vmul.f32 %v278_v61, %v11806_v20  ;;  %v453_v27 = vrot.slane %v7160_v19, %v7032_v47  ;;  %v11809_v61 = vld [vmem:[#allocation5_spill] sm:$0xff] }
  0xa0   :  { %v91_v60 = vpop.permute.xlu1 %90  ;;  %v89_v3 = vpop.permute.xlu0 %88  ;;  %v7241_v17 = vadd.f32 %v487_v43, %v332_v52  ;;  %v7253_v24 = vadd.f32 %v486_v56, %v331_v10  ;;  %v11807_v56 = vld [vmem:[#allocation7_spill] sm:$0xff]  ;;  %v290_v10 = vrot.slane %v7029_v46, %v7046_v53 }
  0xa1   :  { %v108_v2 = vsel %vm102_vm0, %v7036_v49, %v89_v3  ;;  %v107_v57 = vsel %vm102_vm0, %v89_v3, %v91_v60 }
  0xa2   :  { %v211_v11 = vmul.f32 %v164_v34, %v108_v2  ;;  %530 = vrot.lane.b32.xlu0 %v7239_v58, %s6774_s25  ;;  %536 = vrot.lane.b32.xlu1 %v7241_v17, %s6774_s25  ;;  %v212_v38 = vmul.f32 %v168_v7, %v107_v57  ;;  %v180_v7 = vrot.slane %v7048_v54, %v7034_v48 }
  0xa3   :  { %v322_v57 = vmul.f32 %v290_v10, %v11809_v61 }
  0xa4   :  { %v370_v15 = vpop.permute.xlu1 %369  ;;  %v333_v49 = vadd.f32 %v317_v37, %v211_v11  ;;  %v93_v21 = vpop.permute.xlu0 %92  ;;  %v334_v13 = vadd.f32 %v318_v23, %v212_v38  ;;  %v184_v11 = vrot.slane %v7048_v54, %v7046_v53 }
  0xa5   :  { %v384_v12 = vsel %vm379_vm1, %v368_v63, %v370_v15  ;;  %v106_v55 = vsel %vm102_vm0, %v91_v60, %v93_v21  ;;  %v320_v60 = vmul.f32 %v282_v36, %v11807_v56  ;;  %v6263_v56 = vld [vmem:[%s11591_s2 + $0x3] ss:$8 sm:$0xf] }
  0xa6   :  { %v488_v35 = vmul.f32 %v441_v51, %v384_v12  ;;  %534 = vrot.lane.b32.xlu0 %v7253_v24, %s6774_s25  ;;  %799 = vrot.lane.b32.xlu1 %v7193_v5, %s6775_s26  ;;  %v213_v34 = vmul.f32 %v172_v6, %v106_v55  ;;  %v11808_v12 = vld [vmem:[#allocation16_spill] sm:$0xff]  ;;  %v286_v6 = vrot.slane %v7029_v46, %v7034_v48 }
  0xa7   :  { %v457_v46 = vrot.slane %v7160_v19, %v7034_v48 }
  0xa8   :  { %v7261_v62 = vadd.f32 %v488_v35, %v333_v49  ;;  %v372_v0 = vpop.permute.xlu0 %371  ;;  %v374_v9 = vpop.permute.xlu1 %373  ;;  %v335_v2 = vadd.f32 %v319_v42, %v213_v34 }
  0xa9   :  { %v383_v31 = vsel %vm379_vm1, %v370_v15, %v372_v0  ;;  %v382_v63 = vsel %vm379_vm1, %v372_v0, %v374_v9 }
  0xaa   :  { %538 = vrot.lane.b32.xlu0 %v7261_v62, %s6774_s25  ;;  %803 = vrot.lane.b32.xlu1 %v7222_v29, %s6775_s26  ;;  %v489_v8 = vmul.f32 %v445_v22, %v383_v31  ;;  %v490_v50 = vmul.f32 %v449_v41, %v382_v63  ;;  %v461_v22 = vrot.slane %v7160_v19, %v7046_v53  ;;  %v11810_v31 = vld [vmem:[#allocation4_spill] sm:$0xff] }
  0xac   :  { %v95_v30 = vpop.permute.xlu0 %94  ;;  %v376_v43 = vpop.permute.xlu1 %375  ;;  %v7318_v51 = vadd.f32 %v489_v8, %v334_v13  ;;  %v7325_v49 = vadd.f32 %v490_v50, %v335_v2  ;;  %v6269_v2 = vld [vmem:[%s11591_s2 + $0x44] ss:$8 sm:$0xf] }
  0xad   :  { %v105_v1 = vsel %vm102_vm0, %v93_v21, %v95_v30  ;;  %v381_v3 = vsel %vm379_vm1, %v374_v9, %v376_v43 }
  0xae   :  { %801 = vrot.lane.b32.xlu0 %v7164_v45, %s6775_s26  ;;  %805 = vrot.lane.b32.xlu1 %v7195_v4, %s6775_s26  ;;  %v214_v52 = vmul.f32 %v176_v16, %v105_v1  ;;  %v491_v15 = vmul.f32 %v453_v27, %v381_v3  ;;  %v321_v16 = vmul.f32 %v286_v6, %v11810_v31 }
  0xb0   :  { %v97_v37 = vpop.permute.xlu0 %96  ;;  %v336_v21 = vadd.f32 %v320_v60, %v214_v52  ;;  %v378_v0 = vpop.permute.xlu1 %377  ;;  %v6268_v52 = vld [vmem:[%s11591_s2 + $0x4] ss:$8 sm:$0xf0]  ;;  %v6264_v60 = vld [vmem:[%s11591_s2 + $0x3] ss:$8 sm:$0xf0] }
  0xb1   :  { %v103_v35 = vsel %vm102_vm0, %v97_v37, %v11808_v12  ;;  %v104_v9 = vsel %vm102_vm0, %v95_v30, %v97_v37  ;;  %v395_v54 = vsel %vm379_vm1, %v378_v0, %v7126_v18  ;;  %v380_v36 = vsel %vm379_vm1, %v376_v43, %v378_v0  ;;  %v6267_v43 = vld [vmem:[%s11591_s2 + $0x4] ss:$8 sm:$0xf]  ;;  %v6271_v12 = vld [vmem:[%s11591_s2 + $0x5] ss:$8 sm:$0xf] }
  0xb2   :  { %797 = vrot.lane.b32.xlu0 %v7128_v14, %s6775_s26  ;;  %809 = vrot.lane.b32.xlu1 %v7224_v25, %s6775_s26  ;;  %v216_v59 = vmul.f32 %v184_v11, %v103_v35  ;;  %v7338_v55 = vadd.f32 %v491_v15, %v336_v21  ;;  %v215_v41 = vmul.f32 %v180_v7, %v104_v9  ;;  %v6270_v11 = vld [vmem:[%s11591_s2 + $0x44] ss:$8 sm:$0xf0]  ;;  %v6272_v35 = vld [vmem:[%s11591_s2 + $0x5] ss:$8 sm:$0xf0] }
  0xb3   :  { %v493_v38 = vmul.f32 %v461_v22, %v395_v54  ;;  %v492_v18 = vmul.f32 %v457_v46, %v380_v36  ;;  %v7390_v3 = vor.u32 %v6268_v52, %v6267_v43  ;;  %v7402_v10 = vor.u32 %v6264_v60, %v6263_v56  ;;  %v6265_v43 = vld [vmem:[%s11591_s2 + $0x43] ss:$8 sm:$0xf] }
  0xb4   :  { %v338_v30 = vadd.f32 %v322_v57, %v216_v59  ;;  %v337_v1 = vadd.f32 %v321_v16, %v215_v41  ;;  %v7404_v15 = vor.u32 %v6270_v11, %v6269_v2 }
  0xb5   :  { %v682_v21 = vrot.slane %v7390_v3, %v7013_v40  ;;  %v580_v0 = vrot.slane %v7402_v10, %v6981_v26  ;;  %v584_v7 = vrot.slane %v7402_v10, %v7011_v39  ;;  %v686_v57 = vrot.slane %v7390_v3, %v6981_v26 }
  0xb6   :  { %807 = vrot.lane.b32.xlu0 %v7239_v58, %s6775_s26  ;;  %813 = vrot.lane.b32.xlu1 %v7241_v17, %s6775_s26  ;;  %v7358_v63 = vadd.f32 %v493_v38, %v338_v30  ;;  %v7364_v19 = vadd.f32 %v492_v18, %v337_v1  ;;  %v690_v6 = vrot.slane %v7390_v3, %v7011_v39 }
  0xb7   :  { %v588_v54 = vrot.slane %v7402_v10, %v6996_v32  ;;  %v694_v46 = vrot.slane %v7390_v3, %v6996_v32  ;;  %v7435_v30 = vor.u32 %v6272_v35, %v6271_v12  ;;  %v702_v16 = vrot.slane %v7390_v3, %v7034_v48 }
  0xb8   :  { %11811 = vst [vmem:[#allocation6_spill] sm:$0xff] %v7364_v19  ;;  %v576_v18 = vrot.slane %v7402_v10, %v7013_v40  ;;  %v757_v11 = vmul.f32 %v686_v57, %v7193_v5  ;;  %v758_v12 = vmul.f32 %v690_v6, %v7164_v45  ;;  %v596_v45 = vrot.slane %v7402_v10, %v7034_v48 }
  0xb9   :  { %v853_v38 = vrot.slane %v7435_v30, %v7013_v40 }
  0xba   :  { %811 = vrot.lane.b32.xlu0 %v7253_v24, %s6775_s26  ;;  %815 = vrot.lane.b32.xlu1 %v7261_v62, %s6775_s26 }
  0xbe   :  { %540 = vrot.lane.b32.xlu0 %v7318_v51, %s6774_s25  ;;  %819 = vrot.lane.b32.xlu1 %v7325_v49, %s6775_s26 }
  0xc2   :  { %817 = vrot.lane.b32.xlu0 %v7318_v51, %s6775_s26  ;;  %821 = vrot.lane.b32.xlu1 %v7338_v55, %s6775_s26 }
  0xc6   :  { %542 = vrot.lane.b32.xlu0 %v7325_v49, %s6774_s25  ;;  %544 = vrot.lane.b32.xlu1 %v7338_v55, %s6774_s25 }
  0xca   :  { %548 = vrot.lane.b32.xlu0 %v7358_v63, %s6774_s25  ;;  %795 = vrot.lane.b32.xlu1 %v7162_v44, %s6775_s26 }
  0xce   :  { %546 = vrot.lane.b32.xlu0 %v7364_v19, %s6774_s25  ;;  %825 = vrot.lane.b32.xlu1 %v7358_v63, %s6775_s26 }
  0xd2   :  { %823 = vrot.lane.b32.xlu0 %v7364_v19, %s6775_s26 }
 0x104   :  { %v521_v23 = vpop.permute.xlu1 %520 }
 0x108   :  { %v7372_v20 = vpop.permute.xlu0 %518  ;;  %v525_v42 = vpop.permute.xlu1 %524 }
 0x109   :  { %v565_v2 = vsel %vm550_vm2, %v7372_v20, %v521_v23 }
 0x10a   :  { %v650_v57 = vmul.f32 %v576_v18, %v565_v2 }
 0x10c   :  { %v523_v34 = vpop.permute.xlu0 %522  ;;  %v7374_v8 = vpop.permute.xlu1 %528 }
 0x10d   :  { %v563_v9 = vsel %vm550_vm2, %v523_v34, %v525_v42  ;;  %v564_v22 = vsel %vm550_vm2, %v521_v23, %v523_v34  ;;  %v759_v23 = vmul.f32 %v694_v46, %v7222_v29 }
 0x10e   :  { %v651_v1 = vmul.f32 %v580_v0, %v564_v22  ;;  %v652_v34 = vmul.f32 %v584_v7, %v563_v9  ;;  %v857_v0 = vrot.slane %v7435_v30, %v6981_v26  ;;  %v861_v7 = vrot.slane %v7435_v30, %v7011_v39 }
 0x10f   :  { %v865_v9 = vrot.slane %v7435_v30, %v6996_v32  ;;  %v592_v22 = vrot.slane %v7402_v10, %v7032_v47 }
 0x110   :  { %v527_v50 = vpop.permute.xlu0 %526  ;;  %v7376_v27 = vpop.permute.xlu1 %532  ;;  %v773_v6 = vadd.f32 %v757_v11, %v651_v1  ;;  %v6273_v1 = vld [vmem:[%s11591_s2 + $0x45] ss:$8 sm:$0xf]  ;;  %v756_v11 = vmul.f32 %v682_v21, %v7128_v14 }
 0x111   :  { %v562_v31 = vsel %vm550_vm2, %v525_v42, %v527_v50  ;;  %v6266_v42 = vld [vmem:[%s11591_s2 + $0x43] ss:$8 sm:$0xf0]  ;;  %v561_v36 = vsel %vm550_vm2, %v527_v50, %v7374_v8 }
 0x112   :  { %v653_v35 = vmul.f32 %v588_v54, %v562_v31  ;;  %v7474_v5 = vor.u32 %v6266_v42, %v6265_v43  ;;  %v774_v54 = vadd.f32 %v758_v12, %v652_v34  ;;  %v6274_v34 = vld [vmem:[%s11591_s2 + $0x45] ss:$8 sm:$0xf0]  ;;  %v600_v12 = vrot.slane %v7402_v10, %v7046_v53  ;;  %s6776_s2 = smov 33  }
 0x113   :  { %v7510_v14 = vor.u32 %v6274_v34, %v6273_v1  ;;  %v654_v21 = vmul.f32 %v592_v22, %v561_v36  ;;  %v11812_v36 = vrot.slane %v7390_v3, %v7032_v47 }
 0x114   :  { %v7392_v37 = vpop.permute.xlu0 %530  ;;  %v7394_v13 = vpop.permute.xlu1 %536  ;;  %v775_v43 = vadd.f32 %v759_v23, %v653_v35  ;;  %v873_v23 = vrot.slane %v7435_v30, %v7034_v48 }
 0x115   :  { %v760_v22 = vmul.f32 %v11812_v36, %v7195_v4  ;;  %v877_v4 = vrot.slane %v7435_v30, %v7046_v53 }
 0x118   :  { %v7419_v59 = vpop.permute.xlu0 %534  ;;  %v800_v61 = vpop.permute.xlu1 %799 }
 0x11c   :  { %v7455_v56 = vpop.permute.xlu0 %538  ;;  %v804_v60 = vpop.permute.xlu1 %803 }
 0x120   :  { %v802_v31 = vpop.permute.xlu0 %801  ;;  %v806_v52 = vpop.permute.xlu1 %805 }
 0x121   :  { %v839_v29 = vsel %vm827_vm3, %v802_v31, %v804_v60  ;;  %v840_v46 = vsel %vm827_vm3, %v800_v61, %v802_v31  ;;  %v838_v18 = vsel %vm827_vm3, %v804_v60, %v806_v52  ;;  %v560_v60 = vsel %vm550_vm2, %v7374_v8, %v7392_v37 }
 0x122   :  { %v928_v42 = vmul.f32 %v857_v0, %v840_v46  ;;  %v929_v50 = vmul.f32 %v861_v7, %v839_v29  ;;  %v930_v2 = vmul.f32 %v865_v9, %v838_v18  ;;  %v604_v31 = vrot.slane %v7474_v5, %v6985_v28 }
 0x123   :  { %v869_v8 = vrot.slane %v7435_v30, %v7032_v47  ;;  %v655_v29 = vmul.f32 %v596_v45, %v560_v60  ;;  %v608_v46 = vrot.slane %v7474_v5, %v7013_v40 }
 0x124   :  { %v7502_v41 = vadd.f32 %v928_v42, %v773_v6  ;;  %v7504_v19 = vadd.f32 %v929_v50, %v774_v54  ;;  %v7506_v35 = vadd.f32 %v930_v2, %v775_v43  ;;  %v7508_v0 = vpop.permute.xlu0 %797  ;;  %v810_v9 = vpop.permute.xlu1 %809  ;;  %v772_v6 = vadd.f32 %v756_v11, %v650_v57 }
 0x125   :  { %v841_v7 = vsel %vm827_vm3, %v7508_v0, %v800_v61  ;;  %v559_v54 = vsel %vm550_vm2, %v7392_v37, %v7376_v27  ;;  %v761_v57 = vmul.f32 %v702_v16, %v7239_v58  ;;  %v558_v37 = vsel %vm550_vm2, %v7376_v27, %v7419_v59 }
 0x126   :  { %1737 = vst [vmem:[#allocation2 + $0x110] sm:$0xf] %v7502_v41  ;;  %1738 = vst [vmem:[#allocation2 + $0x118] sm:$0xf] %v7504_v19  ;;  %v927_v61 = vmul.f32 %v853_v38, %v841_v7  ;;  %v557_v38 = vsel %vm550_vm2, %v7419_v59, %v7394_v13  ;;  %v881_v58 = vrot.slane %v7510_v14, %v6985_v28 }
 0x127   :  { %1739 = vst [vmem:[#allocation2 + $0x120] sm:$0xf] %v7506_v35  ;;  %v776_v16 = vadd.f32 %v760_v22, %v654_v21  ;;  %v656_v1 = vmul.f32 %v600_v12, %v559_v54  ;;  %v777_v42 = vadd.f32 %v761_v57, %v655_v29  ;;  %v657_v59 = vmul.f32 %v604_v31, %v558_v37 }
 0x128   :  { %v7541_v45 = vadd.f32 %v927_v61, %v772_v6  ;;  %v808_v18 = vpop.permute.xlu0 %807  ;;  %v814_v43 = vpop.permute.xlu1 %813  ;;  %v11813_v11 = vrot.slane %v7390_v3, %v7046_v53  ;;  %v658_v60 = vmul.f32 %v608_v46, %v557_v38  ;;  %v885_v31 = vrot.slane %v7510_v14, %v7013_v40 }
 0x129   :  { %v836_v34 = vsel %vm827_vm3, %v808_v18, %v810_v9  ;;  %v837_v27 = vsel %vm827_vm3, %v806_v52, %v808_v18  ;;  %v612_v52 = vrot.slane %v7474_v5, %v6981_v26  ;;  %v11814_v21 = vrot.slane %v7404_v15, %v6985_v28 }
 0x12a   :  { %1736 = vst [vmem:[#allocation2 + $0x108] sm:$0xf] %v7541_v45  ;;  %v931_v50 = vmul.f32 %v869_v8, %v837_v27  ;;  %v932_v2 = vmul.f32 %v873_v23, %v836_v34  ;;  %960 = vrot.lane.b32.xlu1 %v7541_v45, %s6776_s2  ;;  %v762_v12 = vmul.f32 %v11813_v11, %v7224_v25 }
 0x12b   :  { %v763_v7 = vmul.f32 %v11814_v21, %v7253_v24  ;;  %v11815_v8 = vrot.slane %v7404_v15, %v7013_v40  ;;  %v616_v24 = vrot.slane %v7474_v5, %v7011_v39  ;;  %v620_v21 = vrot.slane %v7474_v5, %v6996_v32 }
 0x12c   :  { %v7570_v6 = vadd.f32 %v931_v50, %v776_v16  ;;  %v7572_v25 = vadd.f32 %v932_v2, %v777_v42  ;;  %v812_v54 = vpop.permute.xlu0 %811  ;;  %v778_v29 = vadd.f32 %v762_v12, %v656_v1  ;;  %v816_v22 = vpop.permute.xlu1 %815  ;;  %v718_v16 = vrot.slane %v7404_v15, %v6981_v26 }
 0x12d   :  { %v764_v23 = vmul.f32 %v11815_v8, %v7241_v17  ;;  %v834_v61 = vsel %vm827_vm3, %v812_v54, %v814_v43  ;;  %v835_v36 = vsel %vm827_vm3, %v810_v9, %v812_v54  ;;  %v779_v57 = vadd.f32 %v763_v7, %v657_v59 }
 0x12e   :  { %1740 = vst [vmem:[#allocation2 + $0x128] sm:$0xf] %v7570_v6  ;;  %1741 = vst [vmem:[#allocation2 + $0x130] sm:$0xf] %v7572_v25  ;;  %v933_v17 = vmul.f32 %v877_v4, %v835_v36  ;;  %v934_v46 = vmul.f32 %v881_v58, %v834_v61  ;;  %v833_v37 = vsel %vm827_vm3, %v814_v43, %v816_v22  ;;  %964 = vrot.lane.b32.xlu1 %v7504_v19, %s6776_s2 }
 0x12f   :  { %v780_v38 = vadd.f32 %v764_v23, %v658_v60  ;;  %v556_v9 = vsel %vm550_vm2, %v7394_v13, %v7455_v56  ;;  %v935_v18 = vmul.f32 %v885_v31, %v833_v37  ;;  %v722_v58 = vrot.slane %v7404_v15, %v7011_v39 }
 0x130   :  { %v7592_v1 = vadd.f32 %v933_v17, %v778_v29  ;;  %v7594_v4 = vadd.f32 %v934_v46, %v779_v57  ;;  %v541_v34 = vpop.permute.xlu0 %540  ;;  %v820_v42 = vpop.permute.xlu1 %819  ;;  %v659_v13 = vmul.f32 %v612_v52, %v556_v9  ;;  %v889_v50 = vrot.slane %v7510_v14, %v6981_v26 }
 0x131   :  { %v7598_v27 = vadd.f32 %v935_v18, %v780_v38  ;;  %v555_v43 = vsel %vm550_vm2, %v7455_v56, %v541_v34  ;;  %v893_v2 = vrot.slane %v7510_v14, %v7011_v39  ;;  %v765_v56 = vmul.f32 %v718_v16, %v7261_v62 }
 0x132   :  { %1742 = vst [vmem:[#allocation2 + $0x138] sm:$0xf] %v7592_v1  ;;  %1743 = vst [vmem:[#allocation2 + $0x140] sm:$0xf] %v7594_v4  ;;  %v660_v59 = vmul.f32 %v616_v24, %v555_v43  ;;  %968 = vrot.lane.b32.xlu1 %v7570_v6, %s6776_s2  ;;  %v766_v11 = vmul.f32 %v722_v58, %v7318_v51  ;;  %v726_v7 = vrot.slane %v7404_v15, %v6996_v32 }
 0x133   :  { %1744 = vst [vmem:[#allocation2 + $0x148] sm:$0xf] %v7598_v27  ;;  %v781_v8 = vadd.f32 %v765_v56, %v659_v13  ;;  %v897_v61 = vrot.slane %v7510_v14, %v6996_v32  ;;  %v738_v38 = vrot.slane %v7404_v15, %v7046_v53  ;;  %v632_v13 = vrot.slane %v7474_v5, %v7046_v53 }
 0x134   :  { %v818_v12 = vpop.permute.xlu0 %817  ;;  %v7618_v31 = vpop.permute.xlu1 %821  ;;  %v782_v23 = vadd.f32 %v766_v11, %v660_v59  ;;  %v767_v46 = vmul.f32 %v726_v7, %v7325_v49  ;;  %v624_v49 = vrot.slane %v7474_v5, %v7032_v47 }
 0x135   :  { %v831_v60 = vsel %vm827_vm3, %v818_v12, %v820_v42  ;;  %v832_v52 = vsel %vm827_vm3, %v816_v22, %v818_v12  ;;  %v678_v22 = vrot.slane %v7390_v3, %v6985_v28  ;;  %v830_v24 = vsel %vm827_vm3, %v820_v42, %v7618_v31 }
 0x136   :  { %v936_v62 = vmul.f32 %v889_v50, %v832_v52  ;;  %v937_v54 = vmul.f32 %v893_v2, %v831_v60  ;;  %972 = vrot.lane.b32.xlu1 %v7592_v1, %s6776_s2  ;;  %v572_v3 = vrot.slane %v7402_v10, %v6985_v28  ;;  %v938_v9 = vmul.f32 %v897_v61, %v830_v24 }
 0x137   :  { %v755_v16 = vmul.f32 %v678_v22, %v7162_v44  ;;  %v628_v10 = vrot.slane %v7474_v5, %v7034_v48  ;;  %v734_v2 = vrot.slane %v7404_v15, %v7034_v48  ;;  %v770_v5 = vmul.f32 %v738_v38, %v7358_v63 }
 0x138   :  { %v7626_v51 = vadd.f32 %v936_v62, %v781_v8  ;;  %v7628_v29 = vadd.f32 %v937_v54, %v782_v23  ;;  %v543_v36 = vpop.permute.xlu0 %542  ;;  %v545_v17 = vpop.permute.xlu1 %544  ;;  %v909_v60 = vrot.slane %v7510_v14, %v7046_v53  ;;  %v905_v63 = vrot.slane %v7510_v14, %v7034_v48 }
 0x139   :  { %v554_v57 = vsel %vm550_vm2, %v541_v34, %v543_v36  ;;  %v849_v34 = vrot.slane %v7435_v30, %v6985_v28  ;;  %v553_v44 = vsel %vm550_vm2, %v543_v36, %v545_v17  ;;  %v11816_v36 = vld [vmem:[#allocation6_spill] sm:$0xff] }
 0x13a   :  { %1745 = vst [vmem:[#allocation2 + $0x150] sm:$0xf] %v7626_v51  ;;  %1746 = vst [vmem:[#allocation2 + $0x158] sm:$0xf] %v7628_v29  ;;  %v661_v37 = vmul.f32 %v620_v21, %v554_v57  ;;  %976 = vrot.lane.b32.xlu1 %v7598_v27, %s6776_s2  ;;  %v662_v52 = vmul.f32 %v624_v49, %v553_v44  ;;  %v769_v22 = vmul.f32 %v734_v2, %v11816_v36 }
 0x13b   :  { %v1007_v49 = vld [vmem:[%s11592_s3] ss:$8 sm:$0xf] }
 0x13c   :  { %v783_v18 = vadd.f32 %v767_v46, %v661_v37  ;;  %v549_v58 = vpop.permute.xlu0 %548  ;;  %v796_v42 = vpop.permute.xlu1 %795 }
 0x13d   :  { %v566_v43 = vsel %vm550_vm2, %v549_v58, %v7372_v20  ;;  %v842_v50 = vsel %vm827_vm3, %v796_v42, %v7508_v0  ;;  %v730_v20 = vrot.slane %v7404_v15, %v7032_v47  ;;  %v901_v0 = vrot.slane %v7510_v14, %v7032_v47 }
 0x13e   :  { %v7660_v59 = vadd.f32 %v938_v9, %v783_v18  ;;  %v649_v30 = vmul.f32 %v572_v3, %v566_v43  ;;  %1132 = vrot.lane.b32.xlu1 %v7502_v41, %s6774_s25  ;;  %v926_v11 = vmul.f32 %v849_v34, %v842_v50  ;;  %v1008_v43 = vld [vmem:[%s11592_s3] ss:$8 sm:$0xf0] }
 0x13f   :  { %v768_v61 = vmul.f32 %v730_v20, %v7338_v55  ;;  %v7840_v44 = vor.u32 %v1008_v43, %v1007_v49 }
 0x140   :  { %1747 = vst [vmem:[#allocation2 + $0x160] sm:$0xf] %v7660_v59  ;;  %v771_v56 = vadd.f32 %v755_v16, %v649_v30  ;;  %v547_v12 = vpop.permute.xlu0 %546  ;;  %v826_v7 = vpop.permute.xlu1 %825 }
 0x141   :  { %v551_v21 = vsel %vm550_vm2, %v547_v12, %v549_v58  ;;  %v552_v15 = vsel %vm550_vm2, %v545_v17, %v547_v12  ;;  %v843_v54 = vsel %vm827_vm3, %v826_v7, %v796_v42  ;;  %v784_v14 = vadd.f32 %v768_v61, %v662_v52  ;;  %v6277_v42 = vld [vmem:[%s11592_s3 + $0x1] ss:$8 sm:$0xf]  ;;  %v6282_v12 = vld [vmem:[%s11592_s3 + $0x2] ss:$8 sm:$0xf0] }
 0x142   :  { %v7685_v8 = vadd.f32 %v926_v11, %v771_v56  ;;  %v663_v23 = vmul.f32 %v628_v10, %v552_v15  ;;  %v664_v62 = vmul.f32 %v632_v13, %v551_v21  ;;  %1521 = vrot.lane.b32.xlu1 %v7502_v41, %s6772_s9  ;;  %v941_v57 = vmul.f32 %v909_v60, %v843_v54  ;;  %v6278_v10 = vld [vmem:[%s11592_s3 + $0x1] ss:$8 sm:$0xf0]  ;;  %v6281_v11 = vld [vmem:[%s11592_s3 + $0x2] ss:$8 sm:$0xf] }
 0x143   :  { %v7844_v30 = vor.u32 %v6278_v10, %v6277_v42  ;;  %v1023_v20 = vrot.slane %v7840_v44, %v7013_v40  ;;  %v1027_v52 = vrot.slane %v7840_v44, %v6981_v26  ;;  %v1031_v21 = vrot.slane %v7840_v44, %v7011_v39 }
 0x144   :  { %1735 = vst [vmem:[#allocation2 + $0x100] sm:$0xf] %v7685_v8  ;;  %v786_v24 = vadd.f32 %v770_v5, %v664_v62  ;;  %v824_v17 = vpop.permute.xlu0 %823  ;;  %958 = vrot.lane.b32.xlu0 %v7685_v8, %s6776_s2  ;;  %v785_v3 = vadd.f32 %v769_v22, %v663_v23  ;;  %v7882_v23 = vor.u32 %v6282_v12, %v6281_v11 }
 0x145   :  { %v828_v46 = vsel %vm827_vm3, %v824_v17, %v826_v7  ;;  %v829_v37 = vsel %vm827_vm3, %v7618_v31, %v824_v17  ;;  %11817 = vst [vmem:[#allocation7_spill] sm:$0xff] %v7844_v30  ;;  %v1197_v5 = vrot.slane %v7844_v30, %v6981_v26  ;;  %v1035_v61 = vrot.slane %v7840_v44, %v6996_v32 }
 0x146   :  { %v7701_v55 = vadd.f32 %v941_v57, %v786_v24  ;;  %v939_v38 = vmul.f32 %v901_v0, %v829_v37  ;;  %v940_v9 = vmul.f32 %v905_v63, %v828_v46  ;;  %1130 = vrot.lane.b32.xlu1 %v7541_v45, %s6774_s25  ;;  %v1039_v17 = vrot.slane %v7840_v44, %v7032_v47  ;;  %v6276_v46 = vld [vmem:[%s11592_s3 + $0x40] ss:$8 sm:$0xf0] }
 0x147   :  { %v1047_v10 = vrot.slane %v7840_v44, %v7046_v53 }
 0x148   :  { %1750 = vst [vmem:[#allocation2 + $0x178] sm:$0xf] %v7701_v55  ;;  %v7706_v18 = vadd.f32 %v939_v38, %v784_v14  ;;  %v7708_v16 = vadd.f32 %v940_v9, %v785_v3  ;;  %962 = vrot.lane.b32.xlu0 %v7502_v41, %s6776_s2  ;;  %v6275_v14 = vld [vmem:[%s11592_s3 + $0x40] ss:$8 sm:$0xf]  ;;  %v1416_v3 = vrot.slane %v7882_v23, %v6981_v26 }
 0x14a   :  { %1748 = vst [vmem:[#allocation2 + $0x168] sm:$0xf] %v7706_v18  ;;  %1749 = vst [vmem:[#allocation2 + $0x170] sm:$0xf] %v7708_v16  ;;  %1350 = vrot.lane.b32.xlu1 %v7502_v41, %s6777_s11 }
 0x14c   :  { %966 = vrot.lane.b32.xlu0 %v7506_v35, %s6776_s2 }
 0x14e   :  { %1348 = vrot.lane.b32.xlu1 %v7541_v45, %s6777_s11 }
 0x150   :  { %970 = vrot.lane.b32.xlu0 %v7572_v25, %s6776_s2 }
 0x152   :  { %1759 = vrot.lane.b32.xlu1 %v7506_v35, %s6773_s18 }
 0x154   :  { %974 = vrot.lane.b32.xlu0 %v7594_v4, %s6776_s2 }
 0x156   :  { %2148 = vrot.lane.b32.xlu1 %v7506_v35, %s6775_s26 }
 0x158   :  { %978 = vrot.lane.b32.xlu0 %v7626_v51, %s6776_s2 }
 0x15a   :  { %2144 = vrot.lane.b32.xlu1 %v7502_v41, %s6775_s26 }
 0x15c   :  { %1134 = vrot.lane.b32.xlu0 %v7504_v19, %s6774_s25 }
 0x15e   :  { %1977 = vrot.lane.b32.xlu1 %v7506_v35, %s6778_s12 }
 0x160   :  { %1523 = vrot.lane.b32.xlu0 %v7504_v19, %s6772_s9 }
 0x162   :  { %1140 = vrot.lane.b32.xlu1 %v7572_v25, %s6774_s25 }
 0x164   :  { %1519 = vrot.lane.b32.xlu0 %v7541_v45, %s6772_s9 }
 0x166   :  { %1529 = vrot.lane.b32.xlu1 %v7572_v25, %s6772_s9 }
 0x168   :  { %1352 = vrot.lane.b32.xlu0 %v7504_v19, %s6777_s11 }
 0x16a   :  { %1138 = vrot.lane.b32.xlu1 %v7570_v6, %s6774_s25 }
 0x16c   :  { %1757 = vrot.lane.b32.xlu0 %v7504_v19, %s6773_s18 }
 0x16e   :  { %1358 = vrot.lane.b32.xlu1 %v7572_v25, %s6777_s11 }
 0x170   :  { %2146 = vrot.lane.b32.xlu0 %v7504_v19, %s6775_s26 }
 0x172   :  { %2364 = vrot.lane.b32.xlu1 %v7504_v19, %s6779_s13 }
 0x174   :  { %1755 = vrot.lane.b32.xlu0 %v7502_v41, %s6773_s18 }
 0x176   :  { %1356 = vrot.lane.b32.xlu1 %v7570_v6, %s6777_s11 }
 0x178   :  { %1975 = vrot.lane.b32.xlu0 %v7504_v19, %s6778_s12  ;;  %v11605_v19 = vmov 0.0  }
 0x179   :  { %2804 = vmatprep.mubr.f32.mxu1 %v11605_v19  ;;  %2733 = vmatprep.mubr.f32.mxu0 %v11605_v19 }
 0x17a   :  { %1765 = vrot.lane.b32.xlu1 %v7592_v1, %s6773_s18 }
 0x17c   :  { %1973 = vrot.lane.b32.xlu0 %v7502_v41, %s6778_s12 }
 0x17e   :  { %2154 = vrot.lane.b32.xlu1 %v7592_v1, %s6775_s26 }
 0x180   :  { %1142 = vrot.lane.b32.xlu0 %v7592_v1, %s6774_s25 }
 0x182   :  { %1763 = vrot.lane.b32.xlu1 %v7572_v25, %s6773_s18 }
 0x184   :  { %1531 = vrot.lane.b32.xlu0 %v7592_v1, %s6772_s9 }
 0x186   :  { %1983 = vrot.lane.b32.xlu1 %v7592_v1, %s6778_s12 }
 0x188   :  { %1527 = vrot.lane.b32.xlu0 %v7570_v6, %s6772_s9 }
 0x18a   :  { %1981 = vrot.lane.b32.xlu1 %v7572_v25, %s6778_s12 }
 0x18c   :  { %1360 = vrot.lane.b32.xlu0 %v7592_v1, %s6777_s11 }
 0x18e   :  { %1150 = vrot.lane.b32.xlu1 %v7628_v29, %s6774_s25 }
 0x190   :  { %2366 = vrot.lane.b32.xlu0 %v7506_v35, %s6779_s13 }
 0x192   :  { %1539 = vrot.lane.b32.xlu1 %v7628_v29, %s6772_s9 }
 0x194   :  { %2362 = vrot.lane.b32.xlu0 %v7502_v41, %s6779_s13 }
 0x196   :  { %1535 = vrot.lane.b32.xlu1 %v7598_v27, %s6772_s9 }
 0x198   :  { %1767 = vrot.lane.b32.xlu0 %v7594_v4, %s6773_s18 }
 0x19a   :  { %1366 = vrot.lane.b32.xlu1 %v7626_v51, %s6777_s11 }
 0x19c   :  { %2156 = vrot.lane.b32.xlu0 %v7594_v4, %s6775_s26  ;;  %v961_v31 = vpop.permute.xlu1 %960 }
 0x19e   :  { %2372 = vrot.lane.b32.xlu1 %v7592_v1, %s6779_s13 }
 0x1a0   :  { %2152 = vrot.lane.b32.xlu0 %v7572_v25, %s6775_s26  ;;  %v965_v41 = vpop.permute.xlu1 %964 }
 0x1a2   :  { %1364 = vrot.lane.b32.xlu1 %v7598_v27, %s6777_s11 }
 0x1a4   :  { %1985 = vrot.lane.b32.xlu0 %v7594_v4, %s6778_s12  ;;  %v7808_v58 = vpop.permute.xlu1 %968 }
 0x1a6   :  { %1773 = vrot.lane.b32.xlu1 %v7628_v29, %s6773_s18 }
 0x1a8   :  { %1148 = vrot.lane.b32.xlu0 %v7626_v51, %s6774_s25  ;;  %v7814_v34 = vpop.permute.xlu1 %972 }
 0x1aa   :  { %2162 = vrot.lane.b32.xlu1 %v7628_v29, %s6775_s26 }
 0x1ac   :  { %1537 = vrot.lane.b32.xlu0 %v7626_v51, %s6772_s9  ;;  %v7820_v1 = vpop.permute.xlu1 %976 }
 0x1ae   :  { %1771 = vrot.lane.b32.xlu1 %v7626_v51, %s6773_s18 }
 0x1b0   :  { %1146 = vrot.lane.b32.xlu0 %v7598_v27, %s6774_s25  ;;  %v7838_v13 = vpop.permute.xlu1 %1132 }
 0x1b2   :  { %1991 = vrot.lane.b32.xlu1 %v7628_v29, %s6778_s12 }
 0x1b4   :  { %980 = vrot.lane.b32.xlu0 %v7628_v29, %s6776_s2  ;;  %v7848_v50 = vpop.permute.xlu1 %1521 }
 0x1b6   :  { %v7853_v2 = vpop.permute.xlu0 %958  ;;  %1989 = vrot.lane.b32.xlu1 %v7626_v51, %s6778_s12 }
 0x1b7   :  { %v1005_v56 = vsel %vm990_vm4, %v7853_v2, %v961_v31 }
 0x1b8   :  { %v1097_v60 = vmul.f32 %v1023_v20, %v1005_v56  ;;  %1368 = vrot.lane.b32.xlu0 %v7628_v29, %s6777_s11  ;;  %v7870_v0 = vpop.permute.xlu1 %1130  ;;  %v7920_v20 = vor.u32 %v6276_v46, %v6275_v14 }
 0x1b9   :  { %v1173_v15 = vsel %vm550_vm2, %v7870_v0, %v7838_v13 }
 0x1ba   :  { %1113 = vst [vmem:[#allocation2 + $0x8] sm:$0xf] %v1097_v60  ;;  %v1268_v7 = vmul.f32 %v1197_v5, %v1173_v15  ;;  %v963_v63 = vpop.permute.xlu0 %962  ;;  %1517 = vrot.lane.b32.xlu1 %v7685_v8, %s6772_s9  ;;  %v1055_v15 = vrot.slane %v7920_v20, %v7013_v40 }
 0x1bb   :  { %v1003_v62 = vsel %vm990_vm4, %v963_v63, %v965_v41  ;;  %v1004_v54 = vsel %vm990_vm4, %v961_v31, %v963_v63  ;;  %v1043_v31 = vrot.slane %v7840_v44, %v7034_v48 }
 0x1bc   :  { %v1300_v36 = vrot.slane %v1268_v7, 4  ;;  %v1098_v22 = vmul.f32 %v1027_v52, %v1004_v54  ;;  %v1099_v24 = vmul.f32 %v1031_v21, %v1003_v62  ;;  %2374 = vrot.lane.b32.xlu0 %v7594_v4, %s6779_s13  ;;  %v7892_v57 = vpop.permute.xlu1 %1350  ;;  %v1051_v21 = vrot.slane %v7920_v20, %v6985_v28 }
 0x1be   :  { %1332 = vst [vmem:[#allocation2 + $0x10] sm:$0xf0] %v1300_v36  ;;  %1114 = vst [vmem:[#allocation2 + $0x10] sm:$0xf] %v1098_v22  ;;  %v967_v37 = vpop.permute.xlu0 %966  ;;  %1158 = vrot.lane.b32.xlu1 %v7701_v55, %s6774_s25  ;;  %v1059_v36 = vrot.slane %v7920_v20, %v6981_v26 }
 0x1bf   :  { %1115 = vst [vmem:[#allocation2 + $0x18] sm:$0xf] %v1099_v24  ;;  %v1001_v38 = vsel %vm990_vm4, %v967_v37, %v7808_v58  ;;  %v1002_v9 = vsel %vm990_vm4, %v965_v41, %v967_v37  ;;  %v6285_v22 = vld [vmem:[%s11592_s3 + $0x3] ss:$8 sm:$0xf]  ;;  %v1201_v37 = vrot.slane %v7844_v30, %v7011_v39 }
 0x1c0   :  { %v1100_v49 = vmul.f32 %v1035_v61, %v1002_v9  ;;  %v1101_v43 = vmul.f32 %v1039_v17, %v1001_v38  ;;  %2370 = vrot.lane.b32.xlu0 %v7572_v25, %s6779_s13  ;;  %v7916_v42 = vpop.permute.xlu1 %1348  ;;  %v6286_v24 = vld [vmem:[%s11592_s3 + $0x3] ss:$8 sm:$0xf0] }
 0x1c1   :  { %v1392_v41 = vsel %vm1378_vm5, %v7916_v42, %v7892_v57 }
 0x1c2   :  { %1116 = vst [vmem:[#allocation2 + $0x20] sm:$0xf] %v1100_v49  ;;  %1117 = vst [vmem:[#allocation2 + $0x28] sm:$0xf] %v1101_v43  ;;  %v1487_v5 = vmul.f32 %v1416_v3, %v1392_v41  ;;  %v971_v56 = vpop.permute.xlu0 %970  ;;  %1547 = vrot.lane.b32.xlu1 %v7701_v55, %s6772_s9  ;;  %v7976_v3 = vor.u32 %v6286_v24, %v6285_v22 }
 0x1c3   :  { %v999_v25 = vsel %vm990_vm4, %v971_v56, %v7814_v34  ;;  %v1000_v11 = vsel %vm990_vm4, %v7808_v58, %v971_v56 }
 0x1c4   :  { %1503 = vst [vmem:[#allocation2 + $0x90] sm:$0xf] %v1487_v5  ;;  %v1102_v12 = vmul.f32 %v1043_v31, %v1000_v11  ;;  %v1103_v60 = vmul.f32 %v1047_v10, %v999_v25  ;;  %1775 = vrot.lane.b32.xlu0 %v7660_v59, %s6773_s18  ;;  %v7936_v52 = vpop.permute.xlu1 %1759  ;;  %v1590_v49 = vrot.slane %v7976_v3, %v7011_v39  ;;  %v6289_v25 = vld [vmem:[%s11592_s3 + $0x5] ss:$8 sm:$0xf] }
 0x1c5   :  { %11818 = vst [vmem:[#allocation16_spill] sm:$0xff] %v7936_v52  ;;  %v1586_v56 = vrot.slane %v7976_v3, %v6981_v26 }
 0x1c6   :  { %1118 = vst [vmem:[#allocation2 + $0x30] sm:$0xf] %v1102_v12  ;;  %1119 = vst [vmem:[#allocation2 + $0x38] sm:$0xf] %v1103_v60  ;;  %v975_v7 = vpop.permute.xlu0 %974  ;;  %1346 = vrot.lane.b32.xlu1 %v7685_v8, %s6777_s11 }
 0x1c7   :  { %v997_v58 = vsel %vm990_vm4, %v975_v7, %v7820_v1  ;;  %v998_v63 = vsel %vm990_vm4, %v7814_v34, %v975_v7  ;;  %v1420_v7 = vrot.slane %v7882_v23, %v7011_v39 }
 0x1c8   :  { %v1104_v62 = vmul.f32 %v1051_v21, %v998_v63  ;;  %v1105_v54 = vmul.f32 %v1055_v15, %v997_v58  ;;  %2164 = vrot.lane.b32.xlu0 %v7660_v59, %s6775_s26  ;;  %v7952_v61 = vpop.permute.xlu1 %2148  ;;  %v6297_v63 = vld [vmem:[%s11592_s3 + $0x7] ss:$8 sm:$0xf] }
 0x1c9   :  { %11819 = vst [vmem:[#allocation5_spill] sm:$0xff] %v7952_v61 }
 0x1ca   :  { %1120 = vst [vmem:[#allocation2 + $0x40] sm:$0xf] %v1104_v62  ;;  %1121 = vst [vmem:[#allocation2 + $0x48] sm:$0xf] %v1105_v54  ;;  %v7962_v34 = vpop.permute.xlu0 %978  ;;  %986 = vrot.lane.b32.xlu1 %v7708_v16, %s6776_s2 }
 0x1cb   :  { %v996_v17 = vsel %vm990_vm4, %v7820_v1, %v7962_v34 }
 0x1cc   :  { %v1106_v14 = vmul.f32 %v1059_v36, %v996_v17  ;;  %2160 = vrot.lane.b32.xlu0 %v7626_v51, %s6775_s26  ;;  %v7972_v46 = vpop.permute.xlu1 %2144  ;;  %v1213_v36 = vrot.slane %v7844_v30, %v7034_v48 }
 0x1ce   :  { %1122 = vst [vmem:[#allocation2 + $0x50] sm:$0xf] %v1106_v14  ;;  %v7978_v38 = vpop.permute.xlu0 %1134  ;;  %1374 = vrot.lane.b32.xlu1 %v7708_v16, %s6777_s11 }
 0x1cf   :  { %11820 = vst [vmem:[#allocation4_spill] sm:$0xff] %v7978_v38  ;;  %v1172_v1 = vsel %vm550_vm2, %v7838_v13, %v7978_v38 }
 0x1d0   :  { %v1269_v9 = vmul.f32 %v1201_v37, %v1172_v1  ;;  %1993 = vrot.lane.b32.xlu0 %v7660_v59, %s6778_s12  ;;  %v7988_v31 = vpop.permute.xlu1 %1977 }
 0x1d1   :  { %11821 = vst [vmem:[#allocation6_spill] sm:$0xff] %v7988_v31 }
 0x1d2   :  { %v1301_v43 = vrot.slane %v1269_v9, 4  ;;  %v7992_v10 = vpop.permute.xlu0 %1523  ;;  %2380 = vrot.lane.b32.xlu1 %v7628_v29, %s6779_s13  ;;  %v6290_v29 = vld [vmem:[%s11592_s3 + $0x5] ss:$8 sm:$0xf0] }
 0x1d3   :  { %v1561_v13 = vsel %vm102_vm0, %v7848_v50, %v7992_v10  ;;  %v8026_v58 = vor.u32 %v6290_v29, %v6289_v25  ;;  %v6294_v29 = vld [vmem:[%s11592_s3 + $0x6] ss:$8 sm:$0xf0] }
 0x1d4   :  { %1333 = vst [vmem:[#allocation2 + $0x18] sm:$0xf0] %v1301_v43  ;;  %v1658_v41 = vmul.f32 %v1590_v49, %v1561_v13  ;;  %1128 = vrot.lane.b32.xlu0 %v7685_v8, %s6774_s25  ;;  %v8002_v5 = vpop.permute.xlu1 %1140 }
 0x1d5   :  { %v1824_v14 = vrot.slane %v8026_v58, %v7011_v39 }
 0x1d6   :  { %v1690_v11 = vrot.slane %v1658_v41, 4  ;;  %v8012_v12 = vpop.permute.xlu0 %1519  ;;  %984 = vrot.lane.b32.xlu1 %v7706_v18, %s6776_s2 }
 0x1d7   :  { %v1562_v60 = vsel %vm102_vm0, %v8012_v12, %v7848_v50  ;;  %v6298_v50 = vld [vmem:[%s11592_s3 + $0x7] ss:$8 sm:$0xf0] }
 0x1d8   :  { %1722 = vst [vmem:[#allocation2 + $0x98] sm:$0xf0] %v1690_v11  ;;  %v1657_v21 = vmul.f32 %v1586_v56, %v1562_v60  ;;  %1156 = vrot.lane.b32.xlu0 %v7708_v16, %s6774_s25  ;;  %v8022_v15 = vpop.permute.xlu1 %1529  ;;  %v8050_v37 = vor.u32 %v6298_v50, %v6297_v63 }
 0x1da   :  { %v1689_v62 = vrot.slane %v1657_v21, 4  ;;  %v8034_v54 = vpop.permute.xlu0 %1352  ;;  %1753 = vrot.lane.b32.xlu1 %v7541_v45, %s6773_s18  ;;  %v2209_v56 = vrot.slane %v8050_v37, %v6981_v26  ;;  %v2213_v25 = vrot.slane %v8050_v37, %v7011_v39 }
 0x1db   :  { %11822 = vst [vmem:[#allocation17_spill] sm:$0xff] %v8034_v54  ;;  %v1391_v22 = vsel %vm1378_vm5, %v7892_v57, %v8034_v54 }
 0x1dc   :  { %1721 = vst [vmem:[#allocation2 + $0x90] sm:$0xf0] %v1689_v62  ;;  %v1488_v24 = vmul.f32 %v1420_v7, %v1391_v22  ;;  %1545 = vrot.lane.b32.xlu0 %v7708_v16, %s6772_s9  ;;  %v8046_v17 = vpop.permute.xlu1 %1138 }
 0x1dd   :  { %11823 = vst [vmem:[#allocation18_spill] sm:$0xff] %v8046_v17  ;;  %v1169_v1 = vsel %vm550_vm2, %v8046_v17, %v8002_v5 }
 0x1de   :  { %1504 = vst [vmem:[#allocation2 + $0x98] sm:$0xf] %v1488_v24  ;;  %v1272_v9 = vmul.f32 %v1213_v36, %v1169_v1  ;;  %v1758_v57 = vpop.permute.xlu0 %1757  ;;  %2378 = vrot.lane.b32.xlu1 %v7626_v51, %s6779_s13  ;;  %v6293_v51 = vld [vmem:[%s11592_s3 + $0x6] ss:$8 sm:$0xf]  ;;  %v1820_v36 = vrot.slane %v8026_v58, %v6981_v26 }
 0x1df   :  { %v1794_v49 = vsel %vm379_vm1, %v1758_v57, %v7936_v52  ;;  %v8089_v24 = vor.u32 %v6294_v29, %v6293_v51 }
 0x1e0   :  { %v1304_v43 = vrot.slane %v1272_v9, 4  ;;  %v1892_v13 = vmul.f32 %v1824_v14, %v1794_v49  ;;  %1154 = vrot.lane.b32.xlu0 %v7706_v18, %s6774_s25  ;;  %v8063_v41 = vpop.permute.xlu1 %1358  ;;  %v2533_v14 = vld [vmem:[#allocation2 + $0x18] sm:$0xff] }
 0x1e2   :  { %1336 = vst [vmem:[#allocation2 + $0x30] sm:$0xf0] %v1304_v43  ;;  %v1924_v11 = vrot.slane %v1892_v13, 4  ;;  %v2147_v60 = vpop.permute.xlu0 %2146  ;;  %1781 = vrot.lane.b32.xlu1 %v7701_v55, %s6773_s18 }
 0x1e3   :  { %v2183_v21 = vsel %vm827_vm3, %v2147_v60, %v7952_v61  ;;  %v2184_v7 = vsel %vm827_vm3, %v7972_v46, %v2147_v60  ;;  %v2548_v22 = vld [vmem:[#allocation2 + $0x90] sm:$0xff] }
 0x1e4   :  { %1956 = vst [vmem:[#allocation2 + $0x118] sm:$0xf0] %v1924_v11  ;;  %v2280_v63 = vmul.f32 %v2209_v56, %v2184_v7  ;;  %v2281_v50 = vmul.f32 %v2213_v25, %v2183_v21  ;;  %1543 = vrot.lane.b32.xlu0 %v7706_v18, %s6772_s9  ;;  %v8085_v62 = vpop.permute.xlu1 %2364  ;;  %v1432_v56 = vrot.slane %v7882_v23, %v7034_v48  ;;  %v2532_v25 = vld [vmem:[#allocation2 + $0x10] sm:$0xff] }
 0x1e5   :  { %v2549_v1 = vld [vmem:[#allocation2 + $0x98] sm:$0xff]  ;;  %v6377_v51 = vpack.c.bf16 %v2548_v22, %v2532_v25  ;;  %v2043_v21 = vrot.slane %v8089_v24, %v7011_v39  ;;  %v1217_v25 = vrot.slane %v7844_v30, %v7046_v53 }
 0x1e6   :  { %v2312_v9 = vrot.slane %v2280_v63, 4  ;;  %v2313_v49 = vrot.slane %v2281_v50, 4  ;;  %v8091_v43 = vpop.permute.xlu0 %1755  ;;  %2170 = vrot.lane.b32.xlu1 %v7701_v55, %s6775_s26  ;;  %v6375_v13 = vpack.c.bf16 %v2549_v1, %v2533_v14  ;;  %v2039_v1 = vrot.slane %v8089_v24, %v6981_v26 }
 0x1e7   :  { %v1795_v11 = vsel %vm379_vm1, %v8091_v43, %v1758_v57 }
 0x1e8   :  { %2344 = vst [vmem:[#allocation2 + $0x190] sm:$0xf0] %v2312_v9  ;;  %2345 = vst [vmem:[#allocation2 + $0x198] sm:$0xf0] %v2313_v49  ;;  %v1891_v29 = vmul.f32 %v1820_v36, %v1795_v11  ;;  %988 = vrot.lane.b32.xlu0 %v7701_v55, %s6776_s2  ;;  %6376 = vmatprep.subr.bf16.mxu1 %v6375_v13  ;;  %v8102_v60 = vpop.permute.xlu1 %1356 }
 0x1e9   :  { %11824 = vst [vmem:[#allocation19_spill] sm:$0xff] %v8102_v60  ;;  %v1388_v57 = vsel %vm1378_vm5, %v8102_v60, %v8063_v41  ;;  %6378 = vmatpush1.bf16.msra.mxu1 %v6377_v51  ;;  %v1836_v51 = vrot.slane %v8026_v58, %v7034_v48  ;;  %v2225_v60 = vrot.slane %v8050_v37, %v7034_v48 }
 0x1ea   :  { %v1923_v7 = vrot.slane %v1891_v29, 4  ;;  %v1491_v63 = vmul.f32 %v1432_v56, %v1388_v57  ;;  %v1976_v50 = vpop.permute.xlu0 %1975  ;;  %1971 = vrot.lane.b32.xlu1 %v7541_v45, %s6778_s12 }
 0x1eb   :  { %v2013_v36 = vsel %vm2001_vm6, %v1976_v50, %v7988_v31 }
 0x1ec   :  { %1955 = vst [vmem:[#allocation2 + $0x110] sm:$0xf0] %v1923_v7  ;;  %1507 = vst [vmem:[#allocation2 + $0xb0] sm:$0xf] %v1491_v63  ;;  %v2111_v22 = vmul.f32 %v2043_v21, %v2013_v36  ;;  %1376 = vrot.lane.b32.xlu0 %v7701_v55, %s6777_s11  ;;  %v8118_v14 = vpop.permute.xlu1 %1765  ;;  %v1606_v7 = vrot.slane %v7976_v3, %v7046_v53 }
 0x1ee   :  { %2127 = vst [vmem:[#allocation2 + $0x198] sm:$0xf] %v2111_v22  ;;  %v8122_v9 = vpop.permute.xlu0 %1973  ;;  %1969 = vrot.lane.b32.xlu1 %v7685_v8, %s6778_s12 }
 0x1ef   :  { %v2014_v49 = vsel %vm2001_vm6, %v8122_v9, %v1976_v50  ;;  %v2565_v50 = vld [vmem:[#allocation2 + $0x118] sm:$0xff] }
 0x1f0   :  { %v2110_v13 = vmul.f32 %v2039_v1, %v2014_v49  ;;  %2382 = vrot.lane.b32.xlu0 %v7660_v59, %s6779_s13  ;;  %v8131_v56 = vpop.permute.xlu1 %2154 }
 0x1f2   :  { %2126 = vst [vmem:[#allocation2 + $0x190] sm:$0xf] %v2110_v13  ;;  %v8135_v11 = vpop.permute.xlu0 %1142  ;;  %1997 = vrot.lane.b32.xlu1 %v7708_v16, %s6778_s12 }
 0x1f3   :  { %11825 = vst [vmem:[#allocation20_spill] sm:$0xff] %v8135_v11  ;;  %v1168_v29 = vsel %vm550_vm2, %v8002_v5, %v8135_v11 }
 0x1f4   :  { %v1273_v21 = vmul.f32 %v1217_v25, %v1168_v29  ;;  %1372 = vrot.lane.b32.xlu0 %v7706_v18, %s6777_s11  ;;  %v8147_v57 = vpop.permute.xlu1 %1763 }
 0x1f5   :  { %11826 = vst [vmem:[#allocation21_spill] sm:$0xff] %v8147_v57  ;;  %v1791_v63 = vsel %vm379_vm1, %v8147_v57, %v8118_v14  ;;  %v2581_v36 = vld [vmem:[#allocation2 + $0x198] sm:$0xff] }
 0x1f6   :  { %v1305_v22 = vrot.slane %v1273_v21, 4  ;;  %v1895_v1 = vmul.f32 %v1836_v51, %v1791_v63  ;;  %v8155_v49 = vpop.permute.xlu0 %1531  ;;  %2358 = vrot.lane.b32.xlu1 %v7685_v8, %s6779_s13  ;;  %v6379_v5 = vpack.c.bf16 %v2581_v36, %v2565_v50  ;;  %v1602_v51 = vrot.slane %v7976_v3, %v7034_v48  ;;  %v6301_v63 = vld [vmem:[%s11592_s3 + $0x80] ss:$8 sm:$0xf] }
 0x1f7   :  { %11827 = vst [vmem:[#allocation22_spill] sm:$0xff] %v8155_v49  ;;  %v1557_v13 = vsel %vm102_vm0, %v8022_v15, %v8155_v49  ;;  %v2564_v50 = vld [vmem:[#allocation2 + $0x110] sm:$0xff] }
 0x1f8   :  { %1337 = vst [vmem:[#allocation2 + $0x38] sm:$0xf0] %v1305_v22  ;;  %v1927_v25 = vrot.slane %v1895_v1, 4  ;;  %v1662_v29 = vmul.f32 %v1606_v7, %v1557_v13  ;;  %2142 = vrot.lane.b32.xlu0 %v7541_v45, %s6775_s26  ;;  %6380 = vmatprep.subr.bf16.mxu1 %v6379_v5  ;;  %v8165_v21 = vpop.permute.xlu1 %1983  ;;  %v6302_v22 = vld [vmem:[%s11592_s3 + $0x80] ss:$8 sm:$0xf0]  ;;  %v2055_v13 = vrot.slane %v8089_v24, %v7034_v48 }
 0x1f9   :  { %v2580_v36 = vld [vmem:[#allocation2 + $0x190] sm:$0xff] }
 0x1fa   :  { %1959 = vst [vmem:[#allocation2 + $0x130] sm:$0xf0] %v1927_v25  ;;  %v1694_v7 = vrot.slane %v1662_v29, 4  ;;  %v8175_v1 = vpop.permute.xlu0 %1527  ;;  %2386 = vrot.lane.b32.xlu1 %v7708_v16, %s6779_s13  ;;  %v6381_v5 = vpack.c.bf16 %v2580_v36, %v2564_v50  ;;  %v1436_v29 = vrot.slane %v7882_v23, %v7046_v53  ;;  %v8191_v50 = vor.u32 %v6302_v22, %v6301_v63 }
 0x1fb   :  { %v1558_v19 = vsel %vm102_vm0, %v8175_v1, %v8022_v15 }
 0x1fc   :  { %1726 = vst [vmem:[#allocation2 + $0xb8] sm:$0xf0] %v1694_v7  ;;  %v1661_v49 = vmul.f32 %v1602_v51, %v1558_v19  ;;  %1751 = vrot.lane.b32.xlu0 %v7685_v8, %s6773_s18  ;;  %6382 = vmatpush1.bf16.msra.mxu1 %v6381_v5  ;;  %v8187_v25 = vpop.permute.xlu1 %1981  ;;  %v2428_v5 = vrot.slane %v8191_v50, %v6981_v26 }
 0x1fd   :  { %11828 = vst [vmem:[#allocation23_spill] sm:$0xff] %v8187_v25  ;;  %v2010_v36 = vsel %vm2001_vm6, %v8187_v25, %v8165_v21 }
 0x1fe   :  { %v1693_v61 = vrot.slane %v1661_v49, 4  ;;  %v2114_v15 = vmul.f32 %v2055_v13, %v2010_v36  ;;  %v8197_v7 = vpop.permute.xlu0 %1360  ;;  %1525 = vrot.lane.b32.xlu1 %v7506_v35, %s6772_s9  ;;  %v2432_v49 = vrot.slane %v8191_v50, %v7011_v39 }
 0x1ff   :  { %11829 = vst [vmem:[#allocation24_spill] sm:$0xff] %v8197_v7  ;;  %v1387_v19 = vsel %vm1378_vm5, %v8063_v41, %v8197_v7 }
 0x200   :  { %1725 = vst [vmem:[#allocation2 + $0xb0] sm:$0xf0] %v1693_v61  ;;  %2130 = vst [vmem:[#allocation2 + $0x1b0] sm:$0xf] %v2114_v15  ;;  %v1492_v51 = vmul.f32 %v1436_v29, %v1387_v19  ;;  %2140 = vrot.lane.b32.xlu0 %v7685_v8, %s6775_s26  ;;  %v8207_v63 = vpop.permute.xlu1 %1150  ;;  %v1840_v19 = vrot.slane %v8026_v58, %v7046_v53 }
 0x201   :  { %11830 = vst [vmem:[#allocation25_spill] sm:$0xff] %v8207_v63 }
 0x202   :  { %1508 = vst [vmem:[#allocation2 + $0xb8] sm:$0xf] %v1492_v51  ;;  %v8212_v22 = vpop.permute.xlu0 %2366  ;;  %1761 = vrot.lane.b32.xlu1 %v7570_v6, %s6773_s18 }
 0x203   :  { %11831 = vst [vmem:[#allocation26_spill] sm:$0xff] %v8212_v22  ;;  %v2402_v61 = vsel %vm2390_vm7, %v8085_v62, %v8212_v22 }
 0x204   :  { %v2500_v41 = vmul.f32 %v2432_v49, %v2402_v61  ;;  %1779 = vrot.lane.b32.xlu0 %v7708_v16, %s6773_s18  ;;  %v8222_v8 = vpop.permute.xlu1 %1539  ;;  %v6284_v49 = vld [vmem:[%s11592_s3 + $0x42] ss:$8 sm:$0xf0] }
 0x205   :  { %11832 = vst [vmem:[#allocation27_spill] sm:$0xff] %v8222_v8 }
 0x206   :  { %2516 = vst [vmem:[#allocation2 + $0x218] sm:$0xf] %v2500_v41  ;;  %v8226_v13 = vpop.permute.xlu0 %2362  ;;  %1979 = vrot.lane.b32.xlu1 %v7570_v6, %s6778_s12 }
 0x207   :  { %11833 = vst [vmem:[#allocation28_spill] sm:$0xff] %v8226_v13  ;;  %v2403_v29 = vsel %vm2390_vm7, %v8226_v13, %v8085_v62 }
 0x208   :  { %v2499_v36 = vmul.f32 %v2428_v5, %v2403_v29  ;;  %2168 = vrot.lane.b32.xlu0 %v7708_v16, %s6775_s26  ;;  %v8236_v15 = vpop.permute.xlu1 %1535  ;;  %v6283_v16 = vld [vmem:[%s11592_s3 + $0x42] ss:$8 sm:$0xf]  ;;  %v2229_v5 = vrot.slane %v8050_v37, %v7046_v53 }
 0x209   :  { %11834 = vst [vmem:[#allocation29_spill] sm:$0xff] %v8236_v15  ;;  %v8265_v22 = vor.u32 %v6284_v49, %v6283_v16  ;;  %v8280_v16 = vld [vmem:[%s11593_s4] sm:$0xff] }
 0x20a   :  { %2515 = vst [vmem:[#allocation2 + $0x210] sm:$0xf] %v2499_v36  ;;  %v8240_v51 = vpop.permute.xlu0 %1767  ;;  %1144 = vrot.lane.b32.xlu1 %v7594_v4, %s6774_s25  ;;  %v6279_v49 = vld [vmem:[%s11592_s3 + $0x41] ss:$8 sm:$0xf] }
 0x20b   :  { %11835 = vst [vmem:[#allocation30_spill] sm:$0xff] %v8240_v51  ;;  %v1790_v62 = vsel %vm379_vm1, %v8118_v14, %v8240_v51  ;;  %v2553_v51 = vld [vmem:[#allocation2 + $0xb8] sm:$0xff]  ;;  %v1448_v13 = vrot.slane %v8265_v22, %v6981_v26 }
 0x20c   :  { %v1896_v61 = vmul.f32 %v1840_v19, %v1790_v62  ;;  %1999 = vrot.lane.b32.xlu0 %v7701_v55, %s6778_s12  ;;  %v8256_v41 = vpop.permute.xlu1 %1366  ;;  %v2552_v62 = vld [vmem:[#allocation2 + $0xb0] sm:$0xff] }
 0x20d   :  { %v2597_v29 = vld [vmem:[#allocation2 + $0x218] sm:$0xf] }
 0x20e   :  { %v1928_v36 = vrot.slane %v1896_v61, 4  ;;  %v8260_v14 = vpop.permute.xlu0 %2156  ;;  %1362 = vrot.lane.b32.xlu1 %v7594_v4, %s6777_s11  ;;  %6308 = vmatprep.subr.msk.mxu1 %vm2620_vm8, %v2597_v29  ;;  %v2537_v29 = vld [vmem:[#allocation2 + $0x38] sm:$0xff] }
 0x20f   :  { %11836 = vst [vmem:[#allocation31_spill] sm:$0xff] %v8260_v14  ;;  %v2179_v19 = vsel %vm827_vm3, %v8131_v56, %v8260_v14 }
 0x210   :  { %1960 = vst [vmem:[#allocation2 + $0x138] sm:$0xf0] %v1928_v36  ;;  %v2285_v54 = vmul.f32 %v2229_v5, %v2179_v19  ;;  %2360 = vrot.lane.b32.xlu0 %v7541_v45, %s6779_s13  ;;  %v8273_v61 = vpop.permute.xlu1 %2372  ;;  %v6391_v36 = vpack.c.bf16 %v2553_v51, %v2537_v29  ;;  %v2536_v19 = vld [vmem:[#allocation2 + $0x30] sm:$0xff] }
 0x211   :  { %v2596_v5 = vld [vmem:[#allocation2 + $0x210] sm:$0xf]  ;;  %v6393_v14 = vpack.c.bf16 %v2552_v62, %v2536_v19  ;;  %v2059_v62 = vrot.slane %v8089_v24, %v7046_v53 }
 0x212   :  { %v6280_v45 = vld [vmem:[%s11592_s3 + $0x41] ss:$8 sm:$0xf0]  ;;  %v2317_v38 = vrot.slane %v2285_v54, 4  ;;  %v8288_v17 = vpop.permute.xlu0 %2152  ;;  %2158 = vrot.lane.b32.xlu1 %v7598_v27, %s6775_s26  ;;  %6309 = vmatpush1.msk.msra.mxu1 %vm2620_vm8, %v2596_v5 }
 0x213   :  { %11837 = vst [vmem:[#allocation32_spill] sm:$0xff] %v8288_v17  ;;  %v2180_v51 = vsel %vm827_vm3, %v8288_v17, %v8131_v56  ;;  %6392 = vmatprep.subr.bf16.mxu1 %v6391_v36  ;;  %6310 = vmatmul.mubr.msk.f32.vlgmr.msra.gmra.mrb[0].mxu1 %vm2616_vm9, %v8280_v16  ;;  %v8307_v5 = vor.u32 %v6280_v45, %v6279_v49  ;;  %v6291_v45 = vld [vmem:[%s11592_s3 + $0x45] ss:$8 sm:$0xf] }
 0x214   :  { %2349 = vst [vmem:[#allocation2 + $0x1b8] sm:$0xf0] %v2317_v38  ;;  %v2284_v54 = vmul.f32 %v2225_v60, %v2180_v51  ;;  %2388 = vrot.lane.b32.xlu0 %v7701_v55, %s6779_s13  ;;  %6394 = vmatpush1.bf16.msra.mxu1 %v6393_v14  ;;  %v8303_v29 = vpop.permute.xlu1 %1364  ;;  %v6287_v38 = vld [vmem:[%s11592_s3 + $0x43] ss:$8 sm:$0xf]  ;;  %v11839_v60 = vmov 0.0  }
 0x215   :  { %11838 = vst [vmem:[#allocation33_spill] sm:$0xff] %v8303_v29  ;;  %v1384_v56 = vsel %vm1378_vm5, %v8303_v29, %v8256_v41  ;;  %v6288_v55 = vld [vmem:[%s11592_s3 + $0x43] ss:$8 sm:$0xf0]  ;;  %2946 = vmatprep.mubr.f32.mxu1 %v11839_v60  ;;  %v1229_v29 = vrot.slane %v8307_v5, %v6981_v26 }
 0x216   :  { %v2316_v14 = vrot.slane %v2284_v54, 4  ;;  %v1495_v36 = vmul.f32 %v1448_v13, %v1384_v56  ;;  %v8320_v19 = vpop.permute.xlu0 %1985  ;;  %2376 = vrot.lane.b32.xlu1 %v7598_v27, %s6779_s13  ;;  %v6292_v51 = vld [vmem:[%s11592_s3 + $0x45] ss:$8 sm:$0xf0]  ;;  %v1233_v56 = vrot.slane %v8307_v5, %v7011_v39 }
 0x217   :  { %11840 = vst [vmem:[#allocation34_spill] sm:$0xff] %v8320_v19  ;;  %v2009_v49 = vsel %vm2001_vm6, %v8165_v21, %v8320_v19  ;;  %v8340_v21 = vor.u32 %v6288_v55, %v6287_v38  ;;  %v8344_v17 = vor.u32 %v6292_v51, %v6291_v45  ;;  %v2569_v31 = vld [vmem:[#allocation2 + $0x138] sm:$0xff] }
 0x218   :  { %2348 = vst [vmem:[#allocation2 + $0x1b0] sm:$0xf0] %v2316_v14  ;;  %1511 = vst [vmem:[#allocation2 + $0xd0] sm:$0xf] %v1495_v36  ;;  %v2115_v13 = vmul.f32 %v2059_v62, %v2009_v49  ;;  %1136 = vrot.lane.b32.xlu0 %v7506_v35, %s6774_s25  ;;  %v8336_v54 = vpop.permute.xlu1 %1773 }
 0x219   :  { %v1618_v38 = vrot.slane %v8340_v21, %v6981_v26  ;;  %v1622_v55 = vrot.slane %v8340_v21, %v7011_v39  ;;  %v6295_v49 = vld [vmem:[%s11592_s3 + $0x46] ss:$8 sm:$0xf] }
 0x21a   :  { %2131 = vst [vmem:[#allocation2 + $0x1b8] sm:$0xf] %v2115_v13  ;;  %v1149_v19 = vpop.permute.xlu0 %1148  ;;  %1541 = vrot.lane.b32.xlu1 %v7660_v59, %s6772_s9  ;;  %v6296_v13 = vld [vmem:[%s11592_s3 + $0x46] ss:$8 sm:$0xf0] }
 0x21b   :  { %v1164_v62 = vsel %vm550_vm2, %v1149_v19, %v8207_v63 }
 0x21c   :  { %v1277_v14 = vmul.f32 %v1233_v56, %v1164_v62  ;;  %1354 = vrot.lane.b32.xlu0 %v7506_v35, %s6777_s11  ;;  %v8351_v36 = vpop.permute.xlu1 %2162  ;;  %v1852_v35 = vrot.slane %v8344_v17, %v6981_v26 }
 0x21e   :  { %v1309_v45 = vrot.slane %v1277_v14, 4  ;;  %v1538_v51 = vpop.permute.xlu0 %1537  ;;  %1370 = vrot.lane.b32.xlu1 %v7660_v59, %s6777_s11 }
 0x21f   :  { %v1553_v56 = vsel %vm102_vm0, %v1538_v51, %v8222_v8  ;;  %v1554_v62 = vsel %vm102_vm0, %v8236_v15, %v1538_v51  ;;  %v2584_v11 = vld [vmem:[#allocation2 + $0x1b0] sm:$0xff]  ;;  %v8383_v51 = vor.u32 %v6296_v13, %v6295_v49  ;;  %v8436_v13 = vld [vmem:[%s11594_s1 + $0x8] sm:$0xff] }
 0x220   :  { %1341 = vst [vmem:[#allocation2 + $0x58] sm:$0xf0] %v1309_v45  ;;  %v1665_v14 = vmul.f32 %v1618_v38, %v1554_v62  ;;  %v1666_v63 = vmul.f32 %v1622_v55, %v1553_v56  ;;  %2150 = vrot.lane.b32.xlu0 %v7570_v6, %s6775_s26  ;;  %v8375_v7 = vpop.permute.xlu1 %1771  ;;  %v2568_v15 = vld [vmem:[#allocation2 + $0x130] sm:$0xff] }
 0x221   :  { %11841 = vst [vmem:[#allocation35_spill] sm:$0xff] %v8375_v7  ;;  %v1787_v8 = vsel %vm379_vm1, %v8375_v7, %v8336_v54  ;;  %v2585_v25 = vld [vmem:[#allocation2 + $0x1b8] sm:$0xff]  ;;  %v6397_v57 = vpack.c.bf16 %v2584_v11, %v2568_v15  ;;  %v8411_v11 = vld [vmem:[%s11594_s1] sm:$0xff]  ;;  %v1452_v15 = vrot.slane %v8265_v22, %v7011_v39 }
 0x222   :  { %v1697_v38 = vrot.slane %v1665_v14, 4  ;;  %v1698_v55 = vrot.slane %v1666_v63, 4  ;;  %v1899_v45 = vmul.f32 %v1852_v35, %v1787_v8  ;;  %v8385_v56 = vpop.permute.xlu0 %1146  ;;  %2166 = vrot.lane.b32.xlu1 %v7706_v18, %s6775_s26  ;;  %v6395_v62 = vpack.c.bf16 %v2585_v25, %v2569_v31 }
 0x223   :  { %v1165_v52 = vsel %vm550_vm2, %v8385_v56, %v1149_v19  ;;  %v1063_v8 = vrot.slane %v7920_v20, %v7011_v39  ;;  %v1582_v35 = vrot.slane %v7976_v3, %v7013_v40 }
 0x224   :  { %1729 = vst [vmem:[#allocation2 + $0xd0] sm:$0xf0] %v1697_v38  ;;  %1730 = vst [vmem:[#allocation2 + $0xd8] sm:$0xf0] %v1698_v55  ;;  %v1931_v7 = vrot.slane %v1899_v45, 4  ;;  %v1276_v49 = vmul.f32 %v1229_v29, %v1165_v52  ;;  %2368 = vrot.lane.b32.xlu0 %v7570_v6, %s6779_s13  ;;  %6396 = vmatprep.subr.bf16.mxu1 %v6395_v62  ;;  %v8394_v63 = vpop.permute.xlu1 %1991  ;;  %v2071_v52 = vrot.slane %v8383_v51, %v6981_v26 }
 0x225   :  { %6398 = vmatpush1.bf16.msra.mxu1 %v6397_v57  ;;  %v2448_v55 = vrot.slane %v8191_v50, %v7046_v53 }
 0x226   :  { %1963 = vst [vmem:[#allocation2 + $0x150] sm:$0xf0] %v1931_v7  ;;  %v1308_v31 = vrot.slane %v1276_v49, 4  ;;  %v8398_v25 = vpop.permute.xlu0 %980  ;;  %2384 = vrot.lane.b32.xlu1 %v7706_v18, %s6779_s13 }
 0x227   :  { %11842 = vst [vmem:[#allocation36_spill] sm:$0xff] %v8398_v25  ;;  %v995_v6 = vsel %vm990_vm4, %v7962_v34, %v8398_v25 }
 0x228   :  { %1340 = vst [vmem:[#allocation2 + $0x50] sm:$0xf0] %v1308_v31  ;;  %v1107_v57 = vmul.f32 %v1063_v8, %v995_v6  ;;  %1533 = vrot.lane.b32.xlu0 %v7594_v4, %s6772_s9  ;;  %v8415_v7 = vpop.permute.xlu1 %1989  ;;  %v8456_v8 = vld [vmem:[%s11594_s1 + $0x10] sm:$0xff]  ;;  %v2444_v6 = vrot.slane %v8191_v50, %v7034_v48 }
 0x229   :  { %11843 = vst [vmem:[#allocation37_spill] sm:$0xff] %v8415_v7  ;;  %v2006_v34 = vsel %vm2001_vm6, %v8415_v7, %v8394_v63 }
 0x22a   :  { %1123 = vst [vmem:[#allocation2 + $0x58] sm:$0xf] %v1107_v57  ;;  %v2118_v29 = vmul.f32 %v2071_v52, %v2006_v34  ;;  %v8423_v19 = vpop.permute.xlu0 %1368  ;;  %3303 = vrot.lane.b32.xlu1 %v8411_v11, %s6776_s2  ;;  %v6299_v57 = vld [vmem:[%s11592_s3 + $0x47] ss:$8 sm:$0xf] }
 0x22b   :  { %11844 = vst [vmem:[#allocation38_spill] sm:$0xff] %v8423_v19  ;;  %v1383_v4 = vsel %vm1378_vm5, %v8256_v41, %v8423_v19  ;;  %v2556_v25 = vld [vmem:[#allocation2 + $0xd0] sm:$0xff] }
 0x22c   :  { %2134 = vst [vmem:[#allocation2 + $0x1d0] sm:$0xf] %v2118_v29  ;;  %v1496_v14 = vmul.f32 %v1452_v15, %v1383_v4  ;;  %1769 = vrot.lane.b32.xlu0 %v7598_v27, %s6773_s18  ;;  %v1518_v38 = vpop.permute.xlu1 %1517  ;;  %v6300_v15 = vld [vmem:[%s11592_s3 + $0x47] ss:$8 sm:$0xf0] }
 0x22d   :  { %v1563_v45 = vsel %vm102_vm0, %v1518_v38, %v8012_v12 }
 0x22e   :  { %1512 = vst [vmem:[#allocation2 + $0xd8] sm:$0xf] %v1496_v14  ;;  %v1656_v41 = vmul.f32 %v1582_v35, %v1563_v45  ;;  %v8445_v62 = vpop.permute.xlu0 %2374  ;;  %3307 = vrot.lane.b32.xlu1 %v8436_v13, %s6776_s2  ;;  %v8483_v35 = vld [vmem:[%s11594_s1 + $0x18] sm:$0xff]  ;;  %v8491_v45 = vor.u32 %v6300_v15, %v6299_v57 }
 0x22f   :  { %11845 = vst [vmem:[#allocation39_spill] sm:$0xff] %v8445_v62  ;;  %v2398_v49 = vsel %vm2390_vm7, %v8273_v61, %v8445_v62 }
 0x230   :  { %v1688_v31 = vrot.slane %v1656_v41, 4  ;;  %v2504_v52 = vmul.f32 %v2448_v55, %v2398_v49  ;;  %1987 = vrot.lane.b32.xlu0 %v7598_v27, %s6778_s12  ;;  %v8460_v12 = vpop.permute.xlu1 %1158  ;;  %v1578_v27 = vrot.slane %v7976_v3, %v6985_v28  ;;  %v1856_v55 = vrot.slane %v8344_v17, %v7011_v39 }
 0x232   :  { %1720 = vst [vmem:[#allocation2 + $0x88] sm:$0xf0] %v1688_v31  ;;  %2520 = vst [vmem:[#allocation2 + $0x238] sm:$0xf] %v2504_v52  ;;  %v8470_v34 = vpop.permute.xlu0 %2370  ;;  %3311 = vrot.lane.b32.xlu1 %v8456_v8, %s6776_s2  ;;  %v1412_v31 = vrot.slane %v7882_v23, %v7013_v40 }
 0x233   :  { %11846 = vst [vmem:[#allocation40_spill] sm:$0xff] %v8470_v34  ;;  %v2399_v29 = vsel %vm2390_vm7, %v8470_v34, %v8273_v61 }
 0x234   :  { %v2503_v4 = vmul.f32 %v2444_v6, %v2399_v29  ;;  %1152 = vrot.lane.b32.xlu0 %v7660_v59, %s6774_s25  ;;  %v8487_v14 = vpop.permute.xlu1 %1547  ;;  %v8509_v6 = vld [vmem:[%s11594_s1 + $0x20] sm:$0xff] }
 0x235   :  { %v1564_v61 = vsel %vm102_vm0, %v8487_v14, %v1518_v38 }
 0x236   :  { %2519 = vst [vmem:[#allocation2 + $0x230] sm:$0xf] %v2503_v4  ;;  %v1655_v41 = vmul.f32 %v1578_v27, %v1564_v61  ;;  %v8496_v49 = vpop.permute.xlu0 %1775  ;;  %3315 = vrot.lane.b32.xlu1 %v8483_v35, %s6776_s2  ;;  %v2245_v27 = vrot.slane %v8491_v45, %v7011_v39 }
 0x237   :  { %11847 = vst [vmem:[#allocation41_spill] sm:$0xff] %v8496_v49  ;;  %v1786_v52 = vsel %vm379_vm1, %v8336_v54, %v8496_v49 }
 0x238   :  { %v1687_v38 = vrot.slane %v1655_v41, 4  ;;  %v1900_v57 = vmul.f32 %v1856_v55, %v1786_v52  ;;  %982 = vrot.lane.b32.xlu0 %v7660_v59, %s6776_s2  ;;  %v8513_v15 = vpop.permute.xlu1 %1346  ;;  %v2557_v55 = vld [vmem:[#allocation2 + $0xd8] sm:$0xff]  ;;  %v2540_v41 = vld [vmem:[#allocation2 + $0x50] sm:$0xff] }
 0x239   :  { %v1393_v54 = vsel %vm1378_vm5, %v8513_v15, %v7916_v42  ;;  %v2601_v29 = vld [vmem:[#allocation2 + $0x238] sm:$0xf]  ;;  %v8533_v42 = vld [vmem:[%s11594_s1 + $0x28] sm:$0xff] }
 0x23a   :  { %1719 = vst [vmem:[#allocation2 + $0x80] sm:$0xf0] %v1687_v38  ;;  %v1932_v4 = vrot.slane %v1900_v57, 4  ;;  %v1486_v61 = vmul.f32 %v1412_v31, %v1393_v54  ;;  %v8521_v49 = vpop.permute.xlu0 %2164  ;;  %6314 = vmatprep.subr.msk.mxu1 %vm2620_vm8, %v2601_v29  ;;  %3319 = vrot.lane.b32.xlu1 %v8509_v6, %s6776_s2  ;;  %v2241_v38 = vrot.slane %v8491_v45, %v6981_v26  ;;  %v2541_v57 = vld [vmem:[#allocation2 + $0x58] sm:$0xff] }
 0x23b   :  { %11848 = vst [vmem:[#allocation42_spill] sm:$0xff] %v8521_v49  ;;  %v2175_v59 = vsel %vm827_vm3, %v8351_v36, %v8521_v49  ;;  %v6407_v29 = vpack.c.bf16 %v2557_v55, %v2541_v57  ;;  %v1189_v57 = vrot.slane %v7844_v30, %v6985_v28 }
 0x23c   :  { %1964 = vst [vmem:[#allocation2 + $0x158] sm:$0xf0] %v1932_v4  ;;  %1502 = vst [vmem:[#allocation2 + $0x88] sm:$0xf] %v1486_v61  ;;  %v2289_v31 = vmul.f32 %v2245_v27, %v2175_v59  ;;  %1777 = vrot.lane.b32.xlu0 %v7706_v18, %s6773_s18  ;;  %v8537_v52 = vpop.permute.xlu1 %986  ;;  %v6409_v4 = vpack.c.bf16 %v2556_v25, %v2540_v41  ;;  %v8555_v61 = vld [vmem:[%s11594_s1 + $0x30] sm:$0xff] }
 0x23d   :  { %v2600_v54 = vld [vmem:[#allocation2 + $0x230] sm:$0xf] }
 0x23e   :  { %v2321_v7 = vrot.slane %v2289_v31, 4  ;;  %v8541_v34 = vpop.permute.xlu0 %2160  ;;  %6315 = vmatpush1.msk.msra.mxu1 %vm2620_vm8, %v2600_v54  ;;  %3323 = vrot.lane.b32.xlu1 %v8533_v42, %s6776_s2  ;;  %v1193_v54 = vrot.slane %v7844_v30, %v7013_v40 }
 0x23f   :  { %11849 = vst [vmem:[#allocation43_spill] sm:$0xff] %v8541_v34  ;;  %v2176_v27 = vsel %vm827_vm3, %v8541_v34, %v8351_v36  ;;  %6408 = vmatprep.subr.bf16.mxu1 %v6407_v29  ;;  %6316 = vmatmul.mubr.msk.f32.vlgmr.msra.gmra.mrb[2].mxu1 %vm2616_vm9, %v8280_v16  ;;  %v2075_v36 = vrot.slane %v8383_v51, %v7011_v39 }
 0x240   :  { %2353 = vst [vmem:[#allocation2 + $0x1d8] sm:$0xf0] %v2321_v7  ;;  %v2288_v55 = vmul.f32 %v2241_v38, %v2176_v27  ;;  %1995 = vrot.lane.b32.xlu0 %v7706_v18, %s6778_s12  ;;  %6410 = vmatpush1.bf16.msra.mxu1 %v6409_v4  ;;  %v8559_v25 = vpop.permute.xlu1 %1374  ;;  %v8575_v18 = vld [vmem:[%s11594_s1 + $0x38] sm:$0xff] }
 0x241   :  { %3088 = vmatprep.mubr.f32.mxu1 %v11839_v60  ;;  %11851 = vst [vmem:[#allocation45_spill] sm:$0xff] %v8575_v18  ;;  %v6303_v4 = vld [vmem:[%s11592_s3 + $0xc0] ss:$8 sm:$0xf] }
 0x242   :  { %v2320_v59 = vrot.slane %v2288_v55, 4  ;;  %v8564_v41 = vpop.permute.xlu0 %1993  ;;  %3327 = vrot.lane.b32.xlu1 %v8555_v61, %s6776_s2 }
 0x243   :  { %11850 = vst [vmem:[#allocation44_spill] sm:$0xff] %v8564_v41  ;;  %v2005_v7 = vsel %vm2001_vm6, %v8394_v63, %v8564_v41  ;;  %v1075_v63 = vrot.slane %v7920_v20, %v7034_v48 }
 0x244   :  { %2352 = vst [vmem:[#allocation2 + $0x1d0] sm:$0xf0] %v2320_v59  ;;  %v2119_v31 = vmul.f32 %v2075_v36, %v2005_v7  ;;  %v8577_v38 = vpop.permute.xlu1 %2380  ;;  %v6304_v36 = vld [vmem:[%s11592_s3 + $0xc0] ss:$8 sm:$0xf0]  ;;  %v6781_v7 = vmov 0  }
 0x245   :  { %v3293_v59 = vld [vmem:[%s11594_s1 + $0x40] sm:$0xff]  ;;  %6729 = vset.pattern.permute.xlu0 %v6781_v7  ;;  %v1816_v7 = vrot.slane %v8026_v58, %v7013_v40 }
 0x246   :  { %2135 = vst [vmem:[#allocation2 + $0x1d8] sm:$0xf] %v2119_v31  ;;  %v1129_v29 = vpop.permute.xlu0 %1128  ;;  %3331 = vrot.lane.b32.xlu1 %v8575_v18, %s6776_s2  ;;  %v2610_v31 = vld [vmem:[%s11595_s5] sm:$0xff] }
 0x247   :  { %v1174_v27 = vsel %vm550_vm2, %v1129_v29, %v7870_v0  ;;  %v1175_v55 = vsel %vm550_vm2, %v8460_v12, %v1129_v29  ;;  %v1249_v29 = vrot.slane %v8307_v5, %v7046_v53  ;;  %2613 = vperm.xlu0 %6729, %v2610_v31  }
 0x248   :  { %v1266_v41 = vmul.f32 %v1189_v57, %v1175_v55  ;;  %v1267_v0 = vmul.f32 %v1193_v54, %v1174_v27  ;;  %v8605_v49 = vpop.permute.xlu1 %984  ;;  %v8615_v57 = vor.u32 %v6304_v36, %v6303_v4  ;;  %v3294_v27 = vld [vmem:[%s11594_s1 + $0x48] sm:$0xff] }
 0x249   :  { %v992_v19 = vsel %vm990_vm4, %v8605_v49, %v8537_v52 }
 0x24a   :  { %v1298_v62 = vrot.slane %v1266_v41, 4  ;;  %v1299_v30 = vrot.slane %v1267_v0, 4  ;;  %v1110_v18 = vmul.f32 %v1075_v63, %v992_v19  ;;  %v1157_v34 = vpop.permute.xlu0 %1156  ;;  %3335 = vrot.lane.b32.xlu1 %v3293_v59, %s6776_s2  ;;  %v1638_v19 = vrot.slane %v8340_v21, %v7046_v53 }
 0x24b   :  { %v1160_v54 = vsel %vm550_vm2, %v1157_v34, %v8460_v12  ;;  %v2588_v63 = vld [vmem:[#allocation2 + $0x1d0] sm:$0xff]  ;;  %v2573_v12 = vld [vmem:[#allocation2 + $0x158] sm:$0xff] }
 0x24c   :  { %1330 = vst [vmem:[#allocation2] sm:$0xf0] %v1298_v62  ;;  %1331 = vst [vmem:[#allocation2 + $0x8] sm:$0xf0] %v1299_v30  ;;  %v1281_v55 = vmul.f32 %v1249_v29, %v1160_v54  ;;  %v8624_v41 = vpop.permute.xlu1 %1753  ;;  %v2460_v30 = vrot.slane %v8615_v57, %v6981_v26 }
 0x24d   :  { %1126 = vst [vmem:[#allocation2 + $0x70] sm:$0xf] %v1110_v18  ;;  %v1796_v4 = vsel %vm379_vm1, %v8624_v41, %v8091_v43  ;;  %v2589_v36 = vld [vmem:[#allocation2 + $0x1d8] sm:$0xff]  ;;  %v2572_v18 = vld [vmem:[#allocation2 + $0x150] sm:$0xff] }
 0x24e   :  { %v1313_v59 = vrot.slane %v1281_v55, 4  ;;  %v1890_v31 = vmul.f32 %v1816_v7, %v1796_v4  ;;  %v1546_v0 = vpop.permute.xlu0 %1545  ;;  %v6411_v62 = vpack.c.bf16 %v2589_v36, %v2573_v12  ;;  %3339 = vrot.lane.b32.xlu1 %v3294_v27, %s6776_s2  ;;  %v6413_v54 = vpack.c.bf16 %v2588_v63, %v2572_v18  ;;  %v3295_v43 = vld [vmem:[%s11594_s1 + $0x50] sm:$0xff] }
 0x24f   :  { %v1549_v29 = vsel %vm102_vm0, %v1546_v0, %v8487_v14  ;;  %v1245_v12 = vrot.slane %v8307_v5, %v7034_v48 }
 0x250   :  { %1345 = vst [vmem:[#allocation2 + $0x78] sm:$0xf0] %v1313_v59  ;;  %v1922_v55 = vrot.slane %v1890_v31, 4  ;;  %v1670_v7 = vmul.f32 %v1638_v19, %v1549_v29  ;;  %6412 = vmatprep.subr.bf16.mxu1 %v6411_v62  ;;  %v8641_v4 = vpop.permute.xlu1 %2378  ;;  %v2547_v31 = vld [vmem:[#allocation2 + $0x88] sm:$0xff]  ;;  %v3296_v62 = vld [vmem:[%s11594_s1 + $0x58] sm:$0xff] }
 0x251   :  { %v2395_v27 = vsel %vm2390_vm7, %v8641_v4, %v8577_v38  ;;  %6414 = vmatpush1.bf16.msra.mxu1 %v6413_v54 }
 0x252   :  { %1954 = vst [vmem:[#allocation2 + $0x108] sm:$0xf0] %v1922_v55  ;;  %v1702_v14 = vrot.slane %v1670_v7, 4  ;;  %v2507_v63 = vmul.f32 %v2460_v30, %v2395_v27  ;;  %v8649_v36 = vpop.permute.xlu0 %1154  ;;  %3343 = vrot.lane.b32.xlu1 %v3295_v43, %s6776_s2  ;;  %v1634_v30 = vrot.slane %v8340_v21, %v7034_v48  ;;  %v3297_v7 = vld [vmem:[%s11594_s1 + $0x60] sm:$0xff] }
 0x253   :  { %v1161_v19 = vsel %vm550_vm2, %v8649_v36, %v1157_v34  ;;  %v2531_v59 = vld [vmem:[#allocation2 + $0x8] sm:$0xff] }
 0x254   :  { %1734 = vst [vmem:[#allocation2 + $0xf8] sm:$0xf0] %v1702_v14  ;;  %2523 = vst [vmem:[#allocation2 + $0x250] sm:$0xf] %v2507_v63  ;;  %v1280_v18 = vmul.f32 %v1245_v12, %v1161_v19  ;;  %v8658_v29 = vpop.permute.xlu1 %1781  ;;  %v6367_v54 = vpack.c.bf16 %v2547_v31, %v2531_v59  ;;  %v1019_v14 = vrot.slane %v7840_v44, %v6985_v28  ;;  %v3298_v44 = vld [vmem:[%s11594_s1 + $0x68] sm:$0xff] }
 0x255   :  { %v1079_v63 = vrot.slane %v7920_v20, %v7046_v53  ;;  %v2035_v31 = vrot.slane %v8089_v24, %v7013_v40 }
 0x256   :  { %v1312_v43 = vrot.slane %v1280_v18, 4  ;;  %v8662_v55 = vpop.permute.xlu0 %1543  ;;  %6368 = vmatprep.subr.bf16.mxu0 %v6367_v54  ;;  %3347 = vrot.lane.b32.xlu1 %v3296_v62, %s6776_s2 }
 0x257   :  { %v1550_v34 = vsel %vm102_vm0, %v8662_v55, %v1546_v0 }
 0x258   :  { %1344 = vst [vmem:[#allocation2 + $0x70] sm:$0xf0] %v1312_v43  ;;  %v1669_v12 = vmul.f32 %v1634_v30, %v1550_v34  ;;  %v8671_v27 = vpop.permute.xlu1 %2170  ;;  %v1408_v43 = vrot.slane %v7882_v23, %v6985_v28  ;;  %v1468_v34 = vrot.slane %v8265_v22, %v7046_v53 }
 0x25a   :  { %v1701_v19 = vrot.slane %v1669_v12, 4  ;;  %v989_v59 = vpop.permute.xlu0 %988  ;;  %3351 = vrot.lane.b32.xlu1 %v3297_v7, %s6776_s2  ;;  %v2031_v12 = vrot.slane %v8089_v24, %v6985_v28 }
 0x25b   :  { %v991_v0 = vsel %vm990_vm4, %v8537_v52, %v989_v59  ;;  %v1006_v62 = vsel %vm990_vm4, %v989_v59, %v7853_v2 }
 0x25c   :  { %1733 = vst [vmem:[#allocation2 + $0xf0] sm:$0xf0] %v1701_v19  ;;  %v1096_v18 = vmul.f32 %v1019_v14, %v1006_v62  ;;  %v1111_v30 = vmul.f32 %v1079_v63, %v991_v0  ;;  %v1972_v54 = vpop.permute.xlu1 %1971  ;;  %v2464_v0 = vrot.slane %v8615_v57, %v7011_v39  ;;  %v11853_v39 = vld [vmem:[#allocation16_spill] sm:$0xff] }
 0x25d   :  { %v2015_v52 = vsel %vm2001_vm6, %v1972_v54, %v8122_v9  ;;  %v3299_v9 = vld [vmem:[%s11594_s1 + $0x70] sm:$0xff] }
 0x25e   :  { %1112 = vst [vmem:[#allocation2] sm:$0xf] %v1096_v18  ;;  %1127 = vst [vmem:[#allocation2 + $0x78] sm:$0xf] %v1111_v30  ;;  %v2109_v2 = vmul.f32 %v2035_v31, %v2015_v52  ;;  %v1377_v7 = vpop.permute.xlu0 %1376  ;;  %3355 = vrot.lane.b32.xlu1 %v3298_v44, %s6776_s2  ;;  %v8725_v30 = vld [vmem:[%s11594_s1 + $0x78] sm:$0xff] }
 0x25f   :  { %v1379_v14 = vsel %vm1378_vm5, %v8559_v25, %v1377_v7  ;;  %v1394_v63 = vsel %vm1378_vm5, %v1377_v7, %v8513_v15  ;;  %v2544_v26 = vld [vmem:[#allocation2 + $0x70] sm:$0xff] }
 0x260   :  { %2125 = vst [vmem:[#allocation2 + $0x188] sm:$0xf] %v2109_v2  ;;  %v1485_v19 = vmul.f32 %v1408_v43, %v1394_v63  ;;  %v1500_v59 = vmul.f32 %v1468_v34, %v1379_v14  ;;  %v8708_v31 = vpop.permute.xlu1 %1969  ;;  %v1464_v34 = vrot.slane %v8265_v22, %v7034_v48 }
 0x261   :  { %v2016_v62 = vsel %vm2001_vm6, %v8708_v31, %v1972_v54 }
 0x262   :  { %1501 = vst [vmem:[#allocation2 + $0x80] sm:$0xf] %v1485_v19  ;;  %1516 = vst [vmem:[#allocation2 + $0xf8] sm:$0xf] %v1500_v59  ;;  %v2108_v44 = vmul.f32 %v2031_v12, %v2016_v62  ;;  %v8715_v15 = vpop.permute.xlu0 %2382  ;;  %3359 = vrot.lane.b32.xlu1 %v3299_v9, %s6776_s2  ;;  %v2205_v12 = vrot.slane %v8050_v37, %v7013_v40 }
 0x263   :  { %v2394_v18 = vsel %vm2390_vm7, %v8577_v38, %v8715_v15 }
 0x264   :  { %2124 = vst [vmem:[#allocation2 + $0x180] sm:$0xf] %v2108_v44  ;;  %v2508_v43 = vmul.f32 %v2464_v0, %v2394_v18  ;;  %v8727_v54 = vpop.permute.xlu1 %1997  ;;  %v1812_v44 = vrot.slane %v8026_v58, %v6985_v28  ;;  %v1872_v18 = vrot.slane %v8344_v17, %v7046_v53 }
 0x265   :  { %v2530_v14 = vld [vmem:[#allocation2] sm:$0xff] }
 0x266   :  { %2524 = vst [vmem:[#allocation2 + $0x258] sm:$0xf] %v2508_v43  ;;  %v8731_v52 = vpop.permute.xlu0 %1372  ;;  %3363 = vrot.lane.b32.xlu1 %v8725_v30, %s6776_s2 }
 0x267   :  { %v1380_v38 = vsel %vm1378_vm5, %v8731_v52, %v8559_v25 }
 0x268   :  { %v1499_v2 = vmul.f32 %v1464_v34, %v1380_v38  ;;  %v8739_v7 = vpop.permute.xlu1 %2358  ;;  %v2545_v34 = vld [vmem:[#allocation2 + $0x78] sm:$0xff] }
 0x269   :  { %v2546_v63 = vld [vmem:[#allocation2 + $0x80] sm:$0xff]  ;;  %v2561_v0 = vld [vmem:[#allocation2 + $0xf8] sm:$0xff] }
 0x26a   :  { %1515 = vst [vmem:[#allocation2 + $0xf0] sm:$0xf] %v1499_v2  ;;  %v2143_v9 = vpop.permute.xlu0 %2142  ;;  %v6369_v19 = vpack.c.bf16 %v2546_v63, %v2530_v14  ;;  %3551 = vrot.lane.b32.xlu1 %v8411_v11, %s6774_s25  ;;  %v2604_v14 = vld [vmem:[#allocation2 + $0x250] sm:$0xf]  ;;  %v6423_v63 = vpack.c.bf16 %v2561_v0, %v2545_v34  ;;  %v2201_v0 = vrot.slane %v8050_v37, %v6985_v28 }
 0x26b   :  { %v2185_v59 = vsel %vm827_vm3, %v2143_v9, %v7972_v46  ;;  %v1594_v46 = vrot.slane %v7976_v3, %v6996_v32  ;;  %v2261_v34 = vrot.slane %v8491_v45, %v7046_v53 }
 0x26c   :  { %v2279_v25 = vmul.f32 %v2205_v12, %v2185_v59  ;;  %6370 = vmatpush1.bf16.msra.mxu0 %v6369_v19  ;;  %v8748_v62 = vpop.permute.xlu1 %2386  ;;  %v1598_v12 = vrot.slane %v7976_v3, %v7032_v47 }
 0x26d   :  { %v2605_v43 = vld [vmem:[#allocation2 + $0x258] sm:$0xf] }
 0x26e   :  { %v2311_v38 = vrot.slane %v2279_v25, 4  ;;  %v1752_v2 = vpop.permute.xlu0 %1751  ;;  %6320 = vmatprep.subr.msk.mxu1 %vm2620_vm8, %v2605_v43  ;;  %3555 = vrot.lane.b32.xlu1 %v8436_v13, %s6774_s25 }
 0x26f   :  { %v1797_v19 = vsel %vm379_vm1, %v1752_v2, %v8624_v41  ;;  %v1798_v59 = vsel %vm379_vm1, %v8658_v29, %v1752_v2  ;;  %6321 = vmatpush1.msk.msra.mxu1 %vm2620_vm8, %v2604_v14 }
 0x270   :  { %2343 = vst [vmem:[#allocation2 + $0x188] sm:$0xf0] %v2311_v38  ;;  %v1889_v25 = vmul.f32 %v1812_v44, %v1797_v19  ;;  %v1904_v43 = vmul.f32 %v1872_v18, %v1798_v59  ;;  %6424 = vmatprep.subr.bf16.mxu1 %v6423_v63  ;;  %v1526_v3 = vpop.permute.xlu1 %1525  ;;  %6322 = vmatmul.mubr.msk.f32.vlgmr.msra.gmra.mrb[4].mxu1 %vm2616_vm9, %v8280_v16 }
 0x271   :  { %v1559_v41 = vsel %vm102_vm0, %v1526_v3, %v8175_v1  ;;  %v1560_v2 = vsel %vm102_vm0, %v7992_v10, %v1526_v3  ;;  %v2560_v14 = vld [vmem:[#allocation2 + $0xf0] sm:$0xff]  ;;  %v1828_v44 = vrot.slane %v8026_v58, %v6996_v32  ;;  %v1832_v18 = vrot.slane %v8026_v58, %v7032_v47  ;;  %3230 = vmatprep.mubr.f32.mxu1 %v11839_v60 }
 0x272   :  { %v1921_v38 = vrot.slane %v1889_v25, 4  ;;  %v1936_v63 = vrot.slane %v1904_v43, 4  ;;  %v1659_v16 = vmul.f32 %v1594_v46, %v1560_v2  ;;  %v1660_v19 = vmul.f32 %v1598_v12, %v1559_v41  ;;  %v2141_v59 = vpop.permute.xlu0 %2140  ;;  %3559 = vrot.lane.b32.xlu1 %v8456_v8, %s6774_s25  ;;  %v11852_v2 = vld [vmem:[#allocation21_spill] sm:$0xff] }
 0x273   :  { %v2186_v10 = vsel %vm827_vm3, %v2141_v59, %v2143_v9  ;;  %v2187_v1 = vsel %vm827_vm3, %v8671_v27, %v2141_v59  ;;  %v6425_v3 = vpack.c.bf16 %v2560_v14, %v2544_v26  ;;  %v1868_v58 = vrot.slane %v8344_v17, %v7034_v48 }
 0x274   :  { %1953 = vst [vmem:[#allocation2 + $0x100] sm:$0xf0] %v1921_v38  ;;  %1968 = vst [vmem:[#allocation2 + $0x178] sm:$0xf0] %v1936_v63  ;;  %v1691_v46 = vrot.slane %v1659_v16, 4  ;;  %v1692_v12 = vrot.slane %v1660_v19, 4  ;;  %v2278_v25 = vmul.f32 %v2201_v0, %v2186_v10  ;;  %v2293_v43 = vmul.f32 %v2261_v34, %v2187_v1  ;;  %v1762_v41 = vpop.permute.xlu1 %1761 }
 0x275   :  { %6426 = vmatpush1.bf16.msra.mxu1 %v6425_v3  ;;  %v1792_v9 = vsel %vm379_vm1, %v1762_v41, %v11852_v2  ;;  %v1793_v59 = vsel %vm379_vm1, %v11853_v39, %v1762_v41  ;;  %v2047_v26 = vrot.slane %v8089_v24, %v6996_v32  ;;  %v2051_v14 = vrot.slane %v8089_v24, %v7032_v47  ;;  %v2563_v24 = vld [vmem:[#allocation2 + $0x108] sm:$0xff] }
 0x276   :  { %1723 = vst [vmem:[#allocation2 + $0xa0] sm:$0xf0] %v1691_v46  ;;  %1724 = vst [vmem:[#allocation2 + $0xa8] sm:$0xf0] %v1692_v12  ;;  %v2310_v0 = vrot.slane %v2278_v25, 4  ;;  %v2325_v34 = vrot.slane %v2293_v43, 4  ;;  %v1893_v38 = vmul.f32 %v1828_v44, %v1793_v59  ;;  %v1894_v63 = vmul.f32 %v1832_v18, %v1792_v9  ;;  %v8804_v16 = vpop.permute.xlu0 %1779  ;;  %3563 = vrot.lane.b32.xlu1 %v8483_v35, %s6774_s25 }
 0x277   :  { %v1783_v39 = vsel %vm379_vm1, %v8804_v16, %v8658_v29  ;;  %v2257_v19 = vrot.slane %v8491_v45, %v7034_v48  ;;  %v2579_v10 = vld [vmem:[#allocation2 + $0x188] sm:$0xff]  ;;  %v11854_v12 = vld [vmem:[#allocation23_spill] sm:$0xff]  ;;  %v11855_v43 = vld [vmem:[#allocation6_spill] sm:$0xff]  ;;  %v1221_v41 = vrot.slane %v8307_v5, %v6985_v28 }
 0x278   :  { %2342 = vst [vmem:[#allocation2 + $0x180] sm:$0xf0] %v2310_v0  ;;  %2357 = vst [vmem:[#allocation2 + $0x1f8] sm:$0xf0] %v2325_v34  ;;  %v1925_v1 = vrot.slane %v1893_v38, 4  ;;  %v1926_v44 = vrot.slane %v1894_v63, 4  ;;  %v1903_v18 = vmul.f32 %v1868_v58, %v1783_v39  ;;  %v1980_v3 = vpop.permute.xlu1 %1979  ;;  %v6371_v46 = vpack.c.bf16 %v2579_v10, %v2563_v24 }
 0x279   :  { %v2011_v25 = vsel %vm2001_vm6, %v1980_v3, %v11854_v12  ;;  %v2012_v29 = vsel %vm2001_vm6, %v11855_v43, %v1980_v3  ;;  %v1225_v58 = vrot.slane %v8307_v5, %v7013_v40  ;;  %v2091_v63 = vrot.slane %v8383_v51, %v7046_v53  ;;  %v11856_v39 = vld [vmem:[#allocation20_spill] sm:$0xff] }
 0x27a   :  { %1957 = vst [vmem:[#allocation2 + $0x120] sm:$0xf0] %v1925_v1  ;;  %1958 = vst [vmem:[#allocation2 + $0x128] sm:$0xf0] %v1926_v44  ;;  %v1935_v2 = vrot.slane %v1903_v18, 4  ;;  %v2112_v9 = vmul.f32 %v2047_v26, %v2012_v29  ;;  %v2113_v59 = vmul.f32 %v2051_v14, %v2011_v25  ;;  %v8822_v0 = vpop.permute.xlu0 %2168  ;;  %6372 = vmatprep.subr.bf16.mxu0 %v6371_v46  ;;  %3567 = vrot.lane.b32.xlu1 %v8509_v6, %s6774_s25 }
 0x27b   :  { %v2172_v34 = vsel %vm827_vm3, %v8822_v0, %v8671_v27  ;;  %v2087_v14 = vrot.slane %v8383_v51, %v7034_v48  ;;  %v1440_v27 = vrot.slane %v8265_v22, %v6985_v28  ;;  %v1444_v18 = vrot.slane %v8265_v22, %v7013_v40 }
 0x27c   :  { %1967 = vst [vmem:[#allocation2 + $0x170] sm:$0xf0] %v1935_v2  ;;  %2128 = vst [vmem:[#allocation2 + $0x1a0] sm:$0xf] %v2112_v9  ;;  %v2292_v38 = vmul.f32 %v2257_v19, %v2172_v34  ;;  %v1145_v26 = vpop.permute.xlu1 %1144  ;;  %v2420_v46 = vrot.slane %v8191_v50, %v6985_v28  ;;  %v2424_v12 = vrot.slane %v8191_v50, %v7013_v40  ;;  %v2562_v9 = vld [vmem:[#allocation2 + $0x100] sm:$0xff] }
 0x27d   :  { %2129 = vst [vmem:[#allocation2 + $0x1a8] sm:$0xf] %v2113_v59  ;;  %v1166_v6 = vsel %vm550_vm2, %v1145_v26, %v8385_v56  ;;  %v1167_v24 = vsel %vm550_vm2, %v11856_v39, %v1145_v26  ;;  %v11857_v59 = vld [vmem:[#allocation33_spill] sm:$0xff]  ;;  %v11858_v34 = vld [vmem:[#allocation24_spill] sm:$0xff] }
 0x27e   :  { %v2324_v10 = vrot.slane %v2292_v38, 4  ;;  %v1274_v19 = vmul.f32 %v1221_v41, %v1167_v24  ;;  %v1275_v1 = vmul.f32 %v1225_v58, %v1166_v6  ;;  %v2000_v44 = vpop.permute.xlu0 %1999  ;;  %3571 = vrot.lane.b32.xlu1 %v8533_v42, %s6774_s25  ;;  %v11859_v24 = vld [vmem:[#allocation28_spill] sm:$0xff] }
 0x27f   :  { %v2002_v56 = vsel %vm2001_vm6, %v8727_v54, %v2000_v44  ;;  %v2017_v3 = vsel %vm2001_vm6, %v2000_v44, %v8708_v31  ;;  %v2578_v25 = vld [vmem:[#allocation2 + $0x180] sm:$0xff] }
 0x280   :  { %2356 = vst [vmem:[#allocation2 + $0x1f0] sm:$0xf0] %v2324_v10  ;;  %v1306_v43 = vrot.slane %v1274_v19, 4  ;;  %v1307_v29 = vrot.slane %v1275_v1, 4  ;;  %v2122_v41 = vmul.f32 %v2087_v14, %v2002_v56  ;;  %v2123_v42 = vmul.f32 %v2091_v63, %v2017_v3  ;;  %v1363_v2 = vpop.permute.xlu1 %1362  ;;  %v11860_v56 = vld [vmem:[#allocation43_spill] sm:$0xff] }
 0x281   :  { %v1385_v58 = vsel %vm1378_vm5, %v1363_v2, %v11857_v59  ;;  %v1386_v31 = vsel %vm1378_vm5, %v11858_v34, %v1363_v2  ;;  %v6373_v38 = vpack.c.bf16 %v2578_v25, %v2562_v9  ;;  %v2233_v14 = vrot.slane %v8491_v45, %v6985_v28  ;;  %v11861_v25 = vld [vmem:[#allocation31_spill] sm:$0xff]  ;;  %v11862_v2 = vld [vmem:[#allocation45_spill] sm:$0xff] }
 0x282   :  { %1338 = vst [vmem:[#allocation2 + $0x40] sm:$0xf0] %v1306_v43  ;;  %1339 = vst [vmem:[#allocation2 + $0x48] sm:$0xf0] %v1307_v29  ;;  %v1493_v26 = vmul.f32 %v1440_v27, %v1386_v31  ;;  %v1494_v6 = vmul.f32 %v1444_v18, %v1385_v58  ;;  %v2361_v39 = vpop.permute.xlu0 %2360  ;;  %v2237_v63 = vrot.slane %v8491_v45, %v7013_v40  ;;  %3575 = vrot.lane.b32.xlu1 %v8555_v61, %s6774_s25  ;;  %v11863_v58 = vld [vmem:[#allocation7_spill] sm:$0xff] }
 0x283   :  { %2138 = vst [vmem:[#allocation2 + $0x1f0] sm:$0xf] %v2122_v41  ;;  %2139 = vst [vmem:[#allocation2 + $0x1f8] sm:$0xf] %v2123_v42  ;;  %v2404_v10 = vsel %vm2390_vm7, %v2361_v39, %v11859_v24  ;;  %v2405_v19 = vsel %vm2390_vm7, %v8739_v7, %v2361_v39  ;;  %6374 = vmatpush1.bf16.msra.mxu0 %v6373_v38  ;;  %v2476_v18 = vrot.slane %v8615_v57, %v7034_v48  ;;  %v9587_v48 = vld [vmem:[%s11596_s6 + $0x8] sm:$0xff] }
 0x284   :  { %1509 = vst [vmem:[#allocation2 + $0xc0] sm:$0xf] %v1493_v26  ;;  %1510 = vst [vmem:[#allocation2 + $0xc8] sm:$0xf] %v1494_v6  ;;  %v2497_v27 = vmul.f32 %v2420_v46, %v2405_v19  ;;  %v2498_v1 = vmul.f32 %v2424_v12, %v2404_v10  ;;  %v2159_v44 = vpop.permute.xlu1 %2158  ;;  %v2480_v61 = vrot.slane %v8615_v57, %v7046_v53  ;;  %v11864_v10 = vld [vmem:[#allocation39_spill] sm:$0xff] }
 0x285   :  { %v2177_v3 = vsel %vm827_vm3, %v2159_v44, %v11860_v56  ;;  %v2178_v43 = vsel %vm827_vm3, %v11861_v25, %v2159_v44  ;;  %v2452_v41 = vrot.slane %v8615_v57, %v6985_v28  ;;  %v2456_v42 = vrot.slane %v8615_v57, %v7013_v40  ;;  %v2576_v44 = vld [vmem:[#allocation2 + $0x170] sm:$0xff]  ;;  %11942 = vst [vmem:[#allocation68_spill] sm:$0xff] %v9587_v48 }
 0x286   :  { %2513 = vst [vmem:[#allocation2 + $0x200] sm:$0xf] %v2497_v27  ;;  %2514 = vst [vmem:[#allocation2 + $0x208] sm:$0xf] %v2498_v1  ;;  %v2286_v29 = vmul.f32 %v2233_v14, %v2178_v43  ;;  %v2287_v46 = vmul.f32 %v2237_v63, %v2177_v3  ;;  %v2389_v12 = vpop.permute.xlu0 %2388  ;;  %3579 = vrot.lane.b32.xlu1 %v11862_v2, %s6774_s25  ;;  %v1205_v34 = vrot.slane %v11863_v58, %v6996_v32  ;;  %v2577_v63 = vld [vmem:[#allocation2 + $0x178] sm:$0xff]  ;;  %v11865_v43 = vld [vmem:[#allocation18_spill] sm:$0xff] }
 0x287   :  { %v2391_v9 = vsel %vm2390_vm7, %v8748_v62, %v2389_v12  ;;  %v2406_v59 = vsel %vm2390_vm7, %v2389_v12, %v8739_v7  ;;  %v1209_v31 = vrot.slane %v11863_v58, %v7032_v47  ;;  %v1626_v27 = vrot.slane %v8340_v21, %v6996_v32 }
 0x288   :  { %v2318_v38 = vrot.slane %v2286_v29, 4  ;;  %v2319_v26 = vrot.slane %v2287_v46, 4  ;;  %v2511_v6 = vmul.f32 %v2476_v18, %v2391_v9  ;;  %v2512_v39 = vmul.f32 %v2480_v61, %v2406_v59  ;;  %v2377_v14 = vpop.permute.xlu1 %2376  ;;  %v11866_v46 = vld [vmem:[#allocation4_spill] sm:$0xff] }
 0x289   :  { %v2396_v24 = vsel %vm2390_vm7, %v2377_v14, %v8641_v4  ;;  %v2397_v7 = vsel %vm2390_vm7, %v11864_v10, %v2377_v14  ;;  %v1630_v1 = vrot.slane %v8340_v21, %v7032_v47  ;;  %v1428_v59 = vrot.slane %v7882_v23, %v7032_v47 }
 0x28a   :  { %v2593_v19 = vld [vmem:[#allocation2 + $0x1f8] sm:$0xff]  ;;  %v2592_v18 = vld [vmem:[#allocation2 + $0x1f0] sm:$0xff]  ;;  %2350 = vst [vmem:[#allocation2 + $0x1c0] sm:$0xf0] %v2318_v38  ;;  %2351 = vst [vmem:[#allocation2 + $0x1c8] sm:$0xf0] %v2319_v26  ;;  %v2505_v61 = vmul.f32 %v2452_v41, %v2397_v7  ;;  %v2506_v56 = vmul.f32 %v2456_v42, %v2396_v24  ;;  %v1137_v4 = vpop.permute.xlu0 %1136  ;;  %3611 = vrot.lane.b32.xlu1 %v8725_v30, %s6774_s25  ;;  %v1424_v42 = vrot.slane %v7882_v23, %v6996_v32 }
 0x28b   :  { %2527 = vst [vmem:[#allocation2 + $0x270] sm:$0xf] %v2511_v6  ;;  %2528 = vst [vmem:[#allocation2 + $0x278] sm:$0xf] %v2512_v39  ;;  %v6427_v3 = vpack.c.bf16 %v2593_v19, %v2577_v63  ;;  %v6429_v25 = vpack.c.bf16 %v2592_v18, %v2576_v44  ;;  %v1170_v29 = vsel %vm550_vm2, %v1137_v4, %v11865_v43  ;;  %v11867_v38 = vld [vmem:[#allocation27_spill] sm:$0xff]  ;;  %v11869_v19 = vld [vmem:[#allocation17_spill] sm:$0xff] }
 0x28c   :  { %v1171_v12 = vsel %vm550_vm2, %v11866_v46, %v1137_v4  ;;  %2521 = vst [vmem:[#allocation2 + $0x240] sm:$0xf] %v2505_v61  ;;  %2522 = vst [vmem:[#allocation2 + $0x248] sm:$0xf] %v2506_v56  ;;  %v1271_v9 = vmul.f32 %v1209_v31, %v1170_v29  ;;  %v1542_v41 = vpop.permute.xlu1 %1541  ;;  %v1456_v31 = vrot.slane %v8265_v22, %v6996_v32  ;;  %v8951_v4 = vld [vmem:[%s11593_s4] sm:$0xff] }
 0x28d   :  { %v1270_v2 = vmul.f32 %v1205_v34, %v1171_v12  ;;  %6428 = vmatprep.subr.bf16.mxu1 %v6427_v3  ;;  %v1551_v58 = vsel %vm102_vm0, %v1542_v41, %v8662_v55  ;;  %v1552_v26 = vsel %vm102_vm0, %v11867_v38, %v1542_v41  ;;  %v2595_v6 = vld [vmem:[#allocation2 + $0x208] sm:$0xf]  ;;  %v2594_v34 = vld [vmem:[#allocation2 + $0x200] sm:$0xf]  ;;  %v1460_v39 = vrot.slane %v8265_v22, %v7032_v47  ;;  %v11868_v55 = vld [vmem:[#allocation19_spill] sm:$0xff] }
 0x28e   :  { %6430 = vmatpush1.bf16.msra.mxu1 %v6429_v25  ;;  %v1303_v63 = vrot.slane %v1271_v9, 4  ;;  %v1667_v23 = vmul.f32 %v1626_v27, %v1552_v26  ;;  %v1668_v24 = vmul.f32 %v1630_v1, %v1551_v58  ;;  %v1355_v10 = vpop.permute.xlu0 %1354  ;;  %6305 = vmatprep.subr.msk.mxu0 %vm2620_vm8, %v2595_v6  ;;  %v2217_v22 = vrot.slane %v8050_v37, %v6996_v32  ;;  %v11871_v41 = vld [vmem:[#allocation32_spill] sm:$0xff] }
 0x28f   :  { %v1302_v14 = vrot.slane %v1270_v2, 4  ;;  %3799 = vrot.lane.b32.xlu1 %v8411_v11, %s6777_s11  ;;  %v1389_v7 = vsel %vm1378_vm5, %v1355_v10, %v11868_v55  ;;  %v1390_v44 = vsel %vm1378_vm5, %v11869_v19, %v1355_v10  ;;  %6306 = vmatpush1.msk.msra.mxu0 %vm2620_vm8, %v2594_v34  ;;  %v2221_v27 = vrot.slane %v8050_v37, %v7032_v47  ;;  %v11870_v37 = vld [vmem:[#allocation38_spill] sm:$0xff] }
 0x290   :  { %1335 = vst [vmem:[#allocation2 + $0x28] sm:$0xf0] %v1303_v63  ;;  %v1699_v1 = vrot.slane %v1667_v23, 4  ;;  %v1700_v11 = vrot.slane %v1668_v24, 4  ;;  %v1489_v18 = vmul.f32 %v1424_v42, %v1390_v44  ;;  %v1490_v61 = vmul.f32 %v1428_v59, %v1389_v7  ;;  %v1371_v56 = vpop.permute.xlu1 %1370  ;;  %6307 = vmatmul.mubr.msk.f32.vlgmr.msra.gmra.mrb[0].mxu0 %vm2616_vm9, %v8951_v4  ;;  %v11872_v59 = vld [vmem:[#allocation5_spill] sm:$0xff]  ;;  %v11875_v19 = vld [vmem:[#allocation26_spill] sm:$0xff] }
 0x291   :  { %1334 = vst [vmem:[#allocation2 + $0x20] sm:$0xf0] %v1302_v14  ;;  %v1381_v3 = vsel %vm1378_vm5, %v1371_v56, %v8731_v52  ;;  %v1382_v25 = vsel %vm1378_vm5, %v11870_v37, %v1371_v56  ;;  %v2249_v46 = vrot.slane %v8491_v45, %v6996_v32  ;;  %2875 = vmatprep.mubr.f32.mxu0 %v11839_v60 }
 0x292   :  { %v2609_v43 = vld [vmem:[#allocation2 + $0x278] sm:$0xf]  ;;  %v2608_v29 = vld [vmem:[#allocation2 + $0x270] sm:$0xf]  ;;  %1731 = vst [vmem:[#allocation2 + $0xe0] sm:$0xf0] %v1699_v1  ;;  %v1497_v12 = vmul.f32 %v1456_v31, %v1382_v25  ;;  %v1498_v2 = vmul.f32 %v1460_v39, %v1381_v3  ;;  %v2151_v9 = vpop.permute.xlu0 %2150  ;;  %v2253_v52 = vrot.slane %v8491_v45, %v7032_v47  ;;  %v2440_v6 = vrot.slane %v8191_v50, %v7032_v47 }
 0x293   :  { %1732 = vst [vmem:[#allocation2 + $0xe8] sm:$0xf0] %v1700_v11  ;;  %1505 = vst [vmem:[#allocation2 + $0xa0] sm:$0xf] %v1489_v18  ;;  %6326 = vmatprep.subr.msk.mxu1 %vm2620_vm8, %v2609_v43  ;;  %3803 = vrot.lane.b32.xlu1 %v8436_v13, %s6777_s11  ;;  %v2181_v42 = vsel %vm827_vm3, %v2151_v9, %v11871_v41  ;;  %v2182_v58 = vsel %vm827_vm3, %v11872_v59, %v2151_v9  ;;  %v11873_v31 = vld [vmem:[#allocation42_spill] sm:$0xff] }
 0x294   :  { %1506 = vst [vmem:[#allocation2 + $0xa8] sm:$0xf] %v1490_v61  ;;  %6327 = vmatpush1.msk.msra.mxu1 %vm2620_vm8, %v2608_v29  ;;  %1513 = vst [vmem:[#allocation2 + $0xe0] sm:$0xf] %v1497_v12  ;;  %v2282_v38 = vmul.f32 %v2217_v22, %v2182_v58  ;;  %v2283_v26 = vmul.f32 %v2221_v27, %v2181_v42  ;;  %v2167_v45 = vpop.permute.xlu1 %2166  ;;  %v2436_v13 = vrot.slane %v8191_v50, %v6996_v32  ;;  %v11874_v50 = vld [vmem:[#allocation40_spill] sm:$0xff] }
 0x295   :  { %1514 = vst [vmem:[#allocation2 + $0xe8] sm:$0xf] %v1498_v2  ;;  %6328 = vmatmul.mubr.msk.f32.vlgmr.msra.gmra.mrb[6].mxu1 %vm2616_vm9, %v8951_v4  ;;  %v2173_v34 = vsel %vm827_vm3, %v2167_v45, %v8822_v0  ;;  %v2174_v39 = vsel %vm827_vm3, %v11873_v31, %v2167_v45  ;;  %v2468_v14 = vrot.slane %v8615_v57, %v6996_v32  ;;  %v2567_v45 = vld [vmem:[#allocation2 + $0x128] sm:$0xff] }
 0x296   :  { %v2472_v63 = vrot.slane %v8615_v57, %v7032_v47  ;;  %v2314_v23 = vrot.slane %v2282_v38, 4  ;;  %v2315_v24 = vrot.slane %v2283_v26, 4  ;;  %v2290_v10 = vmul.f32 %v2249_v46, %v2174_v39  ;;  %v2369_v7 = vpop.permute.xlu0 %2368 }
 0x297   :  { %v2291_v55 = vmul.f32 %v2253_v52, %v2173_v34  ;;  %3807 = vrot.lane.b32.xlu1 %v8456_v8, %s6777_s11  ;;  %v2400_v0 = vsel %vm2390_vm7, %v2369_v7, %v11874_v50  ;;  %v2401_v44 = vsel %vm2390_vm7, %v11875_v19, %v2369_v7  ;;  %v1610_v22 = vrot.slane %v8340_v21, %v6985_v28  ;;  %v2535_v61 = vld [vmem:[#allocation2 + $0x28] sm:$0xff]  ;;  %v11879_v34 = vld [vmem:[#allocation30_spill] sm:$0xff] }
 0x298   :  { %v1614_v57 = vrot.slane %v8340_v21, %v7013_v40  ;;  %2346 = vst [vmem:[#allocation2 + $0x1a0] sm:$0xf0] %v2314_v23  ;;  %2347 = vst [vmem:[#allocation2 + $0x1a8] sm:$0xf0] %v2315_v24  ;;  %v2322_v27 = vrot.slane %v2290_v10, 4  ;;  %v2501_v11 = vmul.f32 %v2436_v13, %v2401_v44  ;;  %v2502_v8 = vmul.f32 %v2440_v6, %v2400_v0  ;;  %v2385_v18 = vpop.permute.xlu1 %2384  ;;  %v2534_v25 = vld [vmem:[#allocation2 + $0x20] sm:$0xff] }
 0x299   :  { %v2323_v1 = vrot.slane %v2291_v55, 4  ;;  %v2392_v56 = vsel %vm2390_vm7, %v2385_v18, %v8748_v62  ;;  %v2393_v3 = vsel %vm2390_vm7, %v8715_v15, %v2385_v18  ;;  %v11876_v62 = vld [vmem:[#allocation29_spill] sm:$0xff]  ;;  %v11877_v15 = vld [vmem:[#allocation22_spill] sm:$0xff]  ;;  %v1844_v59 = vrot.slane %v8344_v17, %v6985_v28  ;;  %v11878_v13 = vld [vmem:[#allocation35_spill] sm:$0xff] }
 0x29a   :  { %v2550_v43 = vld [vmem:[#allocation2 + $0xa0] sm:$0xff]  ;;  %2354 = vst [vmem:[#allocation2 + $0x1e0] sm:$0xf0] %v2322_v27  ;;  %2517 = vst [vmem:[#allocation2 + $0x220] sm:$0xf] %v2501_v11  ;;  %v2509_v21 = vmul.f32 %v2468_v14, %v2393_v3  ;;  %v2510_v29 = vmul.f32 %v2472_v63, %v2392_v56  ;;  %v1534_v46 = vpop.permute.xlu0 %1533  ;;  %v1848_v58 = vrot.slane %v8344_v17, %v7013_v40 }
 0x29b   :  { %v2551_v37 = vld [vmem:[#allocation2 + $0xa8] sm:$0xff]  ;;  %2355 = vst [vmem:[#allocation2 + $0x1e8] sm:$0xf0] %v2323_v1  ;;  %2518 = vst [vmem:[#allocation2 + $0x228] sm:$0xf] %v2502_v8  ;;  %v6385_v2 = vpack.c.bf16 %v2550_v43, %v2534_v25  ;;  %3811 = vrot.lane.b32.xlu1 %v8483_v35, %s6777_s11  ;;  %v1555_v9 = vsel %vm102_vm0, %v1534_v46, %v11876_v62  ;;  %v1556_v52 = vsel %vm102_vm0, %v11877_v15, %v1534_v46  ;;  %v2566_v23 = vld [vmem:[#allocation2 + $0x120] sm:$0xff] }
 0x29c   :  { %v6383_v12 = vpack.c.bf16 %v2551_v37, %v2535_v61  ;;  %2525 = vst [vmem:[#allocation2 + $0x260] sm:$0xf] %v2509_v21  ;;  %2526 = vst [vmem:[#allocation2 + $0x268] sm:$0xf] %v2510_v29  ;;  %v1663_v41 = vmul.f32 %v1610_v22, %v1556_v52  ;;  %v1664_v42 = vmul.f32 %v1614_v57, %v1555_v9  ;;  %v9037_v22 = vld [vmem:[%s11594_s1] sm:$0xff]  ;;  %v11880_v57 = vld [vmem:[#allocation37_spill] sm:$0xff] }
 0x29d   :  { %v2063_v39 = vrot.slane %v8383_v51, %v6985_v28  ;;  %v2067_v14 = vrot.slane %v8383_v51, %v7013_v40  ;;  %v11881_v1 = vld [vmem:[#allocation34_spill] sm:$0xff]  ;;  %v1237_v56 = vrot.slane %v8307_v5, %v6996_v32  ;;  %v1241_v3 = vrot.slane %v8307_v5, %v7032_v47  ;;  %v2539_v43 = vld [vmem:[#allocation2 + $0x48] sm:$0xff]  ;;  %v2538_v9 = vld [vmem:[#allocation2 + $0x40] sm:$0xff] }
 0x29e   :  { %6384 = vmatprep.subr.bf16.mxu0 %v6383_v12  ;;  %v1695_v35 = vrot.slane %v1663_v41, 4  ;;  %v1696_v38 = vrot.slane %v1664_v42, 4  ;;  %v1770_v26 = vpop.permute.xlu0 %1769  ;;  %v9055_v21 = vld [vmem:[%s11594_s1 + $0x8] sm:$0xff]  ;;  %v1067_v12 = vrot.slane %v7920_v20, %v6996_v32 }
 0x29f   :  { %6386 = vmatpush1.bf16.msra.mxu0 %v6385_v2  ;;  %3859 = vrot.lane.b32.xlu1 %v8725_v30, %s6777_s11  ;;  %v1788_v6 = vsel %vm379_vm1, %v1770_v26, %v11878_v13  ;;  %v1789_v31 = vsel %vm379_vm1, %v11879_v34, %v1770_v26  ;;  %v2583_v63 = vld [vmem:[#allocation2 + $0x1a8] sm:$0xff]  ;;  %v2582_v24 = vld [vmem:[#allocation2 + $0x1a0] sm:$0xff]  ;;  %v1071_v2 = vrot.slane %v7920_v20, %v7032_v47  ;;  %v9076_v20 = vld [vmem:[%s11594_s1 + $0x10] sm:$0xff] }
 0x2a0   :  { %1727 = vst [vmem:[#allocation2 + $0xc0] sm:$0xf0] %v1695_v35  ;;  %1728 = vst [vmem:[#allocation2 + $0xc8] sm:$0xf0] %v1696_v38  ;;  %v1897_v10 = vmul.f32 %v1844_v59, %v1789_v31  ;;  %v1898_v55 = vmul.f32 %v1848_v58, %v1788_v6  ;;  %v6387_v7 = vpack.c.bf16 %v2583_v63, %v2567_v45  ;;  %v11882_v46 = vld [vmem:[#allocation25_spill] sm:$0xff]  ;;  %v11883_v26 = vld [vmem:[#allocation36_spill] sm:$0xff] }
 0x2a1   :  { %v6389_v50 = vpack.c.bf16 %v2582_v24, %v2566_v23  ;;  %v2598_v25 = vld [vmem:[#allocation2 + $0x220] sm:$0xf]  ;;  %v1860_v34 = vrot.slane %v8344_v17, %v6996_v32  ;;  %v1864_v31 = vrot.slane %v8344_v17, %v7032_v47 }
 0x2a2   :  { %v1929_v0 = vrot.slane %v1897_v10, 4  ;;  %v1930_v19 = vrot.slane %v1898_v55, 4  ;;  %v1988_v44 = vpop.permute.xlu0 %1987  ;;  %6388 = vmatprep.subr.bf16.mxu0 %v6387_v7  ;;  %v2599_v8 = vld [vmem:[#allocation2 + $0x228] sm:$0xf]  ;;  %v9093_v55 = vld [vmem:[%s11594_s1 + $0x18] sm:$0xff] }
 0x2a3   :  { %4047 = vrot.lane.b32.xlu1 %v9037_v22, %s6772_s9  ;;  %v2007_v27 = vsel %vm2001_vm6, %v1988_v44, %v11880_v57  ;;  %v2008_v11 = vsel %vm2001_vm6, %v11881_v1, %v1988_v44  ;;  %6390 = vmatpush1.bf16.msra.mxu0 %v6389_v50  ;;  %v11884_v7 = vld [vmem:[#allocation41_spill] sm:$0xff]  ;;  %v2079_v44 = vrot.slane %v8383_v51, %v6996_v32 }
 0x2a4   :  { %1961 = vst [vmem:[#allocation2 + $0x140] sm:$0xf0] %v1929_v0  ;;  %1962 = vst [vmem:[#allocation2 + $0x148] sm:$0xf0] %v1930_v19  ;;  %v2116_v18 = vmul.f32 %v2063_v39, %v2008_v11  ;;  %v2117_v61 = vmul.f32 %v2067_v14, %v2007_v27  ;;  %6311 = vmatprep.subr.msk.mxu0 %vm2620_vm8, %v2599_v8  ;;  %v2083_v57 = vrot.slane %v8383_v51, %v7032_v47  ;;  %v2603_v27 = vld [vmem:[#allocation2 + $0x248] sm:$0xf] }
 0x2a6   :  { %2132 = vst [vmem:[#allocation2 + $0x1c0] sm:$0xf] %v2116_v18  ;;  %2133 = vst [vmem:[#allocation2 + $0x1c8] sm:$0xf] %v2117_v61  ;;  %v1153_v37 = vpop.permute.xlu0 %1152  ;;  %v11885_v18 = vld [vmem:[#allocation44_spill] sm:$0xff] }
 0x2a7   :  { %4051 = vrot.lane.b32.xlu1 %v9055_v21, %s6772_s9  ;;  %v1162_v29 = vsel %vm550_vm2, %v1153_v37, %v8649_v36  ;;  %v1163_v5 = vsel %vm550_vm2, %v11882_v46, %v1153_v37  ;;  %6312 = vmatpush1.msk.msra.mxu0 %vm2620_vm8, %v2598_v25  ;;  %v2555_v62 = vld [vmem:[#allocation2 + $0xc8] sm:$0xff]  ;;  %v2554_v15 = vld [vmem:[#allocation2 + $0xc0] sm:$0xff]  ;;  %v9116_v25 = vpop.permute.xlu1 %3303 }
 0x2a8   :  { %v1278_v52 = vmul.f32 %v1237_v56, %v1163_v5  ;;  %v1279_v41 = vmul.f32 %v1241_v3, %v1162_v29  ;;  %6313 = vmatmul.mubr.msk.f32.vlgmr.msra.gmra.mrb[2].mxu0 %vm2616_vm9, %v8951_v4  ;;  %v6399_v36 = vpack.c.bf16 %v2555_v62, %v2539_v43  ;;  %v6401_v42 = vpack.c.bf16 %v2554_v15, %v2538_v9  ;;  %v2602_v3 = vld [vmem:[#allocation2 + $0x240] sm:$0xf]  ;;  %v2559_v37 = vld [vmem:[#allocation2 + $0xe8] sm:$0xff] }
 0x2a9   :  { %3017 = vmatprep.mubr.f32.mxu0 %v11839_v60  ;;  %11886 = vst [vmem:[#allocation21_spill] sm:$0xff] %v9116_v25  ;;  %v2558_v29 = vld [vmem:[#allocation2 + $0xe0] sm:$0xff] }
 0x2aa   :  { %v1310_v59 = vrot.slane %v1278_v52, 4  ;;  %v1311_v58 = vrot.slane %v1279_v41, 4  ;;  %v983_v35 = vpop.permute.xlu0 %982  ;;  %6400 = vmatprep.subr.bf16.mxu0 %v6399_v36  ;;  %v9136_v36 = vld [vmem:[%s11594_s1 + $0x20] sm:$0xff] }
 0x2ab   :  { %4055 = vrot.lane.b32.xlu1 %v9076_v20, %s6772_s9  ;;  %v993_v38 = vsel %vm990_vm4, %v983_v35, %v8605_v49  ;;  %v994_v45 = vsel %vm990_vm4, %v11883_v26, %v983_v35  ;;  %6402 = vmatpush1.bf16.msra.mxu0 %v6401_v42  ;;  %v2571_v39 = vld [vmem:[#allocation2 + $0x148] sm:$0xff]  ;;  %v2570_v63 = vld [vmem:[#allocation2 + $0x140] sm:$0xff]  ;;  %v9124_v5 = vpop.permute.xlu1 %3307 }
 0x2ac   :  { %1342 = vst [vmem:[#allocation2 + $0x60] sm:$0xf0] %v1310_v59  ;;  %1343 = vst [vmem:[#allocation2 + $0x68] sm:$0xf0] %v1311_v58  ;;  %v1108_v13 = vmul.f32 %v1067_v12, %v994_v45  ;;  %v1109_v6 = vmul.f32 %v1071_v2, %v993_v38  ;;  %v2606_v42 = vld [vmem:[#allocation2 + $0x260] sm:$0xf] }
 0x2ad   :  { %v2587_v14 = vld [vmem:[#allocation2 + $0x1c8] sm:$0xff]  ;;  %v2586_v23 = vld [vmem:[#allocation2 + $0x1c0] sm:$0xff] }
 0x2ae   :  { %1124 = vst [vmem:[#allocation2 + $0x60] sm:$0xf] %v1108_v13  ;;  %1125 = vst [vmem:[#allocation2 + $0x68] sm:$0xf] %v1109_v6  ;;  %v1778_v49 = vpop.permute.xlu0 %1777  ;;  %v6403_v24 = vpack.c.bf16 %v2587_v14, %v2571_v39  ;;  %v6405_v10 = vpack.c.bf16 %v2586_v23, %v2570_v63 }
 0x2af   :  { %4059 = vrot.lane.b32.xlu1 %v9093_v55, %s6772_s9  ;;  %v1784_v17 = vsel %vm379_vm1, %v1778_v49, %v8804_v16  ;;  %v1785_v50 = vsel %vm379_vm1, %v11884_v7, %v1778_v49  ;;  %v9130_v41 = vpop.permute.xlu1 %3311 }
 0x2b0   :  { %v1901_v0 = vmul.f32 %v1860_v34, %v1785_v50  ;;  %v1902_v19 = vmul.f32 %v1864_v31, %v1784_v17  ;;  %6404 = vmatprep.subr.bf16.mxu0 %v6403_v24 }
 0x2b1   :  { %6406 = vmatpush1.bf16.msra.mxu0 %v6405_v10 }
 0x2b2   :  { %v1933_v1 = vrot.slane %v1901_v0, 4  ;;  %v1934_v11 = vrot.slane %v1902_v19, 4  ;;  %v1996_v8 = vpop.permute.xlu0 %1995  ;;  %6317 = vmatprep.subr.msk.mxu0 %vm2620_vm8, %v2603_v27 }
 0x2b3   :  { %4107 = vrot.lane.b32.xlu1 %v8725_v30, %s6772_s9  ;;  %v2003_v16 = vsel %vm2001_vm6, %v1996_v8, %v8727_v54  ;;  %v2004_v61 = vsel %vm2001_vm6, %v11885_v18, %v1996_v8  ;;  %v9143_v59 = vpop.permute.xlu1 %3315 }
 0x2b4   :  { %1965 = vst [vmem:[#allocation2 + $0x160] sm:$0xf0] %v1933_v1  ;;  %1966 = vst [vmem:[#allocation2 + $0x168] sm:$0xf0] %v1934_v11  ;;  %v2120_v51 = vmul.f32 %v2079_v44, %v2004_v61  ;;  %v2121_v56 = vmul.f32 %v2083_v57, %v2003_v16 }
 0x2b5   :  { %6318 = vmatpush1.msk.msra.mxu0 %vm2620_vm8, %v2602_v3  ;;  %v2543_v43 = vld [vmem:[#allocation2 + $0x68] sm:$0xff]  ;;  %v2542_v30 = vld [vmem:[#allocation2 + $0x60] sm:$0xff]  ;;  %11887 = vst [vmem:[#allocation16_spill] sm:$0xff] %v9143_v59 }
 0x2b6   :  { %2136 = vst [vmem:[#allocation2 + $0x1e0] sm:$0xf] %v2120_v51  ;;  %2137 = vst [vmem:[#allocation2 + $0x1e8] sm:$0xf] %v2121_v56  ;;  %6319 = vmatmul.mubr.msk.f32.vlgmr.msra.gmra.mrb[4].mxu0 %vm2616_vm9, %v8951_v4  ;;  %v6415_v54 = vpack.c.bf16 %v2559_v37, %v2543_v43  ;;  %v6417_v46 = vpack.c.bf16 %v2558_v29, %v2542_v30 }
 0x2b7   :  { %4331 = vrot.lane.b32.xlu1 %v9055_v21, %s6773_s18  ;;  %3159 = vmatprep.mubr.f32.mxu0 %v11839_v60  ;;  %v2607_v60 = vld [vmem:[#allocation2 + $0x268] sm:$0xf]  ;;  %v9149_v58 = vpop.permute.xlu1 %3319 }
 0x2b8   :  { %6416 = vmatprep.subr.bf16.mxu0 %v6415_v54  ;;  %11888 = vst [vmem:[#allocation23_spill] sm:$0xff] %v9149_v58 }
 0x2b9   :  { %6418 = vmatpush1.bf16.msra.mxu0 %v6417_v46 }
 0x2bb   :  { %4335 = vrot.lane.b32.xlu1 %v9076_v20, %s6773_s18  ;;  %v2575_v12 = vld [vmem:[#allocation2 + $0x168] sm:$0xff]  ;;  %v2574_v62 = vld [vmem:[#allocation2 + $0x160] sm:$0xff]  ;;  %v9153_v35 = vpop.permute.xlu1 %3323 }
 0x2bc   :  { %11889 = vst [vmem:[#allocation6_spill] sm:$0xff] %v9153_v35 }
 0x2bd   :  { %v2591_v2 = vld [vmem:[#allocation2 + $0x1e8] sm:$0xff]  ;;  %v2590_v9 = vld [vmem:[#allocation2 + $0x1e0] sm:$0xff] }
 0x2be   :  { %v6419_v15 = vpack.c.bf16 %v2591_v2, %v2575_v12  ;;  %v6421_v52 = vpack.c.bf16 %v2590_v9, %v2574_v62  ;;  %v9270_v9 = vld [vmem:[%s11594_s1 + $0x28] sm:$0xff] }
 0x2bf   :  { %4339 = vrot.lane.b32.xlu1 %v9093_v55, %s6773_s18 }
 0x2c0   :  { %6420 = vmatprep.subr.bf16.mxu0 %v6419_v15 }
 0x2c1   :  { %6422 = vmatpush1.bf16.msra.mxu0 %v6421_v52  ;;  %v9281_v52 = vld [vmem:[%s11594_s1 + $0x30] sm:$0xff] }
 0x2c2   :  { %6323 = vmatprep.subr.msk.mxu0 %vm2620_vm8, %v2607_v60  ;;  %v9290_v60 = vld [vmem:[%s11594_s1 + $0x38] sm:$0xff] }
 0x2c3   :  { %4343 = vrot.lane.b32.xlu1 %v9136_v36, %s6773_s18 }
 0x2c5   :  { %6324 = vmatpush1.msk.msra.mxu0 %vm2620_vm8, %v2606_v42 }
 0x2c6   :  { %6325 = vmatmul.mubr.msk.f32.vlgmr.msra.gmra.mrb[6].mxu0 %vm2616_vm9, %v8951_v4  ;;  %v9159_v4 = vpop.permute.xlu1 %3327  ;;  %v9171_v45 = vpop.permute.xlu0 %2613  ;;  %vm5613_vm9 = vcmask 130048  }
 0x2c7   :  { %4327 = vrot.lane.b32.xlu1 %v9037_v22, %s6773_s18  ;;  %11890 = vst [vmem:[#allocation20_spill] sm:$0xff] %v9159_v4  ;;  %6360 = vmatprep.mubr.msk.f32.mxu1 %vm5613_vm9, %v9587_v48 }
 0x2c8   :  { %6359 = vmatprep.mubr.msk.f32.mxu0 %vm5613_vm9, %v9587_v48 }
 0x2ca   :  { %v9163_v38 = vpop.permute.xlu1 %3331 }
 0x2cb   :  { %4579 = vrot.lane.b32.xlu1 %v9055_v21, %s6778_s12  ;;  %11891 = vst [vmem:[#allocation33_spill] sm:$0xff] %v9163_v38 }
 0x2ce   :  { %v9169_v26 = vpop.permute.xlu1 %3335 }
 0x2cf   :  { %4583 = vrot.lane.b32.xlu1 %v9076_v20, %s6778_s12  ;;  %11892 = vst [vmem:[#allocation24_spill] sm:$0xff] %v9169_v26 }
 0x2d2   :  { %v9178_v39 = vpop.permute.xlu1 %3339 }
 0x2d3   :  { %4587 = vrot.lane.b32.xlu1 %v9093_v55, %s6778_s12  ;;  %11893 = vst [vmem:[#allocation28_spill] sm:$0xff] %v9178_v39 }
 0x2d6   :  { %v9188_v63 = vpop.permute.xlu1 %3343 }
 0x2d7   :  { %4591 = vrot.lane.b32.xlu1 %v9136_v36, %s6778_s12  ;;  %11894 = vst [vmem:[#allocation43_spill] sm:$0xff] %v9188_v63 }
 0x2da   :  { %v9192_v23 = vpop.permute.xlu1 %3347 }
 0x2db   :  { %4575 = vrot.lane.b32.xlu1 %v9037_v22, %s6778_s12  ;;  %11895 = vst [vmem:[#allocation31_spill] sm:$0xff] %v9192_v23  ;;  %v9350_v23 = vld [vmem:[%s11594_s1 + $0x40] sm:$0xff] }
 0x2de   :  { %v9198_v49 = vpop.permute.xlu1 %3351 }
 0x2df   :  { %4827 = vrot.lane.b32.xlu1 %v9055_v21, %s6775_s26  ;;  %11896 = vst [vmem:[#allocation45_spill] sm:$0xff] %v9198_v49 }
 0x2e2   :  { %v9202_v24 = vpop.permute.xlu1 %3355 }
 0x2e3   :  { %4831 = vrot.lane.b32.xlu1 %v9076_v20, %s6775_s26  ;;  %11897 = vst [vmem:[#allocation7_spill] sm:$0xff] %v9202_v24 }
 0x2e6   :  { %v2806_v13 = vpop.f32.mrb[0].mxu1  ;;  %v9206_v10 = vpop.permute.xlu1 %3359 }
 0x2e7   :  { %4835 = vrot.lane.b32.xlu1 %v9093_v55, %s6775_s26  ;;  %v9175_v6 = vpop.f32.mrb[1].mxu1  ;;  %v2807_v34 = vadd.f32 %v2806_v13, %v9171_v45  ;;  %11898 = vst [vmem:[#allocation39_spill] sm:$0xff] %v9206_v10 }
 0x2e9   :  { %vm3239_vm10 = vcmp.ge.f32.partialorder %v2807_v34, 0.0  ;;  %v3255_v31 = vmul.f32 0.1, %v2807_v34 }
 0x2eb   :  { %4839 = vrot.lane.b32.xlu1 %v9136_v36, %s6775_s26  ;;  %v9182_v14 = vsel %vm3239_vm10, %v2807_v34, %v3255_v31 }
 0x2ec   :  { %3309 = vrot.lane.b32.xlu0 %v9182_v14, %s6776_s2 }
 0x2ef   :  { %4823 = vrot.lane.b32.xlu1 %v9037_v22, %s6775_s26 }
 0x2f3   :  { %5075 = vrot.lane.b32.xlu1 %v9055_v21, %s6779_s13  ;;  %v9208_v21 = vpop.permute.xlu1 %3363 }
 0x2f4   :  { %11899 = vst [vmem:[#allocation18_spill] sm:$0xff] %v9208_v21 }
 0x2f7   :  { %5079 = vrot.lane.b32.xlu1 %v9076_v20, %s6779_s13  ;;  %v9214_v50 = vpop.permute.xlu1 %3551 }
 0x2f8   :  { %11900 = vst [vmem:[#allocation4_spill] sm:$0xff] %v9214_v50 }
 0x2fb   :  { %5083 = vrot.lane.b32.xlu1 %v9093_v55, %s6779_s13  ;;  %v9216_v0 = vpop.permute.xlu1 %3555 }
 0x2ff   :  { %5087 = vrot.lane.b32.xlu1 %v9136_v36, %s6779_s13  ;;  %v9218_v19 = vpop.permute.xlu1 %3559 }
 0x303   :  { %5071 = vrot.lane.b32.xlu1 %v9037_v22, %s6779_s13  ;;  %v9220_v44 = vpop.permute.xlu1 %3563 }
 0x304   :  { %11901 = vst [vmem:[#allocation27_spill] sm:$0xff] %v9220_v44 }
 0x307   :  { %v9222_v57 = vpop.permute.xlu1 %3567 }
 0x308   :  { %11902 = vst [vmem:[#allocation19_spill] sm:$0xff] %v9222_v57 }
 0x30b   :  { %v9224_v27 = vpop.permute.xlu1 %3571 }
 0x30c   :  { %11903 = vst [vmem:[#allocation17_spill] sm:$0xff] %v9224_v27 }
 0x30f   :  { %v9226_v22 = vpop.permute.xlu1 %3575 }
 0x310   :  { %11904 = vst [vmem:[#allocation38_spill] sm:$0xff] %v9226_v22 }
 0x312   :  { %v9210_v17 = vpop.f32.mrb[2].mxu1 }
 0x313   :  { %v9212_v7 = vpop.f32.mrb[3].mxu1  ;;  %v9228_v1 = vpop.permute.xlu1 %3579 }
 0x314   :  { %11905 = vst [vmem:[#allocation32_spill] sm:$0xff] %v9228_v1  ;;  %v9562_v1 = vld [vmem:[%s11594_s1 + $0x60] sm:$0xff]  ;;  %v2951_v4 = vadd.f32 %v9212_v7, %v9171_v45 }
 0x316   :  { %vm3244_vm10 = vcmp.ge.f32.partialorder %v2951_v4, 0.0 }
 0x317   :  { %v9234_v16 = vpop.permute.xlu1 %3611 }
 0x318   :  { %11906 = vst [vmem:[#allocation5_spill] sm:$0xff] %v9234_v16 }
 0x31b   :  { %v9236_v18 = vpop.permute.xlu1 %3799 }
 0x31c   :  { %11907 = vst [vmem:[#allocation42_spill] sm:$0xff] %v9236_v18  ;;  %v2949_v18 = vadd.f32 %v9210_v17, %v9171_v45 }
 0x31e   :  { %vm3243_vm15 = vcmp.ge.f32.partialorder %v2949_v18, 0.0 }
 0x31f   :  { %v9238_v61 = vpop.permute.xlu1 %3803 }
 0x323   :  { %v9240_v51 = vpop.permute.xlu1 %3807 }
 0x327   :  { %v9242_v56 = vpop.permute.xlu1 %3811 }
 0x328   :  { %11908 = vst [vmem:[#allocation40_spill] sm:$0xff] %v9242_v56 }
 0x32b   :  { %v9244_v3 = vpop.permute.xlu1 %3859 }
 0x32c   :  { %11909 = vst [vmem:[#allocation26_spill] sm:$0xff] %v9244_v3 }
 0x32f   :  { %v9253_v2 = vpop.permute.xlu1 %4047 }
 0x330   :  { %11911 = vst [vmem:[#allocation22_spill] sm:$0xff] %v9253_v2 }
 0x333   :  { %v9263_v62 = vpop.permute.xlu1 %4051 }
 0x337   :  { %v9274_v15 = vpop.permute.xlu1 %4055 }
 0x33b   :  { %v9294_v42 = vpop.permute.xlu1 %4059 }
 0x33c   :  { %11912 = vst [vmem:[#allocation35_spill] sm:$0xff] %v9294_v42 }
 0x33f   :  { %v9304_v31 = vpop.permute.xlu1 %4107 }
 0x340   :  { %11913 = vst [vmem:[#allocation30_spill] sm:$0xff] %v9304_v31 }
 0x343   :  { %v9230_v11 = vpop.f32.mrb[4].mxu1 }
 0x344   :  { %v9232_v8 = vpop.f32.mrb[5].mxu1 }
 0x363   :  { %v2735_v37 = vpop.f32.mrb[0].mxu0 }
 0x364   :  { %v2736_v43 = vadd.f32 %v2735_v37, %v9171_v45  ;;  %v2737_v30 = vpop.f32.mrb[1].mxu0  ;;  %v9314_v37 = vpop.permute.xlu1 %4331 }
 0x365   :  { %11914 = vst [vmem:[#allocation37_spill] sm:$0xff] %v9314_v37  ;;  %v2738_v49 = vadd.f32 %v2737_v30, %v9171_v45  ;;  %v2809_v30 = vadd.f32 %v9175_v6, %v9171_v45  ;;  %v9461_v37 = vld [vmem:[%s11594_s1 + $0x58] sm:$0xff] }
 0x366   :  { %vm3237_vm11 = vcmp.ge.f32.partialorder %v2736_v43, 0.0  ;;  %v3253_v29 = vmul.f32 0.1, %v2736_v43 }
 0x367   :  { %v3254_v39 = vmul.f32 0.1, %v2738_v49  ;;  %vm3238_vm12 = vcmp.ge.f32.partialorder %v2738_v49, 0.0  ;;  %v3256_v47 = vmul.f32 0.1, %v2809_v30  ;;  %vm3240_vm13 = vcmp.ge.f32.partialorder %v2809_v30, 0.0 }
 0x368   :  { %v9247_v54 = vpop.f32.mrb[6].mxu1  ;;  %v9249_v46 = vsel %vm3237_vm11, %v2736_v43, %v3253_v29  ;;  %v9324_v29 = vpop.permute.xlu1 %4335 }
 0x369   :  { %11910 = vst [vmem:[#allocation29_spill] sm:$0xff] %v9249_v46  ;;  %v9251_v12 = vpop.f32.mrb[7].mxu1  ;;  %3549 = vrot.lane.b32.xlu0 %v9249_v46, %s6774_s25  ;;  %3301 = vrot.lane.b32.xlu1 %v9249_v46, %s6776_s2  ;;  %v9364_v58 = vsel %vm3238_vm12, %v2738_v49, %v3254_v39  ;;  %v9372_v32 = vsel %vm3240_vm13, %v2809_v30, %v3256_v47 }
 0x36a   :  { %11917 = vst [vmem:[#allocation36_spill] sm:$0xff] %v9364_v58 }
 0x36c   :  { %v9334_v10 = vpop.permute.xlu1 %4339 }
 0x36d   :  { %3557 = vrot.lane.b32.xlu0 %v9182_v14, %s6774_s25  ;;  %3815 = vrot.lane.b32.xlu1 %v9136_v36, %s6777_s11 }
 0x370   :  { %v9341_v24 = vpop.permute.xlu1 %4343 }
 0x371   :  { %3797 = vrot.lane.b32.xlu0 %v9249_v46, %s6777_s11  ;;  %3819 = vrot.lane.b32.xlu1 %v9270_v9, %s6777_s11  ;;  %11915 = vst [vmem:[#allocation34_spill] sm:$0xff] %v9341_v24 }
 0x374   :  { %v9362_v57 = vpop.permute.xlu1 %4327 }
 0x375   :  { %3805 = vrot.lane.b32.xlu0 %v9182_v14, %s6777_s11  ;;  %3823 = vrot.lane.b32.xlu1 %v9281_v52, %s6777_s11  ;;  %11916 = vst [vmem:[#allocation25_spill] sm:$0xff] %v9362_v57 }
 0x378   :  { %v9370_v6 = vpop.permute.xlu1 %4579 }
 0x379   :  { %4045 = vrot.lane.b32.xlu0 %v9249_v46, %s6772_s9  ;;  %3827 = vrot.lane.b32.xlu1 %v9290_v60, %s6777_s11  ;;  %11918 = vst [vmem:[#allocation41_spill] sm:$0xff] %v9370_v6  ;;  %v9452_v6 = vpop.permute.xlu0 %3309 }
 0x37b   :  { %v9296_v13 = vpop.f32.mrb[2].mxu0 }
 0x37c   :  { %v9298_v34 = vpop.f32.mrb[3].mxu0  ;;  %v9382_v39 = vpop.permute.xlu1 %4583  ;;  %v2878_v57 = vadd.f32 %v9296_v13, %v9171_v45 }
 0x37d   :  { %4053 = vrot.lane.b32.xlu0 %v9182_v14, %s6772_s9  ;;  %4063 = vrot.lane.b32.xlu1 %v9136_v36, %s6772_s9 }
 0x37e   :  { %v3257_v2 = vmul.f32 0.1, %v2878_v57  ;;  %vm3241_vm14 = vcmp.ge.f32.partialorder %v2878_v57, 0.0 }
 0x380   :  { %v9388_v47 = vpop.permute.xlu1 %4587 }
 0x381   :  { %4333 = vrot.lane.b32.xlu0 %v9182_v14, %s6773_s18  ;;  %4067 = vrot.lane.b32.xlu1 %v9270_v9, %s6772_s9 }
 0x384   :  { %v9398_v49 = vpop.permute.xlu1 %4591 }
 0x385   :  { %4325 = vrot.lane.b32.xlu0 %v9249_v46, %s6773_s18  ;;  %4071 = vrot.lane.b32.xlu1 %v9281_v52, %s6772_s9  ;;  %11919 = vst [vmem:[#allocation44_spill] sm:$0xff] %v9398_v49 }
 0x388   :  { %v9404_v30 = vpop.permute.xlu1 %4575 }
 0x389   :  { %v9316_v43 = vpop.f32.mrb[4].mxu0  ;;  %4581 = vrot.lane.b32.xlu0 %v9182_v14, %s6778_s12  ;;  %4075 = vrot.lane.b32.xlu1 %v9290_v60, %s6772_s9  ;;  %11920 = vst [vmem:[#allocation46_spill] sm:$0xff] %v9404_v30 }
 0x38a   :  { %v9322_v36 = vpop.f32.mrb[5].mxu0 }
 0x38d   :  { %4573 = vrot.lane.b32.xlu0 %v9249_v46, %s6778_s12  ;;  %4347 = vrot.lane.b32.xlu1 %v9270_v9, %s6773_s18 }
 0x391   :  { %4829 = vrot.lane.b32.xlu0 %v9182_v14, %s6775_s26  ;;  %4351 = vrot.lane.b32.xlu1 %v9281_v52, %s6773_s18 }
 0x395   :  { %4821 = vrot.lane.b32.xlu0 %v9249_v46, %s6775_s26  ;;  %4355 = vrot.lane.b32.xlu1 %v9290_v60, %s6773_s18 }
 0x399   :  { %v9343_v63 = vpop.f32.mrb[6].mxu0  ;;  %5077 = vrot.lane.b32.xlu0 %v9182_v14, %s6779_s13  ;;  %4359 = vrot.lane.b32.xlu1 %v9350_v23, %s6773_s18 }
 0x39a   :  { %v9354_v26 = vpop.f32.mrb[7].mxu0 }
 0x39d   :  { %5069 = vrot.lane.b32.xlu0 %v9249_v46, %s6779_s13  ;;  %4595 = vrot.lane.b32.xlu1 %v9270_v9, %s6778_s12  ;;  %v9414_v46 = vpop.permute.xlu1 %4827 }
 0x39e   :  { %11921 = vst [vmem:[#allocation47_spill] sm:$0xff] %v9414_v46  ;;  %v9448_v46 = vld [vmem:[%s11594_s1 + $0x50] sm:$0xff] }
 0x3a1   :  { %3305 = vrot.lane.b32.xlu0 %v9364_v58, %s6776_s2  ;;  %4599 = vrot.lane.b32.xlu1 %v9281_v52, %s6778_s12  ;;  %v9420_v30 = vpop.permute.xlu1 %4831 }
 0x3a5   :  { %3313 = vrot.lane.b32.xlu0 %v9372_v32, %s6776_s2  ;;  %4603 = vrot.lane.b32.xlu1 %v9290_v60, %s6778_s12 }
 0x3a9   :  { %3553 = vrot.lane.b32.xlu0 %v9364_v58, %s6774_s25  ;;  %4607 = vrot.lane.b32.xlu1 %v9350_v23, %s6778_s12 }
 0x3ad   :  { %3561 = vrot.lane.b32.xlu0 %v9372_v32, %s6774_s25  ;;  %4843 = vrot.lane.b32.xlu1 %v9270_v9, %s6775_s26 }
 0x3b1   :  { %3801 = vrot.lane.b32.xlu0 %v9364_v58, %s6777_s11  ;;  %4847 = vrot.lane.b32.xlu1 %v9281_v52, %s6775_s26 }
 0x3b5   :  { %3809 = vrot.lane.b32.xlu0 %v9372_v32, %s6777_s11  ;;  %4851 = vrot.lane.b32.xlu1 %v9290_v60, %s6775_s26 }
 0x3b9   :  { %4049 = vrot.lane.b32.xlu0 %v9364_v58, %s6772_s9  ;;  %4855 = vrot.lane.b32.xlu1 %v9350_v23, %s6775_s26 }
 0x3bd   :  { %4057 = vrot.lane.b32.xlu0 %v9372_v32, %s6772_s9  ;;  %5091 = vrot.lane.b32.xlu1 %v9270_v9, %s6779_s13  ;;  %v9430_v9 = vpop.permute.xlu1 %4835 }
 0x3c1   :  { %4329 = vrot.lane.b32.xlu0 %v9364_v58, %s6773_s18  ;;  %5095 = vrot.lane.b32.xlu1 %v9281_v52, %s6779_s13  ;;  %v9437_v52 = vld [vmem:[%s11594_s1 + $0x48] sm:$0xff] }
 0x3c5   :  { %4337 = vrot.lane.b32.xlu0 %v9372_v32, %s6773_s18  ;;  %5099 = vrot.lane.b32.xlu1 %v9290_v60, %s6779_s13  ;;  %v9441_v60 = vpop.permute.xlu1 %4839 }
 0x3c6   :  { %11922 = vst [vmem:[#allocation48_spill] sm:$0xff] %v9441_v60 }
 0x3c9   :  { %4577 = vrot.lane.b32.xlu0 %v9364_v58, %s6778_s12  ;;  %5103 = vrot.lane.b32.xlu1 %v9350_v23, %s6779_s13  ;;  %v9465_v31 = vpop.permute.xlu1 %4823 }
 0x3ca   :  { %11923 = vst [vmem:[#allocation49_spill] sm:$0xff] %v9465_v31  ;;  %v3259_v31 = vmul.f32 0.1, %v2949_v18 }
 0x3cc   :  { %v9487_v50 = vsel %vm3243_vm15, %v2949_v18, %v3259_v31 }
 0x3cd   :  { %4585 = vrot.lane.b32.xlu0 %v9372_v32, %s6778_s12  ;;  %3583 = vrot.lane.b32.xlu1 %v9350_v23, %s6774_s25  ;;  %v9479_v16 = vpop.permute.xlu1 %5075 }
 0x3ce   :  { %11926 = vst [vmem:[#allocation52_spill] sm:$0xff] %v9479_v16 }
 0x3d1   :  { %4825 = vrot.lane.b32.xlu0 %v9364_v58, %s6775_s26  ;;  %3587 = vrot.lane.b32.xlu1 %v9437_v52, %s6774_s25 }
 0x3d5   :  { %4833 = vrot.lane.b32.xlu0 %v9372_v32, %s6775_s26  ;;  %3591 = vrot.lane.b32.xlu1 %v9448_v46, %s6774_s25 }
 0x3d9   :  { %5073 = vrot.lane.b32.xlu0 %v9364_v58, %s6779_s13  ;;  %3595 = vrot.lane.b32.xlu1 %v9461_v37, %s6774_s25  ;;  %v9477_v58 = vsel %vm3241_vm14, %v2878_v57, %v3257_v2  ;;  %v9493_v57 = vpop.permute.xlu1 %5079 }
 0x3da   :  { %11925 = vst [vmem:[#allocation51_spill] sm:$0xff] %v9477_v58  ;;  %11928 = vst [vmem:[#allocation54_spill] sm:$0xff] %v9493_v57 }
 0x3db   :  { %v9467_v3 = vpop.permute.xlu0 %3549 }
 0x3dc   :  { %11924 = vst [vmem:[#allocation50_spill] sm:$0xff] %v9467_v3 }
 0x3dd   :  { %5081 = vrot.lane.b32.xlu0 %v9372_v32, %s6779_s13  ;;  %3831 = vrot.lane.b32.xlu1 %v9350_v23, %s6777_s11  ;;  %v9503_v18 = vpop.permute.xlu1 %5083 }
 0x3de   :  { %11930 = vst [vmem:[#allocation56_spill] sm:$0xff] %v9503_v18 }
 0x3df   :  { %v9475_v13 = vpop.permute.xlu0 %3557 }
 0x3e1   :  { %3317 = vrot.lane.b32.xlu0 %v9477_v58, %s6776_s2  ;;  %3835 = vrot.lane.b32.xlu1 %v9437_v52, %s6777_s11 }
 0x3e3   :  { %v9485_v17 = vpop.permute.xlu0 %3797 }
 0x3e4   :  { %11927 = vst [vmem:[#allocation53_spill] sm:$0xff] %v9485_v17  ;;  %v9515_v17 = vpop.permute.xlu1 %5087 }
 0x3e5   :  { %3325 = vrot.lane.b32.xlu0 %v9487_v50, %s6776_s2  ;;  %3839 = vrot.lane.b32.xlu1 %v9448_v46, %s6777_s11  ;;  %11931 = vst [vmem:[#allocation57_spill] sm:$0xff] %v9515_v17 }
 0x3e7   :  { %v9495_v2 = vpop.permute.xlu0 %3805 }
 0x3e9   :  { %3565 = vrot.lane.b32.xlu0 %v9477_v58, %s6774_s25  ;;  %3843 = vrot.lane.b32.xlu1 %v9461_v37, %s6777_s11 }
 0x3eb   :  { %v9501_v16 = vpop.permute.xlu0 %4045 }
 0x3ec   :  { %11929 = vst [vmem:[#allocation55_spill] sm:$0xff] %v9501_v16 }
 0x3ed   :  { %3573 = vrot.lane.b32.xlu0 %v9487_v50, %s6774_s25  ;;  %4079 = vrot.lane.b32.xlu1 %v9350_v23, %s6772_s9  ;;  %v9525_v23 = vpop.permute.xlu1 %5071 }
 0x3ee   :  { %11933 = vst [vmem:[#allocation59_spill] sm:$0xff] %v9525_v23 }
 0x3ef   :  { %v9509_v31 = vpop.permute.xlu0 %4053 }
 0x3f1   :  { %4341 = vrot.lane.b32.xlu0 %v9477_v58, %s6773_s18  ;;  %4083 = vrot.lane.b32.xlu1 %v9437_v52, %s6772_s9  ;;  %v9537_v28 = vpop.permute.xlu1 %3301 }
 0x3f2   :  { %11934 = vst [vmem:[#allocation60_spill] sm:$0xff] %v9537_v28 }
 0x3f3   :  { %v9517_v21 = vpop.permute.xlu0 %4333 }
 0x3f5   :  { %4589 = vrot.lane.b32.xlu0 %v9477_v58, %s6778_s12  ;;  %4087 = vrot.lane.b32.xlu1 %v9448_v46, %s6772_s9 }
 0x3f7   :  { %v9523_v16 = vpop.permute.xlu0 %4325 }
 0x3f8   :  { %11932 = vst [vmem:[#allocation58_spill] sm:$0xff] %v9523_v16  ;;  %v9547_v16 = vpop.permute.xlu1 %3815 }
 0x3f9   :  { %4837 = vrot.lane.b32.xlu0 %v9477_v58, %s6775_s26  ;;  %4091 = vrot.lane.b32.xlu1 %v9461_v37, %s6772_s9  ;;  %11937 = vst [vmem:[#allocation63_spill] sm:$0xff] %v9547_v16  ;;  %v3397_v16 = vld [vmem:[%s11592_s3] ss:$8 sm:$0xf] }
 0x3fb   :  { %v9531_v3 = vpop.permute.xlu0 %4581 }
 0x3fd   :  { %5085 = vrot.lane.b32.xlu0 %v9477_v58, %s6779_s13  ;;  %4363 = vrot.lane.b32.xlu1 %v9437_v52, %s6773_s18 }
 0x3ff   :  { %v9539_v27 = vpop.permute.xlu0 %4573 }
 0x400   :  { %11935 = vst [vmem:[#allocation61_spill] sm:$0xff] %v9539_v27  ;;  %v2880_v27 = vadd.f32 %v9298_v34, %v9171_v45  ;;  %v9572_v34 = vpop.permute.xlu1 %3819 }
 0x401   :  { %3813 = vrot.lane.b32.xlu0 %v9477_v58, %s6777_s11  ;;  %4367 = vrot.lane.b32.xlu1 %v9448_v46, %s6773_s18  ;;  %11939 = vst [vmem:[#allocation65_spill] sm:$0xff] %v9572_v34  ;;  %v3260_v34 = vmul.f32 0.1, %v2951_v4 }
 0x402   :  { %vm3242_vm8 = vcmp.ge.f32.partialorder %v2880_v27, 0.0 }
 0x403   :  { %v9545_v23 = vpop.permute.xlu0 %4829  ;;  %v9614_v48 = vsel %vm3244_vm10, %v2951_v4, %v3260_v34  ;;  %v3390_v4 = vsel %vm990_vm4, %v9130_v41, %v9143_v59 }
 0x404   :  { %11936 = vst [vmem:[#allocation62_spill] sm:$0xff] %v9545_v23 }
 0x405   :  { %3821 = vrot.lane.b32.xlu0 %v9487_v50, %s6777_s11  ;;  %4371 = vrot.lane.b32.xlu1 %v9461_v37, %s6773_s18 }
 0x407   :  { %v9553_v22 = vpop.permute.xlu0 %4821 }
 0x408   :  { %11938 = vst [vmem:[#allocation64_spill] sm:$0xff] %v9553_v22  ;;  %v3398_v22 = vld [vmem:[%s11592_s3] ss:$8 sm:$0xf0] }
 0x409   :  { %4061 = vrot.lane.b32.xlu0 %v9477_v58, %s6772_s9  ;;  %4375 = vrot.lane.b32.xlu1 %v9562_v1, %s6773_s18  ;;  %v3258_v58 = vmul.f32 0.1, %v2880_v27  ;;  %v9578_v38 = vor.u32 %v3398_v22, %v3397_v16  ;;  %v9597_v16 = vpop.permute.xlu1 %3823 }
 0x40a   :  { %11945 = vst [vmem:[#allocation71_spill] sm:$0xff] %v9597_v16 }
 0x40b   :  { %v9574_v35 = vpop.permute.xlu0 %5077  ;;  %11941 = vst [vmem:[#allocation67_spill] sm:$0xff] %v9578_v38  ;;  %v9595_v22 = vsel %vm3242_vm8, %v2880_v27, %v3258_v58  ;;  %v3412_v53 = vrot.slane %v9578_v38, %v7013_v40  ;;  %v11946_v27 = vld [vmem:[#allocation11_spill] sm:$0xff] }
 0x40c   :  { %11940 = vst [vmem:[#allocation66_spill] sm:$0xff] %v9574_v35  ;;  %11944 = vst [vmem:[#allocation70_spill] sm:$0xff] %v9595_v22  ;;  %v3420_v16 = vrot.slane %v9578_v38, %v11946_v27 }
 0x40d   :  { %4069 = vrot.lane.b32.xlu0 %v9487_v50, %s6772_s9  ;;  %4611 = vrot.lane.b32.xlu1 %v9437_v52, %s6778_s12  ;;  %v9629_v34 = vpop.permute.xlu1 %3827 }
 0x40e   :  { %11948 = vst [vmem:[#allocation72_spill] sm:$0xff] %v9629_v34  ;;  %v3504_v34 = vmul.f32 %v3420_v16, %v3390_v4 }
 0x40f   :  { %v9593_v7 = vpop.permute.xlu0 %5069 }
 0x410   :  { %11943 = vst [vmem:[#allocation69_spill] sm:$0xff] %v9593_v7  ;;  %v3394_v7 = vsel %vm990_vm4, %v9116_v25, %v9124_v5  ;;  %v11947_v25 = vld [vmem:[#allocation8_spill] sm:$0xff] }
 0x411   :  { %3321 = vrot.lane.b32.xlu0 %v9595_v22, %s6776_s2  ;;  %4615 = vrot.lane.b32.xlu1 %v9448_v46, %s6778_s12  ;;  %v3502_v35 = vmul.f32 %v3412_v53, %v3394_v7  ;;  %v3416_v17 = vrot.slane %v9578_v38, %v11947_v25 }
 0x413   :  { %v3306_v58 = vpop.permute.xlu0 %3305 }
 0x414   :  { %v3393_v40 = vsel %vm990_vm4, %v9537_v28, %v3306_v58  ;;  %v3391_v57 = vsel %vm990_vm4, %v3306_v58, %v9452_v6  ;;  %v6331_v58 = vld [vmem:[%s11592_s3 + $0x1] ss:$8 sm:$0xf] }
 0x415   :  { %v3486_v18 = vmul.f32 %v3412_v53, %v3393_v40  ;;  %3329 = vrot.lane.b32.xlu0 %v9614_v48, %s6776_s2  ;;  %4619 = vrot.lane.b32.xlu1 %v9461_v37, %s6778_s12  ;;  %v3392_v40 = vsel %vm990_vm4, %v9124_v5, %v9130_v41  ;;  %v6332_v28 = vld [vmem:[%s11592_s3 + $0x1] ss:$8 sm:$0xf0]  ;;  %v3487_v38 = vmul.f32 %v3416_v17, %v3391_v57 }
 0x416   :  { %v3503_v5 = vmul.f32 %v3416_v17, %v3392_v40  ;;  %v9651_v41 = vor.u32 %v6332_v28, %v6331_v58  ;;  %v6336_v17 = vld [vmem:[%s11592_s3 + $0x2] ss:$8 sm:$0xf0] }
 0x417   :  { %v9635_v53 = vpop.permute.xlu0 %3313  ;;  %v6431_v7 = vpack.c.bf16 %v3502_v35, %v3486_v18  ;;  %v9655_v18 = vpop.permute.xlu1 %4063 }
 0x418   :  { %11949 = vst [vmem:[#allocation73_spill] sm:$0xff] %v9635_v53  ;;  %v3389_v59 = vsel %vm990_vm4, %v9452_v6, %v9635_v53  ;;  %11950 = vst [vmem:[#allocation74_spill] sm:$0xff] %v9655_v18  ;;  %v6469_v60 = vpack.c.bf16 %v3503_v5, %v3487_v38  ;;  %v3668_v6 = vrot.slane %v9651_v41, %v11946_v27 }
 0x419   :  { %v3488_v23 = vmul.f32 %v3420_v16, %v3389_v59  ;;  %3569 = vrot.lane.b32.xlu0 %v9595_v22, %s6774_s25  ;;  %4623 = vrot.lane.b32.xlu1 %v9562_v1, %s6778_s12  ;;  %v6335_v59 = vld [vmem:[%s11592_s3 + $0x2] ss:$8 sm:$0xf]  ;;  %v3664_v38 = vrot.slane %v9651_v41, %v11947_v25  ;;  %v3640_v16 = vsel %vm550_vm2, %v9216_v0, %v9218_v19 }
 0x41a   :  { %6432 = vmatprep.subr.bf16.mxu0 %v6431_v7 }
 0x41b   :  { %v9653_v35 = vpop.permute.xlu0 %3553  ;;  %v6467_v57 = vpack.c.bf16 %v3504_v34, %v3488_v23  ;;  %v3638_v23 = vsel %vm550_vm2, %v9218_v19, %v9220_v44  ;;  %v9685_v34 = vor.u32 %v6336_v17, %v6335_v59 }
 0x41c   :  { %v3639_v28 = vsel %vm550_vm2, %v9653_v35, %v9475_v13  ;;  %v3752_v58 = vmul.f32 %v3668_v6, %v3638_v23 }
 0x41d   :  { %3577 = vrot.lane.b32.xlu0 %v9614_v48, %s6774_s25  ;;  %6468 = vmatprep.subr.bf16.mxu1 %v6467_v57  ;;  %v3735_v40 = vmul.f32 %v3664_v38, %v3639_v28  ;;  %v9693_v57 = vpop.permute.xlu1 %4067  ;;  %v3916_v19 = vrot.slane %v9685_v34, %v11946_v27  ;;  %v6339_v28 = vld [vmem:[%s11592_s3 + $0x3] ss:$8 sm:$0xf] }
 0x41e   :  { %4859 = vrot.lane.b32.xlu1 %v9437_v52, %s6775_s26  ;;  %6470 = vmatpush1.bf16.msra.mxu1 %v6469_v60  ;;  %v3751_v60 = vmul.f32 %v3664_v38, %v3640_v16  ;;  %v6340_v38 = vld [vmem:[%s11592_s3 + $0x3] ss:$8 sm:$0xf0]  ;;  %v3888_v16 = vsel %vm1378_vm5, %v9238_v61, %v9240_v51 }
 0x41f   :  { %v9683_v4 = vpop.permute.xlu0 %3561 }
 0x420   :  { %11951 = vst [vmem:[#allocation75_spill] sm:$0xff] %v9683_v4  ;;  %v3637_v7 = vsel %vm550_vm2, %v9475_v13, %v9683_v4  ;;  %v3912_v13 = vrot.slane %v9685_v34, %v11947_v25  ;;  %v6473_v23 = vpack.c.bf16 %v3751_v60, %v3735_v40  ;;  %v9725_v40 = vor.u32 %v6340_v38, %v6339_v28 }
 0x421   :  { %v3736_v5 = vmul.f32 %v3668_v6, %v3637_v7  ;;  %3817 = vrot.lane.b32.xlu0 %v9595_v22, %s6777_s11  ;;  %v3886_v6 = vsel %vm1378_vm5, %v9240_v51, %v9242_v56  ;;  %v3020_v51 = vadd.f32 %v9316_v43, %v9171_v45  ;;  %v9731_v18 = vpop.permute.xlu1 %4071  ;;  %v3091_v38 = vadd.f32 %v9230_v11, %v9171_v45 }
 0x422   :  { %4863 = vrot.lane.b32.xlu1 %v9448_v46, %s6775_s26  ;;  %v3999_v60 = vmul.f32 %v3912_v13, %v3888_v16  ;;  %v4164_v43 = vrot.slane %v9725_v40, %v11946_v27 }
 0x423   :  { %v9699_v59 = vpop.permute.xlu0 %3801  ;;  %v6471_v17 = vpack.c.bf16 %v3752_v58, %v3736_v5  ;;  %v4000_v58 = vmul.f32 %v3916_v19, %v3886_v6  ;;  %v4160_v6 = vrot.slane %v9725_v40, %v11947_v25  ;;  %vm3245_vm11 = vcmp.ge.f32.partialorder %v3020_v51, 0.0 }
 0x424   :  { %v3887_v7 = vsel %vm1378_vm5, %v9699_v59, %v9495_v2  ;;  %vm3247_vm12 = vcmp.ge.f32.partialorder %v3091_v38, 0.0 }
 0x425   :  { %3825 = vrot.lane.b32.xlu0 %v9614_v48, %s6777_s11  ;;  %6472 = vmatprep.subr.bf16.mxu1 %v6471_v17  ;;  %v3983_v56 = vmul.f32 %v3912_v13, %v3887_v7  ;;  %v9763_v11 = vpop.permute.xlu1 %4075 }
 0x426   :  { %4867 = vrot.lane.b32.xlu1 %v9461_v37, %s6775_s26  ;;  %6474 = vmatpush1.bf16.msra.mxu1 %v6473_v23  ;;  %v3261_v23 = vmul.f32 0.1, %v3020_v51  ;;  %11953 = vst [vmem:[#allocation77_spill] sm:$0xff] %v9763_v11 }
 0x427   :  { %v9727_v5 = vpop.permute.xlu0 %3809  ;;  %v6477_v16 = vpack.c.bf16 %v3999_v60, %v3983_v56  ;;  %v3263_v56 = vmul.f32 0.1, %v3091_v38 }
 0x428   :  { %11952 = vst [vmem:[#allocation76_spill] sm:$0xff] %v9727_v5  ;;  %v3885_v17 = vsel %vm1378_vm5, %v9495_v2, %v9727_v5  ;;  %v4136_v2 = vsel %vm102_vm0, %v9263_v62, %v9274_v15  ;;  %v9769_v60 = vsel %vm3245_vm11, %v3020_v51, %v3261_v23 }
 0x429   :  { %v3984_v4 = vmul.f32 %v3916_v19, %v3885_v17  ;;  %4065 = vrot.lane.b32.xlu0 %v9595_v22, %s6772_s9  ;;  %v4134_v19 = vsel %vm102_vm0, %v9274_v15, %v9294_v42  ;;  %v4247_v7 = vmul.f32 %v4160_v6, %v4136_v2  ;;  %11955 = vst [vmem:[#allocation79_spill] sm:$0xff] %v9769_v60  ;;  %v9785_v2 = vpop.permute.xlu1 %4347 }
 0x42a   :  { %4871 = vrot.lane.b32.xlu1 %v9562_v1, %s6775_s26  ;;  %v4248_v15 = vmul.f32 %v4164_v43, %v4134_v19  ;;  %v3022_v17 = vadd.f32 %v9322_v36, %v9171_v45  ;;  %v3093_v36 = vadd.f32 %v9232_v8, %v9171_v45  ;;  %11956 = vst [vmem:[#allocation80_spill] sm:$0xff] %v9785_v2 }
 0x42b   :  { %v9745_v28 = vpop.permute.xlu0 %4049  ;;  %v6475_v13 = vpack.c.bf16 %v4000_v58, %v3984_v4  ;;  %v9787_v23 = vsel %vm3247_vm12, %v3091_v38, %v3263_v56 }
 0x42c   :  { %v4135_v4 = vsel %vm102_vm0, %v9745_v28, %v9509_v31  ;;  %vm3246_vm13 = vcmp.ge.f32.partialorder %v3022_v17, 0.0  ;;  %vm3248_vm14 = vcmp.ge.f32.partialorder %v3093_v36, 0.0 }
 0x42d   :  { %4073 = vrot.lane.b32.xlu0 %v9614_v48, %s6772_s9  ;;  %6476 = vmatprep.subr.bf16.mxu1 %v6475_v13  ;;  %v4231_v42 = vmul.f32 %v4160_v6, %v4135_v4  ;;  %v3262_v6 = vmul.f32 0.1, %v3022_v17  ;;  %v3164_v4 = vadd.f32 %v9354_v26, %v9171_v45  ;;  %v3235_v26 = vadd.f32 %v9251_v12, %v9171_v45 }
 0x42e   :  { %5107 = vrot.lane.b32.xlu1 %v9437_v52, %s6779_s13  ;;  %6478 = vmatpush1.bf16.msra.mxu1 %v6477_v16 }
 0x42f   :  { %v9767_v58 = vpop.permute.xlu0 %4057  ;;  %v6481_v19 = vpack.c.bf16 %v4247_v7, %v4231_v42  ;;  %v3162_v42 = vadd.f32 %v9343_v63, %v9171_v45  ;;  %v3233_v63 = vadd.f32 %v9247_v54, %v9171_v45  ;;  %v9832_v54 = vld [vmem:[%s11594_s1 + $0x68] sm:$0xff]  ;;  %vm3250_vm10 = vcmp.ge.f32.partialorder %v3164_v4, 0.0 }
 0x430   :  { %11954 = vst [vmem:[#allocation78_spill] sm:$0xff] %v9767_v58  ;;  %v4133_v13 = vsel %vm102_vm0, %v9509_v31, %v9767_v58  ;;  %v3264_v31 = vmul.f32 0.1, %v3093_v36  ;;  %vm3252_vm11 = vcmp.ge.f32.partialorder %v3235_v26, 0.0 }
 0x431   :  { %v4232_v5 = vmul.f32 %v4164_v43, %v4133_v13  ;;  %3333 = vrot.lane.b32.xlu0 %v9769_v60, %s6776_s2  ;;  %v6485_v43 = vpack.c.bf16 %v9076_v20, %v9182_v14  ;;  %v3265_v38 = vmul.f32 0.1, %v3162_v42  ;;  %vm3249_vm15 = vcmp.ge.f32.partialorder %v3162_v42, 0.0  ;;  %v6351_v58 = vld [vmem:[%s11592_s3 + $0x7] ss:$8 sm:$0xf] }
 0x432   :  { %5111 = vrot.lane.b32.xlu1 %v9448_v46, %s6779_s13  ;;  %v6483_v46 = vpack.c.bf16 %v9093_v55, %v9372_v32  ;;  %v9805_v32 = vpop.permute.xlu1 %4351  ;;  %v3267_v14 = vmul.f32 0.1, %v3233_v63  ;;  %vm3251_vm8 = vcmp.ge.f32.partialorder %v3233_v63, 0.0 }
 0x433   :  { %v9781_v52 = vpop.permute.xlu0 %4329  ;;  %v6479_v51 = vpack.c.bf16 %v4248_v15, %v4232_v5  ;;  %v9797_v5 = vsel %vm3246_vm13, %v3022_v17, %v3262_v6  ;;  %11957 = vst [vmem:[#allocation81_spill] sm:$0xff] %v9805_v32  ;;  %v9821_v16 = vsel %vm3249_vm15, %v3162_v42, %v3265_v38  ;;  %v3266_v17 = vmul.f32 0.1, %v3164_v4 }
 0x434   :  { %11958 = vst [vmem:[#allocation82_spill] sm:$0xff] %v9821_v16  ;;  %v9838_v56 = vsel %vm3251_vm8, %v3233_v63, %v3267_v14  ;;  %v3268_v6 = vmul.f32 0.1, %v3235_v26  ;;  %v6343_v14 = vld [vmem:[%s11592_s3 + $0x5] ss:$8 sm:$0xf] }
 0x435   :  { %3341 = vrot.lane.b32.xlu0 %v9787_v23, %s6776_s2  ;;  %6480 = vmatprep.subr.bf16.mxu1 %v6479_v51  ;;  %11960 = vst [vmem:[#allocation84_spill] sm:$0xff] %v9838_v56  ;;  %v9849_v51 = vld [vmem:[%s11594_s1 + $0x70] sm:$0xff] }
 0x436   :  { %5115 = vrot.lane.b32.xlu1 %v9461_v37, %s6779_s13  ;;  %6482 = vmatpush1.bf16.msra.mxu1 %v6481_v19  ;;  %v9811_v37 = vsel %vm3248_vm14, %v3093_v36, %v3264_v31  ;;  %v9825_v7 = vpop.permute.xlu1 %4355  ;;  %v9855_v19 = vsel %vm3250_vm10, %v3164_v4, %v3266_v17  ;;  %v9863_v12 = vsel %vm3252_vm11, %v3235_v26, %v3268_v6  ;;  %v6344_v4 = vld [vmem:[%s11592_s3 + $0x5] ss:$8 sm:$0xf0]  ;;  %v6347_v17 = vld [vmem:[%s11592_s3 + $0x6] ss:$8 sm:$0xf] }
 0x437   :  { %6484 = vmatprep.subr.bf16.mxu1 %v6483_v46  ;;  %v9795_v8 = vpop.permute.xlu0 %4337  ;;  %11959 = vst [vmem:[#allocation83_spill] sm:$0xff] %v9825_v7  ;;  %11962 = vst [vmem:[#allocation86_spill] sm:$0xff] %v9855_v19  ;;  %v6348_v6 = vld [vmem:[%s11592_s3 + $0x6] ss:$8 sm:$0xf0] }
 0x438   :  { %11964 = vst [vmem:[#allocation88_spill] sm:$0xff] %v9863_v12  ;;  %v9929_v2 = vor.u32 %v6348_v6, %v6347_v17 }
 0x439   :  { %3337 = vrot.lane.b32.xlu0 %v9797_v5, %s6776_s2 }
 0x43a   :  { %5119 = vrot.lane.b32.xlu1 %v9562_v1, %s6779_s13  ;;  %6486 = vmatpush1.bf16.msra.mxu1 %v6485_v43  ;;  %v9844_v13 = vpop.permute.xlu1 %4359 }
 0x43b   :  { %v9809_v55 = vpop.permute.xlu0 %4577  ;;  %11961 = vst [vmem:[#allocation85_spill] sm:$0xff] %v9844_v13  ;;  %v11975_v13 = vld [vmem:[#allocation62_spill] sm:$0xff] }
 0x43d   :  { %3345 = vrot.lane.b32.xlu0 %v9811_v37, %s6776_s2 }
 0x43e   :  { %3599 = vrot.lane.b32.xlu1 %v9562_v1, %s6774_s25  ;;  %v9865_v46 = vpop.permute.xlu1 %4595 }
 0x43f   :  { %v9819_v20 = vpop.permute.xlu0 %4585  ;;  %11965 = vst [vmem:[#allocation89_spill] sm:$0xff] %v9865_v46  ;;  %v4412_v46 = vsel %vm379_vm1, %v9334_v10, %v9341_v24  ;;  %v4662_v24 = vsel %vm2001_vm6, %v9382_v39, %v9388_v47 }
 0x441   :  { %3349 = vrot.lane.b32.xlu0 %v9821_v16, %s6776_s2 }
 0x442   :  { %3603 = vrot.lane.b32.xlu1 %v9832_v54, %s6774_s25  ;;  %v9875_v42 = vpop.permute.xlu1 %4599 }
 0x443   :  { %v9836_v15 = vpop.permute.xlu0 %4825  ;;  %11966 = vst [vmem:[#allocation90_spill] sm:$0xff] %v9875_v42  ;;  %v6352_v42 = vld [vmem:[%s11592_s3 + $0x7] ss:$8 sm:$0xf0] }
 0x444   :  { %v9959_v53 = vor.u32 %v6352_v42, %v6351_v58 }
 0x445   :  { %3357 = vrot.lane.b32.xlu0 %v9838_v56, %s6776_s2 }
 0x446   :  { %3607 = vrot.lane.b32.xlu1 %v9849_v51, %s6774_s25  ;;  %v9887_v38 = vpop.permute.xlu1 %4603 }
 0x447   :  { %v9853_v36 = vpop.permute.xlu0 %4833  ;;  %11968 = vst [vmem:[#allocation92_spill] sm:$0xff] %v9887_v38  ;;  %v4413_v38 = vsel %vm379_vm1, %v9517_v21, %v9795_v8 }
 0x449   :  { %3353 = vrot.lane.b32.xlu0 %v9855_v19, %s6776_s2  ;;  %v4414_v19 = vsel %vm379_vm1, %v9324_v29, %v9334_v10  ;;  %v4688_v10 = vrot.slane %v9929_v2, %v11947_v25 }
 0x44a   :  { %3847 = vrot.lane.b32.xlu1 %v9562_v1, %s6777_s11 }
 0x44b   :  { %v9861_v45 = vpop.permute.xlu0 %5073  ;;  %v4775_v42 = vmul.f32 %v4688_v10, %v4662_v24 }
 0x44c   :  { %11963 = vst [vmem:[#allocation87_spill] sm:$0xff] %v9861_v45 }
 0x44d   :  { %3361 = vrot.lane.b32.xlu0 %v9863_v12, %s6776_s2 }
 0x44e   :  { %3851 = vrot.lane.b32.xlu1 %v9832_v54, %s6777_s11 }
 0x44f   :  { %v9871_v31 = vpop.permute.xlu0 %5081 }
 0x451   :  { %3609 = vrot.lane.b32.xlu0 %v9863_v12, %s6774_s25 }
 0x452   :  { %3855 = vrot.lane.b32.xlu1 %v9849_v51, %s6777_s11 }
 0x453   :  { %v9879_v43 = vpop.permute.xlu0 %3317 }
 0x454   :  { %11967 = vst [vmem:[#allocation91_spill] sm:$0xff] %v9879_v43 }
 0x455   :  { %3857 = vrot.lane.b32.xlu0 %v9863_v12, %s6777_s11 }
 0x456   :  { %4095 = vrot.lane.b32.xlu1 %v9562_v1, %s6772_s9  ;;  %v9901_v1 = vor.u32 %v6344_v4, %v6343_v14 }
 0x457   :  { %v9885_v63 = vpop.permute.xlu0 %3325 }
 0x458   :  { %v4440_v14 = vrot.slane %v9901_v1, %v11947_v25  ;;  %v4444_v4 = vrot.slane %v9901_v1, %v11946_v27 }
 0x459   :  { %4105 = vrot.lane.b32.xlu0 %v9863_v12, %s6772_s9  ;;  %v9911_v12 = vpop.permute.xlu1 %4607 }
 0x45a   :  { %4099 = vrot.lane.b32.xlu1 %v9832_v54, %s6772_s9  ;;  %11970 = vst [vmem:[#allocation94_spill] sm:$0xff] %v9911_v12  ;;  %v4527_v17 = vmul.f32 %v4440_v14, %v4414_v19  ;;  %v4528_v6 = vmul.f32 %v4444_v4, %v4412_v46  ;;  %v4692_v12 = vrot.slane %v9929_v2, %v11946_v27  ;;  %v6355_v19 = vld [vmem:[%s11592_s3 + $0x80] ss:$8 sm:$0xf] }
 0x45b   :  { %v9899_v26 = vpop.permute.xlu0 %3565  ;;  %v6356_v46 = vld [vmem:[%s11592_s3 + $0x80] ss:$8 sm:$0xf0]  ;;  %v4511_v32 = vmul.f32 %v4440_v14, %v4413_v38  ;;  %v4940_v38 = vrot.slane %v9959_v53, %v11946_v27  ;;  %v4910_v14 = vsel %vm827_vm3, %v9420_v30, %v9430_v9 }
 0x45c   :  { %11969 = vst [vmem:[#allocation93_spill] sm:$0xff] %v9899_v26  ;;  %v4660_v26 = vsel %vm2001_vm6, %v9388_v47, %v9398_v49  ;;  %v4661_v47 = vsel %vm2001_vm6, %v9531_v3, %v9819_v20  ;;  %v4936_v49 = vrot.slane %v9959_v53, %v11947_v25 }
 0x45d   :  { %4345 = vrot.lane.b32.xlu0 %v9595_v22, %s6773_s18  ;;  %v9967_v43 = vpop.permute.xlu1 %4843  ;;  %v6489_v45 = vpack.c.bf16 %v4527_v17, %v4511_v32  ;;  %v4759_v7 = vmul.f32 %v4688_v10, %v4661_v47  ;;  %v10014_v10 = vld [vmem:[%s11594_s1 + $0x78] sm:$0xff] }
 0x45e   :  { %4103 = vrot.lane.b32.xlu1 %v9849_v51, %s6772_s9  ;;  %11972 = vst [vmem:[#allocation96_spill] sm:$0xff] %v9967_v43  ;;  %v11974_v43 = vld [vmem:[#allocation48_spill] sm:$0xff] }
 0x45f   :  { %v9919_v56 = vpop.permute.xlu0 %3573 }
 0x461   :  { %4349 = vrot.lane.b32.xlu0 %v9487_v50, %s6773_s18  ;;  %v10009_v32 = vpop.permute.xlu1 %4847 }
 0x462   :  { %4379 = vrot.lane.b32.xlu1 %v9832_v54, %s6773_s18  ;;  %11976 = vst [vmem:[#allocation62_spill] sm:$0xff] %v10009_v32 }
 0x463   :  { %v9953_v44 = vpop.permute.xlu0 %4341 }
 0x464   :  { %11971 = vst [vmem:[#allocation95_spill] sm:$0xff] %v9953_v44  ;;  %v4411_v16 = vsel %vm379_vm1, %v9795_v8, %v9953_v44  ;;  %v4776_v8 = vmul.f32 %v4692_v12, %v4660_v26  ;;  %v4908_v44 = vsel %vm827_vm3, %v9430_v9, %v11974_v43 }
 0x465   :  { %v4512_v58 = vmul.f32 %v4444_v4, %v4411_v16  ;;  %4353 = vrot.lane.b32.xlu0 %v9614_v48, %s6773_s18  ;;  %v9989_v16 = vor.u32 %v6356_v46, %v6355_v19  ;;  %v4909_v19 = vsel %vm827_vm3, %v11975_v13, %v9853_v36 }
 0x466   :  { %4383 = vrot.lane.b32.xlu1 %v9849_v51, %s6773_s18  ;;  %v5007_v32 = vmul.f32 %v4936_v49, %v4909_v19  ;;  %v10044_v19 = vpop.permute.xlu1 %4851 }
 0x467   :  { %v9991_v4 = vpop.permute.xlu0 %4589  ;;  %v6487_v24 = vpack.c.bf16 %v4528_v6, %v4512_v58  ;;  %v5184_v9 = vrot.slane %v9989_v16, %v11947_v25  ;;  %v5188_v17 = vrot.slane %v9989_v16, %v11946_v27  ;;  %v11978_v58 = vld [vmem:[#allocation57_spill] sm:$0xff]  ;;  %v6493_v25 = vpack.c.bf16 %v4775_v42, %v4759_v7  ;;  %v11981_v27 = vld [vmem:[#allocation66_spill] sm:$0xff] }
 0x468   :  { %11973 = vst [vmem:[#allocation97_spill] sm:$0xff] %v9991_v4  ;;  %v4659_v26 = vsel %vm2001_vm6, %v9819_v20, %v9991_v4  ;;  %v5023_v20 = vmul.f32 %v4936_v49, %v4910_v14 }
 0x469   :  { %v4760_v46 = vmul.f32 %v4692_v12, %v4659_v26  ;;  %4357 = vrot.lane.b32.xlu0 %v9769_v60, %s6773_s18  ;;  %6488 = vmatprep.subr.bf16.mxu1 %v6487_v24  ;;  %v5024_v12 = vmul.f32 %v4940_v38, %v4908_v44  ;;  %v11979_v24 = vld [vmem:[#allocation56_spill] sm:$0xff]  ;;  %v11980_v44 = vld [vmem:[#allocation54_spill] sm:$0xff] }
 0x46a   :  { %4387 = vrot.lane.b32.xlu1 %v10014_v10, %s6773_s18  ;;  %6490 = vmatpush1.bf16.msra.mxu1 %v6489_v45  ;;  %v5156_v26 = vsel %vm2390_vm7, %v11979_v24, %v11978_v58  ;;  %v5158_v14 = vsel %vm2390_vm7, %v11980_v44, %v11979_v24  ;;  %11983 = vst [vmem:[#allocation54_spill] sm:$0xff] %v10044_v19 }
 0x46b   :  { %v10020_v6 = vpop.permute.xlu0 %4837  ;;  %v6491_v47 = vpack.c.bf16 %v4776_v8, %v4760_v46  ;;  %v5157_v8 = vsel %vm2390_vm7, %v11981_v27, %v9871_v31  ;;  %v5272_v49 = vmul.f32 %v5188_v17, %v5156_v26  ;;  %v5271_v42 = vmul.f32 %v5184_v9, %v5158_v14 }
 0x46c   :  { %11977 = vst [vmem:[#allocation98_spill] sm:$0xff] %v10020_v6  ;;  %v4907_v45 = vsel %vm827_vm3, %v9853_v36, %v10020_v6  ;;  %v6497_v24 = vpack.c.bf16 %v5023_v20, %v5007_v32  ;;  %v5255_v58 = vmul.f32 %v5184_v9, %v5157_v8  ;;  %v10058_v9 = vpop.permute.xlu1 %4855  ;;  %v11985_v20 = vld [vmem:[#allocation68_spill] sm:$0xff] }
 0x46d   :  { %v5008_v46 = vmul.f32 %v4940_v38, %v4907_v45  ;;  %4593 = vrot.lane.b32.xlu0 %v9595_v22, %s6778_s12  ;;  %6492 = vmatprep.subr.bf16.mxu1 %v6491_v47  ;;  %11984 = vst [vmem:[#allocation66_spill] sm:$0xff] %v10058_v9 }
 0x46e   :  { %4627 = vrot.lane.b32.xlu1 %v9832_v54, %s6778_s12  ;;  %6494 = vmatpush1.bf16.msra.mxu1 %v6493_v25  ;;  %v6501_v47 = vpack.c.bf16 %v5271_v42, %v5255_v58 }
 0x46f   :  { %v10042_v7 = vpop.permute.xlu0 %5085  ;;  %v6495_v36 = vpack.c.bf16 %v5024_v12, %v5008_v46  ;;  %v11989_v46 = vld [vmem:[#allocation15_spill] sm:$0xff] }
 0x470   :  { %11982 = vst [vmem:[#allocation56_spill] sm:$0xff] %v10042_v7  ;;  %v5155_v38 = vsel %vm2390_vm7, %v9871_v31, %v10042_v7  ;;  %v10065_v31 = vld [vmem:[%s11596_s6] sm:$0xff]  ;;  %v10078_v58 = vpop.permute.xlu1 %5091 }
 0x471   :  { %v5256_v45 = vmul.f32 %v5188_v17, %v5155_v38  ;;  %4597 = vrot.lane.b32.xlu0 %v9487_v50, %s6778_s12  ;;  %6496 = vmatprep.subr.bf16.mxu1 %v6495_v36  ;;  %11987 = vst [vmem:[#allocation99_spill] sm:$0xff] %v10078_v58 }
 0x472   :  { %4631 = vrot.lane.b32.xlu1 %v9849_v51, %s6778_s12  ;;  %6498 = vmatpush1.bf16.msra.mxu1 %v6497_v24  ;;  %v11991_v24 = vld [vmem:[#allocation14_spill] sm:$0xff] }
 0x473   :  { %v10054_v25 = vpop.permute.xlu0 %3813  ;;  %v6499_v12 = vpack.c.bf16 %v5272_v49, %v5256_v45  ;;  %v11990_v49 = vld [vmem:[#allocation67_spill] sm:$0xff]  ;;  %v11992_v45 = vld [vmem:[#allocation33_spill] sm:$0xff] }
 0x474   :  { %v10088_v14 = vpop.permute.xlu1 %5095  ;;  %v3436_v36 = vrot.slane %v11990_v49, %v11989_v46  ;;  %v3432_v38 = vrot.slane %v11990_v49, %v11991_v24 }
 0x475   :  { %4601 = vrot.lane.b32.xlu0 %v9614_v48, %s6778_s12  ;;  %6500 = vmatprep.subr.bf16.mxu1 %v6499_v12  ;;  %11988 = vst [vmem:[#allocation100_spill] sm:$0xff] %v10088_v14  ;;  %v11993_v12 = vld [vmem:[#allocation20_spill] sm:$0xff] }
 0x476   :  { %4635 = vrot.lane.b32.xlu1 %v10014_v10, %s6778_s12  ;;  %6502 = vmatpush1.bf16.msra.mxu1 %v6501_v47  ;;  %v3382_v47 = vsel %vm990_vm4, %v11993_v12, %v11992_v45 }
 0x477   :  { %v10067_v32 = vpop.permute.xlu0 %3821  ;;  %v3508_v9 = vmul.f32 %v3436_v36, %v3382_v47 }
 0x478   :  { %v10116_v14 = vpop.permute.xlu1 %5099 }
 0x479   :  { %4605 = vrot.lane.b32.xlu0 %v9769_v60, %s6778_s12  ;;  %5753 = vmatmul.mubr.f32.vlgmr.msra.gmra.mrb[8].mxu1 %v10065_v31  ;;  %11996 = vst [vmem:[#allocation67_spill] sm:$0xff] %v10116_v14 }
 0x47a   :  { %4875 = vrot.lane.b32.xlu1 %v9832_v54, %s6775_s26  ;;  %6362 = vmatprep.mubr.msk.f32.mxu1 %vm5613_vm9, %v11985_v20  ;;  %v11994_v20 = vld [vmem:[#allocation6_spill] sm:$0xff] }
 0x47b   :  { %v10076_v17 = vpop.permute.xlu0 %4061  ;;  %v3384_v7 = vsel %vm990_vm4, %v11994_v20, %v11993_v12 }
 0x47c   :  { %11986 = vst [vmem:[#allocation68_spill] sm:$0xff] %v10076_v17 }
 0x47d   :  { %4841 = vrot.lane.b32.xlu0 %v9595_v22, %s6775_s26 }
 0x47e   :  { %4879 = vrot.lane.b32.xlu1 %v9849_v51, %s6775_s26 }
 0x47f   :  { %v10084_v26 = vpop.permute.xlu0 %4069 }
 0x481   :  { %4845 = vrot.lane.b32.xlu0 %v9487_v50, %s6775_s26 }
 0x482   :  { %4883 = vrot.lane.b32.xlu1 %v10014_v10, %s6775_s26 }
 0x483   :  { %v10092_v8 = vpop.permute.xlu0 %3321 }
 0x484   :  { %v3383_v42 = vsel %vm990_vm4, %v10092_v8, %v9885_v63 }
 0x485   :  { %4849 = vrot.lane.b32.xlu0 %v9614_v48, %s6775_s26  ;;  %v3491_v6 = vmul.f32 %v3432_v38, %v3383_v42  ;;  %v3684_v42 = vrot.slane %v9651_v41, %v11989_v46 }
 0x486   :  { %5123 = vrot.lane.b32.xlu1 %v9832_v54, %s6779_s13  ;;  %v3507_v54 = vmul.f32 %v3432_v38, %v3384_v7  ;;  %v3680_v7 = vrot.slane %v9651_v41, %v11991_v24 }
 0x487   :  { %v10114_v58 = vpop.permute.xlu0 %3329 }
 0x488   :  { %11995 = vst [vmem:[#allocation15_spill] sm:$0xff] %v10114_v58  ;;  %v3381_v19 = vsel %vm990_vm4, %v9885_v63, %v10114_v58  ;;  %v6541_v4 = vpack.c.bf16 %v3507_v54, %v3491_v6  ;;  %v12003_v58 = vld [vmem:[#allocation71_spill] sm:$0xff] }
 0x489   :  { %v3492_v45 = vmul.f32 %v3436_v36, %v3381_v19  ;;  %4853 = vrot.lane.b32.xlu0 %v9769_v60, %s6775_s26  ;;  %v11998_v19 = vld [vmem:[#allocation38_spill] sm:$0xff]  ;;  %v12000_v36 = vld [vmem:[#allocation17_spill] sm:$0xff] }
 0x48a   :  { %5127 = vrot.lane.b32.xlu1 %v9849_v51, %s6779_s13  ;;  %v11997_v51 = vld [vmem:[#allocation32_spill] sm:$0xff]  ;;  %v3632_v38 = vsel %vm550_vm2, %v12000_v36, %v11998_v19 }
 0x48b   :  { %v10126_v12 = vpop.permute.xlu0 %3569  ;;  %v6539_v43 = vpack.c.bf16 %v3508_v9, %v3492_v45  ;;  %v3630_v6 = vsel %vm550_vm2, %v11998_v19, %v11997_v51  ;;  %v10142_v9 = vpop.permute.xlu1 %5103 }
 0x48c   :  { %v3631_v63 = vsel %vm550_vm2, %v10126_v12, %v9919_v56  ;;  %11999 = vst [vmem:[#allocation14_spill] sm:$0xff] %v10142_v9  ;;  %v3756_v54 = vmul.f32 %v3684_v42, %v3630_v6  ;;  %v12002_v9 = vld [vmem:[#allocation72_spill] sm:$0xff] }
 0x48d   :  { %5089 = vrot.lane.b32.xlu0 %v9595_v22, %s6779_s13  ;;  %6540 = vmatprep.subr.bf16.mxu1 %v6539_v43  ;;  %v3739_v45 = vmul.f32 %v3680_v7, %v3631_v63  ;;  %v3928_v63 = vrot.slane %v9685_v34, %v11991_v24 }
 0x48e   :  { %5131 = vrot.lane.b32.xlu1 %v10014_v10, %s6779_s13  ;;  %6542 = vmatpush1.bf16.msra.mxu1 %v6541_v4  ;;  %v3755_v10 = vmul.f32 %v3680_v7, %v3632_v38  ;;  %v3932_v4 = vrot.slane %v9685_v34, %v11989_v46 }
 0x48f   :  { %v10150_v43 = vpop.permute.xlu0 %3577 }
 0x490   :  { %12001 = vst [vmem:[#allocation20_spill] sm:$0xff] %v10150_v43  ;;  %v3629_v47 = vsel %vm550_vm2, %v9919_v56, %v10150_v43  ;;  %v3878_v56 = vsel %vm1378_vm5, %v12003_v58, %v12002_v9  ;;  %v6545_v6 = vpack.c.bf16 %v3755_v10, %v3739_v45  ;;  %v4180_v9 = vrot.slane %v9725_v40, %v11989_v46 }
 0x491   :  { %v3740_v51 = vmul.f32 %v3684_v42, %v3629_v47  ;;  %5093 = vrot.lane.b32.xlu0 %v9487_v50, %s6779_s13  ;;  %v12004_v42 = vld [vmem:[#allocation65_spill] sm:$0xff] }
 0x492   :  { %v3880_v7 = vsel %vm1378_vm5, %v12004_v42, %v12003_v58 }
 0x493   :  { %v10160_v14 = vpop.permute.xlu0 %3817  ;;  %v6543_v19 = vpack.c.bf16 %v3756_v54, %v3740_v51  ;;  %v4004_v51 = vmul.f32 %v3932_v4, %v3878_v56  ;;  %v4003_v54 = vmul.f32 %v3928_v63, %v3880_v7  ;;  %v4176_v56 = vrot.slane %v9725_v40, %v11991_v24 }
 0x494   :  { %v3879_v38 = vsel %vm1378_vm5, %v10160_v14, %v10067_v32 }
 0x495   :  { %5097 = vrot.lane.b32.xlu0 %v9614_v48, %s6779_s13  ;;  %6544 = vmatprep.subr.bf16.mxu1 %v6543_v19  ;;  %v3987_v45 = vmul.f32 %v3928_v63, %v3879_v38  ;;  %v4126_v63 = vsel %vm102_vm0, %v9731_v18, %v9763_v11 }
 0x496   :  { %6546 = vmatpush1.bf16.msra.mxu1 %v6545_v6  ;;  %v4252_v7 = vmul.f32 %v4180_v9, %v4126_v63 }
 0x497   :  { %v10178_v47 = vpop.permute.xlu0 %3825  ;;  %v6549_v6 = vpack.c.bf16 %v4003_v54, %v3987_v45 }
 0x498   :  { %12005 = vst [vmem:[#allocation6_spill] sm:$0xff] %v10178_v47  ;;  %v3877_v58 = vsel %vm1378_vm5, %v10067_v32, %v10178_v47  ;;  %v4128_v32 = vsel %vm102_vm0, %v9693_v57, %v9731_v18 }
 0x499   :  { %v3988_v10 = vmul.f32 %v3932_v4, %v3877_v58  ;;  %5101 = vrot.lane.b32.xlu0 %v9769_v60, %s6779_s13 }
 0x49b   :  { %v10188_v43 = vpop.permute.xlu0 %4065  ;;  %v6547_v19 = vpack.c.bf16 %v4004_v51, %v3988_v10  ;;  %v4251_v51 = vmul.f32 %v4176_v56, %v4128_v32 }
 0x49c   :  { %v4127_v4 = vsel %vm102_vm0, %v10188_v43, %v10084_v26 }
 0x49d   :  { %3581 = vrot.lane.b32.xlu0 %v9769_v60, %s6774_s25  ;;  %6548 = vmatprep.subr.bf16.mxu1 %v6547_v19  ;;  %v4235_v54 = vmul.f32 %v4176_v56, %v4127_v4  ;;  %v6755_v19 = vld [vmem:[%s11594_s1 + $0x38] sm:$0xff] }
 0x49e   :  { %6550 = vmatpush1.bf16.msra.mxu1 %v6549_v6  ;;  %v6555_v56 = vpack.c.bf16 %v6755_v19, %v9614_v48  ;;  %v10230_v6 = vpop.permute.xlu1 %3583 }
 0x49f   :  { %v10206_v38 = vpop.permute.xlu0 %4073  ;;  %v6553_v11 = vpack.c.bf16 %v4251_v51, %v4235_v54  ;;  %12009 = vst [vmem:[#allocation65_spill] sm:$0xff] %v10230_v6  ;;  %v12017_v54 = vld [vmem:[#allocation9_spill] sm:$0xff] }
 0x4a0   :  { %12006 = vst [vmem:[#allocation38_spill] sm:$0xff] %v10206_v38  ;;  %v4125_v18 = vsel %vm102_vm0, %v10084_v26, %v10206_v38 }
 0x4a1   :  { %v4236_v45 = vmul.f32 %v4180_v9, %v4125_v18  ;;  %3585 = vrot.lane.b32.xlu0 %v9797_v5, %s6774_s25  ;;  %v6756_v9 = vld [vmem:[%s11594_s1 + $0x30] sm:$0xff]  ;;  %v3408_v18 = vrot.slane %v11990_v49, %v12017_v54 }
 0x4a2   :  { %v6557_v63 = vpack.c.bf16 %v6756_v9, %v9487_v50  ;;  %v12021_v9 = vld [vmem:[#allocation18_spill] sm:$0xff] }
 0x4a3   :  { %v10214_v58 = vpop.permute.xlu0 %3333  ;;  %v6551_v10 = vpack.c.bf16 %v4252_v7, %v4236_v45  ;;  %v12018_v45 = vld [vmem:[#allocation50_spill] sm:$0xff] }
 0x4a4   :  { %12007 = vst [vmem:[#allocation17_spill] sm:$0xff] %v10214_v58 }
 0x4a5   :  { %3589 = vrot.lane.b32.xlu0 %v9787_v23, %s6774_s25  ;;  %6552 = vmatprep.subr.bf16.mxu1 %v6551_v10  ;;  %v3641_v10 = vsel %vm550_vm2, %v12018_v45, %v9653_v35  ;;  %v3656_v35 = vrot.slane %v9651_v41, %v12017_v54 }
 0x4a6   :  { %6554 = vmatpush1.bf16.msra.mxu1 %v6553_v11  ;;  %v10238_v11 = vpop.permute.xlu1 %3587 }
 0x4a7   :  { %v10222_v26 = vpop.permute.xlu0 %3341  ;;  %6556 = vmatprep.subr.bf16.mxu1 %v6555_v56  ;;  %12012 = vst [vmem:[#allocation103_spill] sm:$0xff] %v10238_v11  ;;  %v12020_v56 = vld [vmem:[#allocation21_spill] sm:$0xff]  ;;  %v12027_v11 = vld [vmem:[#allocation42_spill] sm:$0xff] }
 0x4a8   :  { %12008 = vst [vmem:[#allocation71_spill] sm:$0xff] %v10222_v26  ;;  %v3890_v26 = vsel %vm1378_vm5, %v12027_v11, %v9238_v61 }
 0x4a9   :  { %3593 = vrot.lane.b32.xlu0 %v9811_v37, %s6774_s25 }
 0x4aa   :  { %6558 = vmatpush1.bf16.msra.mxu1 %v6557_v63  ;;  %v10246_v50 = vpop.permute.xlu1 %3591  ;;  %v3396_v63 = vsel %vm990_vm4, %v12021_v9, %v12020_v56 }
 0x4ab   :  { %v10232_v32 = vpop.permute.xlu0 %3337  ;;  %12014 = vst [vmem:[#allocation105_spill] sm:$0xff] %v10246_v50 }
 0x4ac   :  { %12010 = vst [vmem:[#allocation101_spill] sm:$0xff] %v10232_v32 }
 0x4ad   :  { %3829 = vrot.lane.b32.xlu0 %v9769_v60, %s6777_s11 }
 0x4ae   :  { %v10260_v19 = vpop.permute.xlu1 %3595 }
 0x4af   :  { %v10236_v48 = vpop.permute.xlu0 %3345  ;;  %12019 = vst [vmem:[#allocation9_spill] sm:$0xff] %v10260_v19  ;;  %v12026_v19 = vld [vmem:[#allocation60_spill] sm:$0xff] }
 0x4b0   :  { %12011 = vst [vmem:[#allocation102_spill] sm:$0xff] %v10236_v48  ;;  %v12028_v48 = vld [vmem:[#allocation53_spill] sm:$0xff] }
 0x4b1   :  { %3833 = vrot.lane.b32.xlu0 %v9797_v5, %s6777_s11 }
 0x4b3   :  { %v10242_v4 = vpop.permute.xlu0 %3349 }
 0x4b4   :  { %12013 = vst [vmem:[#allocation104_spill] sm:$0xff] %v10242_v4 }
 0x4b5   :  { %3837 = vrot.lane.b32.xlu0 %v9787_v23, %s6777_s11 }
 0x4b7   :  { %v10248_v7 = vpop.permute.xlu0 %3357 }
 0x4b8   :  { %12015 = vst [vmem:[#allocation106_spill] sm:$0xff] %v10248_v7  ;;  %v12022_v7 = vld [vmem:[#allocation12_spill] sm:$0xff] }
 0x4b9   :  { %3841 = vrot.lane.b32.xlu0 %v9811_v37, %s6777_s11  ;;  %v3660_v4 = vrot.slane %v9651_v41, %v12022_v7  ;;  %v3908_v56 = vrot.slane %v9685_v34, %v12022_v7 }
 0x4bb   :  { %v10252_v51 = vpop.permute.xlu0 %3353  ;;  %v3734_v9 = vmul.f32 %v3660_v4, %v3641_v10  ;;  %v3998_v22 = vmul.f32 %v3908_v56, %v3890_v26  ;;  %v12032_v26 = vld [vmem:[#allocation26_spill] sm:$0xff] }
 0x4bc   :  { %12016 = vst [vmem:[#allocation107_spill] sm:$0xff] %v10252_v51  ;;  %v12023_v51 = vld [vmem:[#allocation4_spill] sm:$0xff] }
 0x4bd   :  { %4077 = vrot.lane.b32.xlu0 %v9769_v60, %s6772_s9  ;;  %v3642_v38 = vsel %vm550_vm2, %v12023_v51, %v9216_v0  ;;  %v12025_v60 = vld [vmem:[#allocation5_spill] sm:$0xff]  ;;  %v3501_v0 = vmul.f32 %v3408_v18, %v3396_v63  ;;  %v4156_v63 = vrot.slane %v9725_v40, %v12022_v7 }
 0x4be   :  { %v3644_v50 = vsel %vm550_vm2, %v12025_v60, %v12023_v51  ;;  %v3889_v51 = vsel %vm1378_vm5, %v12028_v48, %v9699_v59  ;;  %v3750_v10 = vmul.f32 %v3660_v4, %v3642_v38 }
 0x4bf   :  { %v10276_v47 = vpop.permute.xlu0 %3361  ;;  %v3749_v58 = vmul.f32 %v3656_v35, %v3644_v50  ;;  %v3982_v17 = vmul.f32 %v3908_v56, %v3889_v51  ;;  %v12031_v50 = vld [vmem:[#allocation55_spill] sm:$0xff] }
 0x4c0   :  { %12024 = vst [vmem:[#allocation50_spill] sm:$0xff] %v10276_v47  ;;  %v3395_v6 = vsel %vm990_vm4, %v10276_v47, %v12026_v19  ;;  %v3904_v19 = vrot.slane %v9685_v34, %v12017_v54  ;;  %v10302_v47 = vpop.permute.xlu1 %3831  ;;  %v6435_v38 = vpack.c.bf16 %v3750_v10, %v3734_v9  ;;  %v4152_v9 = vrot.slane %v9725_v40, %v12017_v54 }
 0x4c1   :  { %v3485_v60 = vmul.f32 %v3408_v18, %v3395_v6  ;;  %4081 = vrot.lane.b32.xlu0 %v9797_v5, %s6772_s9  ;;  %v12030_v6 = vld [vmem:[#allocation22_spill] sm:$0xff] }
 0x4c2   :  { %v4138_v4 = vsel %vm102_vm0, %v12030_v6, %v9263_v62 }
 0x4c3   :  { %v6433_v61 = vpack.c.bf16 %v3501_v0, %v3485_v60  ;;  %v10304_v32 = vpop.permute.xlu0 %3609  ;;  %v4137_v60 = vsel %vm102_vm0, %v12031_v50, %v9745_v28  ;;  %v4246_v0 = vmul.f32 %v4156_v63, %v4138_v4 }
 0x4c4   :  { %12029 = vst [vmem:[#allocation21_spill] sm:$0xff] %v10304_v32  ;;  %v3643_v59 = vsel %vm550_vm2, %v10304_v32, %v12018_v45  ;;  %v3892_v45 = vsel %vm1378_vm5, %v12032_v26, %v12027_v11  ;;  %v4230_v51 = vmul.f32 %v4156_v63, %v4137_v60  ;;  %v4415_v60 = vsel %vm379_vm1, %v9781_v52, %v9517_v21  ;;  %v12052_v26 = vld [vmem:[#allocation59_spill] sm:$0xff] }
 0x4c5   :  { %v3733_v18 = vmul.f32 %v3656_v35, %v3643_v59  ;;  %4085 = vrot.lane.b32.xlu0 %v9787_v23, %s6772_s9  ;;  %6434 = vmatpush1.bf16.msra.mxu0 %v6433_v61  ;;  %v6439_v35 = vpack.c.bf16 %v3998_v22, %v3982_v17  ;;  %v3997_v10 = vmul.f32 %v3904_v19, %v3892_v45  ;;  %v12034_v61 = vld [vmem:[#allocation30_spill] sm:$0xff]  ;;  %v10336_v59 = vpop.permute.xlu1 %3835 }
 0x4c6   :  { %6436 = vmatprep.subr.bf16.mxu0 %v6435_v38  ;;  %v4140_v11 = vsel %vm102_vm0, %v12034_v61, %v12030_v6  ;;  %v4436_v22 = vrot.slane %v9901_v1, %v12022_v7  ;;  %v4432_v45 = vrot.slane %v9901_v1, %v12017_v54 }
 0x4c7   :  { %v6437_v62 = vpack.c.bf16 %v3749_v58, %v3733_v18  ;;  %v10326_v56 = vpop.permute.xlu0 %3857  ;;  %v4245_v4 = vmul.f32 %v4152_v9, %v4140_v11  ;;  %v6757_v11 = vld [vmem:[%s11594_s1 + $0x8] sm:$0xff] }
 0x4c8   :  { %12033 = vst [vmem:[#allocation12_spill] sm:$0xff] %v10326_v56  ;;  %v3891_v28 = vsel %vm1378_vm5, %v10326_v56, %v12028_v48  ;;  %v6443_v48 = vpack.c.bf16 %v4246_v0, %v4230_v51 }
 0x4c9   :  { %v3981_v38 = vmul.f32 %v3904_v19, %v3891_v28  ;;  %4089 = vrot.lane.b32.xlu0 %v9811_v37, %s6772_s9  ;;  %6438 = vmatpush1.bf16.msra.mxu0 %v6437_v62  ;;  %v12036_v19 = vld [vmem:[#allocation37_spill] sm:$0xff]  ;;  %v10366_v0 = vpop.permute.xlu1 %3839  ;;  %v12038_v28 = vld [vmem:[#allocation58_spill] sm:$0xff] }
 0x4ca   :  { %6440 = vmatprep.subr.bf16.mxu0 %v6439_v35  ;;  %v4416_v6 = vsel %vm379_vm1, %v12036_v19, %v9324_v29  ;;  %v4684_v29 = vrot.slane %v9929_v2, %v12022_v7  ;;  %v4417_v35 = vsel %vm379_vm1, %v12038_v28, %v9781_v52  ;;  %v12044_v28 = vld [vmem:[#allocation61_spill] sm:$0xff] }
 0x4cb   :  { %v6441_v58 = vpack.c.bf16 %v3997_v10, %v3981_v38  ;;  %v10340_v63 = vpop.permute.xlu0 %4105  ;;  %v4526_v51 = vmul.f32 %v4436_v22, %v4416_v6  ;;  %v4510_v10 = vmul.f32 %v4436_v22, %v4415_v60  ;;  %v12039_v38 = vld [vmem:[#allocation36_spill] sm:$0xff]  ;;  %v4680_v22 = vrot.slane %v9929_v2, %v12017_v54  ;;  %v12041_v6 = vld [vmem:[#allocation46_spill] sm:$0xff]  ;;  %v12042_v60 = vld [vmem:[#allocation47_spill] sm:$0xff] }
 0x4cc   :  { %12035 = vst [vmem:[#allocation4_spill] sm:$0xff] %v10340_v63  ;;  %v4139_v17 = vsel %vm102_vm0, %v10340_v63, %v12031_v50  ;;  %v12037_v50 = vld [vmem:[#allocation25_spill] sm:$0xff] }
 0x4cd   :  { %v4229_v18 = vmul.f32 %v4152_v9, %v4139_v17  ;;  %4361 = vrot.lane.b32.xlu0 %v9797_v5, %s6773_s18  ;;  %6442 = vmatpush1.bf16.msra.mxu0 %v6441_v58  ;;  %v4418_v62 = vsel %vm379_vm1, %v12037_v50, %v12036_v19  ;;  %v6447_v58 = vpack.c.bf16 %v6757_v11, %v12039_v38  ;;  %v12040_v17 = vld [vmem:[#allocation41_spill] sm:$0xff] }
 0x4ce   :  { %6444 = vmatprep.subr.bf16.mxu0 %v6443_v48  ;;  %v4663_v48 = vsel %vm2001_vm6, %v9809_v55, %v9531_v3  ;;  %v4525_v52 = vmul.f32 %v4432_v45, %v4418_v62  ;;  %v4932_v19 = vrot.slane %v9959_v53, %v12022_v7  ;;  %v4912_v3 = vsel %vm827_vm3, %v12042_v60, %v9420_v30  ;;  %v6758_v62 = vld [vmem:[%s11594_s1] sm:$0xff]  ;;  %v12043_v11 = vld [vmem:[#allocation29_spill] sm:$0xff] }
 0x4cf   :  { %v6445_v21 = vpack.c.bf16 %v4245_v4, %v4229_v18  ;;  %v10368_v9 = vpop.permute.xlu0 %4345  ;;  %v4664_v4 = vsel %vm2001_vm6, %v12040_v17, %v9382_v39  ;;  %v4666_v39 = vsel %vm2001_vm6, %v12041_v6, %v12040_v17  ;;  %v4509_v18 = vmul.f32 %v4432_v45, %v4417_v35  ;;  %v10416_v35 = vpop.permute.xlu1 %3843 }
 0x4d0   :  { %v6449_v38 = vpack.c.bf16 %v6758_v62, %v12043_v11  ;;  %v4665_v17 = vsel %vm2001_vm6, %v12044_v28, %v9809_v55  ;;  %v4758_v6 = vmul.f32 %v4684_v29, %v4663_v48  ;;  %v6451_v50 = vpack.c.bf16 %v4526_v51, %v4510_v10  ;;  %v12045_v55 = vld [vmem:[#allocation49_spill] sm:$0xff]  ;;  %v12046_v10 = vld [vmem:[#allocation52_spill] sm:$0xff]  ;;  %v12048_v28 = vld [vmem:[#allocation83_spill] sm:$0xff] }
 0x4d1   :  { %4365 = vrot.lane.b32.xlu0 %v9787_v23, %s6773_s18  ;;  %6446 = vmatpush1.bf16.msra.mxu0 %v6445_v21  ;;  %v4928_v30 = vrot.slane %v9959_v53, %v12017_v54  ;;  %v4911_v45 = vsel %vm827_vm3, %v9836_v15, %v11975_v13  ;;  %v5022_v62 = vmul.f32 %v4932_v19, %v4912_v3 }
 0x4d2   :  { %6448 = vmatprep.subr.bf16.mxu0 %v6447_v58  ;;  %v4774_v58 = vmul.f32 %v4684_v29, %v4664_v4  ;;  %v4773_v4 = vmul.f32 %v4680_v22, %v4666_v39  ;;  %v4914_v29 = vsel %vm827_vm3, %v12045_v55, %v12042_v60  ;;  %v5180_v51 = vrot.slane %v9989_v16, %v12022_v7  ;;  %v12049_v55 = vld [vmem:[#allocation64_spill] sm:$0xff] }
 0x4d3   :  { %v10400_v21 = vpop.permute.xlu0 %4349  ;;  %v5160_v13 = vsel %vm2390_vm7, %v12046_v10, %v11980_v44  ;;  %v4460_v48 = vrot.slane %v9901_v1, %v11989_v46  ;;  %v6453_v11 = vpack.c.bf16 %v4525_v52, %v4509_v18  ;;  %v4757_v39 = vmul.f32 %v4680_v22, %v4665_v17  ;;  %v12050_v52 = vld [vmem:[#allocation87_spill] sm:$0xff]  ;;  %v12051_v18 = vld [vmem:[#allocation82_spill] sm:$0xff] }
 0x4d4   :  { %v5006_v63 = vmul.f32 %v4932_v19, %v4911_v45  ;;  %v6455_v61 = vpack.c.bf16 %v4774_v58, %v4758_v6  ;;  %v5021_v56 = vmul.f32 %v4928_v30, %v4914_v29  ;;  %v5176_v44 = vrot.slane %v9989_v16, %v12017_v54 }
 0x4d5   :  { %4369 = vrot.lane.b32.xlu0 %v9811_v37, %s6773_s18  ;;  %6450 = vmatpush1.bf16.msra.mxu0 %v6449_v38  ;;  %v12047_v38 = vld [vmem:[#allocation85_spill] sm:$0xff]  ;;  %v5159_v22 = vsel %vm2390_vm7, %v12050_v52, %v11981_v27  ;;  %v5270_v17 = vmul.f32 %v5180_v51, %v5160_v13  ;;  %v4456_v19 = vrot.slane %v9901_v1, %v11991_v24 }
 0x4d6   :  { %6452 = vmatprep.subr.bf16.mxu0 %v6451_v50  ;;  %v4404_v60 = vsel %vm379_vm1, %v12048_v28, %v12047_v38  ;;  %v4913_v50 = vsel %vm827_vm3, %v12049_v55, %v9836_v15  ;;  %v5162_v15 = vsel %vm2390_vm7, %v12052_v26, %v12046_v10  ;;  %v12053_v27 = vld [vmem:[#allocation81_spill] sm:$0xff]  ;;  %v6457_v29 = vpack.c.bf16 %v4773_v4, %v4757_v39 }
 0x4d7   :  { %v4354_v3 = vpop.permute.xlu0 %4353  ;;  %v4406_v58 = vsel %vm379_vm1, %v12053_v27, %v12048_v28  ;;  %v4532_v45 = vmul.f32 %v4460_v48, %v4404_v60  ;;  %v5005_v13 = vmul.f32 %v4928_v30, %v4913_v50  ;;  %v12056_v10 = vld [vmem:[#allocation69_spill] sm:$0xff]  ;;  %v5254_v32 = vmul.f32 %v5180_v51, %v5159_v22  ;;  %v12057_v28 = vld [vmem:[#allocation91_spill] sm:$0xff]  ;;  %v12058_v60 = vld [vmem:[#allocation10_spill] sm:$0xff] }
 0x4d8   :  { %v4405_v6 = vsel %vm379_vm1, %v10400_v21, %v4354_v3  ;;  %v5161_v26 = vsel %vm2390_vm7, %v12056_v10, %v12050_v52  ;;  %v6459_v38 = vpack.c.bf16 %v5022_v62, %v5006_v63  ;;  %v3385_v30 = vsel %vm990_vm4, %v12057_v28, %v10092_v8  ;;  %v12059_v51 = vld [vmem:[#allocation13_spill] sm:$0xff] }
 0x4d9   :  { %4373 = vrot.lane.b32.xlu0 %v12051_v18, %s6773_s18  ;;  %6454 = vmatpush1.bf16.msra.mxu0 %v6453_v11  ;;  %v10461_v11 = vpop.permute.xlu1 %4079  ;;  %v4515_v4 = vmul.f32 %v4456_v19, %v4405_v6  ;;  %v3424_v50 = vrot.slane %v11990_v49, %v12058_v60  ;;  %v3428_v52 = vrot.slane %v11990_v49, %v12059_v51  ;;  %v12061_v10 = vld [vmem:[#allocation73_spill] sm:$0xff] }
 0x4da   :  { %6456 = vmatprep.subr.bf16.mxu0 %v6455_v61  ;;  %12054 = vst [vmem:[#allocation60_spill] sm:$0xff] %v10461_v11  ;;  %v5269_v62 = vmul.f32 %v5176_v44, %v5162_v15  ;;  %v4531_v8 = vmul.f32 %v4456_v19, %v4406_v58  ;;  %v6461_v22 = vpack.c.bf16 %v5021_v56, %v5005_v13  ;;  %v12063_v15 = vld [vmem:[#allocation16_spill] sm:$0xff]  ;;  %v12064_v19 = vld [vmem:[#allocation19_spill] sm:$0xff] }
 0x4db   :  { %v10463_v55 = vpop.permute.xlu0 %4357  ;;  %v3387_v49 = vsel %vm990_vm4, %v12061_v10, %v12057_v28  ;;  %v6463_v11 = vpack.c.bf16 %v5270_v17, %v5254_v32 }
 0x4dc   :  { %12055 = vst [vmem:[#allocation42_spill] sm:$0xff] %v10463_v55  ;;  %v4403_v61 = vsel %vm379_vm1, %v4354_v3, %v10463_v55  ;;  %v12060_v3 = vld [vmem:[#allocation23_spill] sm:$0xff]  ;;  %v3490_v55 = vmul.f32 %v3428_v52, %v3385_v30  ;;  %v3489_v10 = vmul.f32 %v3424_v50, %v3387_v49 }
 0x4dd   :  { %v4516_v39 = vmul.f32 %v4460_v48, %v4403_v61  ;;  %4609 = vrot.lane.b32.xlu0 %v9797_v5, %s6778_s12  ;;  %6458 = vmatpush1.bf16.msra.mxu0 %v6457_v29  ;;  %v3386_v63 = vsel %vm990_vm4, %v12060_v3, %v11994_v20  ;;  %v5253_v48 = vmul.f32 %v5176_v44, %v5161_v26  ;;  %v12062_v26 = vld [vmem:[#allocation93_spill] sm:$0xff]  ;;  %v12066_v30 = vld [vmem:[#allocation63_spill] sm:$0xff] }
 0x4de   :  { %6460 = vmatprep.subr.bf16.mxu0 %v6459_v38  ;;  %v3672_v29 = vrot.slane %v9651_v41, %v12058_v60  ;;  %v3676_v20 = vrot.slane %v9651_v41, %v12059_v51  ;;  %v10496_v38 = vpop.permute.xlu1 %4083  ;;  %v3633_v56 = vsel %vm550_vm2, %v12062_v26, %v10126_v12  ;;  %v6561_v44 = vpack.c.bf16 %v4531_v8, %v4515_v4  ;;  %v12065_v41 = vld [vmem:[#allocation27_spill] sm:$0xff] }
 0x4df   :  { %v10486_v6 = vpop.permute.xlu0 %4593  ;;  %v6559_v61 = vpack.c.bf16 %v4532_v45, %v4516_v39  ;;  %v3388_v32 = vsel %vm990_vm4, %v12063_v15, %v12060_v3  ;;  %v3506_v17 = vmul.f32 %v3428_v52, %v3386_v63  ;;  %v3636_v58 = vsel %vm550_vm2, %v12065_v41, %v12064_v19  ;;  %v12072_v41 = vld [vmem:[#allocation94_spill] sm:$0xff] }
 0x4e0   :  { %v3634_v12 = vsel %vm550_vm2, %v12064_v19, %v12000_v36  ;;  %v3924_v45 = vrot.slane %v9685_v34, %v12059_v51  ;;  %v6465_v13 = vpack.c.bf16 %v5269_v62, %v5253_v48  ;;  %v3882_v4 = vsel %vm1378_vm5, %v12066_v30, %v12004_v42  ;;  %v12071_v19 = vld [vmem:[#allocation68_spill] sm:$0xff] }
 0x4e1   :  { %4613 = vrot.lane.b32.xlu0 %v9787_v23, %s6778_s12  ;;  %6462 = vmatpush1.bf16.msra.mxu0 %v6461_v22  ;;  %v3738_v52 = vmul.f32 %v3676_v20, %v3633_v56  ;;  %v6503_v36 = vpack.c.bf16 %v3506_v17, %v3490_v55  ;;  %v3505_v3 = vmul.f32 %v3424_v50, %v3388_v32  ;;  %v12068_v50 = vld [vmem:[#allocation40_spill] sm:$0xff] }
 0x4e2   :  { %6560 = vmatprep.subr.bf16.mxu1 %v6559_v61  ;;  %6464 = vmatprep.subr.bf16.mxu0 %v6463_v11  ;;  %v12067_v11 = vld [vmem:[#allocation75_spill] sm:$0xff]  ;;  %v3753_v63 = vmul.f32 %v3672_v29, %v3636_v58  ;;  %v3881_v62 = vsel %vm1378_vm5, %v10054_v25, %v10160_v14  ;;  %v3754_v8 = vmul.f32 %v3676_v20, %v3634_v12  ;;  %v12073_v58 = vld [vmem:[#allocation92_spill] sm:$0xff] }
 0x4e3   :  { %6562 = vmatpush1.bf16.msra.mxu1 %v6561_v44  ;;  %v10518_v28 = vpop.permute.xlu0 %4597  ;;  %v3635_v39 = vsel %vm550_vm2, %v12067_v11, %v12062_v26  ;;  %v3920_v42 = vrot.slane %v9685_v34, %v12058_v60  ;;  %v4168_v22 = vrot.slane %v9725_v40, %v12058_v60  ;;  %v4172_v55 = vrot.slane %v9725_v40, %v12059_v51  ;;  %v10544_v26 = vpop.permute.xlu1 %4087  ;;  %v12069_v34 = vld [vmem:[#allocation74_spill] sm:$0xff]  ;;  %v12070_v44 = vld [vmem:[#allocation76_spill] sm:$0xff] }
 0x4e4   :  { %v3884_v14 = vsel %vm1378_vm5, %v12068_v50, %v12066_v30  ;;  %v4002_v48 = vmul.f32 %v3924_v45, %v3882_v4  ;;  %v6505_v61 = vpack.c.bf16 %v3505_v3, %v3489_v10  ;;  %v3737_v49 = vmul.f32 %v3672_v29, %v3635_v39  ;;  %v12074_v10 = vld [vmem:[#allocation90_spill] sm:$0xff] }
 0x4e5   :  { %4617 = vrot.lane.b32.xlu0 %v9811_v37, %s6778_s12  ;;  %6466 = vmatpush1.bf16.msra.mxu0 %v6465_v13  ;;  %v4130_v56 = vsel %vm102_vm0, %v12069_v34, %v9693_v57  ;;  %v3883_v40 = vsel %vm1378_vm5, %v12070_v44, %v10054_v25  ;;  %v3986_v15 = vmul.f32 %v3924_v45, %v3881_v62  ;;  %v10575_v13 = vld [vmem:[%s11596_s6 + $0x8] sm:$0xff] }
 0x4e6   :  { %6504 = vmatprep.subr.bf16.mxu0 %v6503_v36  ;;  %v6507_v32 = vpack.c.bf16 %v3754_v8, %v3738_v52  ;;  %v4704_v29 = vrot.slane %v9929_v2, %v11991_v24  ;;  %v4708_v17 = vrot.slane %v9929_v2, %v11989_v46  ;;  %v4129_v57 = vsel %vm102_vm0, %v12071_v19, %v10188_v43  ;;  %v12075_v52 = vld [vmem:[#allocation78_spill] sm:$0xff] }
 0x4e7   :  { %v4602_v20 = vpop.permute.xlu0 %4601  ;;  %v4001_v25 = vmul.f32 %v3920_v42, %v3884_v14  ;;  %v4652_v12 = vsel %vm2001_vm6, %v12073_v58, %v12072_v41  ;;  %v4250_v43 = vmul.f32 %v4172_v55, %v4130_v56  ;;  %v4654_v30 = vsel %vm2001_vm6, %v12074_v10, %v12073_v58  ;;  %v10592_v14 = vpop.permute.xlu1 %4091  ;;  %v12079_v58 = vld [vmem:[#allocation95_spill] sm:$0xff] }
 0x4e8   :  { %5682 = vmatmul.mubr.f32.vlgmr.msra.gmra.mrb[8].mxu0 %v10065_v31  ;;  %v4653_v45 = vsel %vm2001_vm6, %v10518_v28, %v4602_v20  ;;  %v6509_v4 = vpack.c.bf16 %v3753_v63, %v3737_v49  ;;  %v3985_v11 = vmul.f32 %v3920_v42, %v3883_v40  ;;  %v4131_v36 = vsel %vm102_vm0, %v12075_v52, %v12071_v19  ;;  %v12077_v63 = vld [vmem:[#allocation35_spill] sm:$0xff] }
 0x4e9   :  { %4621 = vrot.lane.b32.xlu0 %v12051_v18, %s6778_s12  ;;  %6506 = vmatpush1.bf16.msra.mxu0 %v6505_v61  ;;  %v4234_v3 = vmul.f32 %v4172_v55, %v4129_v57  ;;  %v6511_v8 = vpack.c.bf16 %v4002_v48, %v3986_v15  ;;  %v4780_v50 = vmul.f32 %v4708_v17, %v4652_v12 }
 0x4ea   :  { %6508 = vmatprep.subr.bf16.mxu0 %v6507_v32  ;;  %6361 = vmatprep.mubr.msk.f32.mxu0 %vm5613_vm9, %v10575_v13  ;;  %12076 = vst [vmem:[#allocation53_spill] sm:$0xff] %v10592_v14  ;;  %v4763_v61 = vmul.f32 %v4704_v29, %v4653_v45  ;;  %v4132_v42 = vsel %vm102_vm0, %v12077_v63, %v12069_v34 }
 0x4eb   :  { %v10583_v39 = vpop.permute.xlu0 %4605  ;;  %v4779_v55 = vmul.f32 %v4704_v29, %v4654_v30  ;;  %v6513_v49 = vpack.c.bf16 %v4001_v25, %v3985_v11  ;;  %v4233_v44 = vmul.f32 %v4168_v22, %v4131_v36  ;;  %v6515_v40 = vpack.c.bf16 %v4250_v43, %v4234_v3  ;;  %v10614_v57 = vpop.permute.xlu1 %4363  ;;  %v12080_v43 = vld [vmem:[#allocation70_spill] sm:$0xff] }
 0x4ec   :  { %v4651_v62 = vsel %vm2001_vm6, %v4602_v20, %v10583_v39  ;;  %v4249_v15 = vmul.f32 %v4168_v22, %v4132_v42  ;;  %v4407_v32 = vsel %vm379_vm1, %v10368_v9, %v10400_v21  ;;  %v4452_v34 = vrot.slane %v9901_v1, %v12059_v51  ;;  %v12078_v22 = vld [vmem:[#allocation80_spill] sm:$0xff]  ;;  %v12082_v3 = vld [vmem:[#allocation34_spill] sm:$0xff] }
 0x4ed   :  { %v4764_v56 = vmul.f32 %v4708_v17, %v4651_v62  ;;  %4857 = vrot.lane.b32.xlu0 %v9797_v5, %s6775_s26  ;;  %6510 = vmatpush1.bf16.msra.mxu0 %v6509_v4  ;;  %v6565_v17 = vpack.c.bf16 %v4779_v55, %v4763_v61  ;;  %v4448_v29 = vrot.slane %v9901_v1, %v12058_v60  ;;  %v6760_v1 = vld [vmem:[%s11594_s1 + $0x28] sm:$0xff]  ;;  %v12081_v4 = vld [vmem:[#allocation51_spill] sm:$0xff]  ;;  %v12084_v61 = vld [vmem:[#allocation44_spill] sm:$0xff] }
 0x4ee   :  { %6512 = vmatprep.subr.bf16.mxu0 %v6511_v8  ;;  %v4408_v19 = vsel %vm379_vm1, %v12078_v22, %v12053_v27  ;;  %v6517_v21 = vpack.c.bf16 %v4249_v15, %v4233_v44  ;;  %v4409_v12 = vsel %vm379_vm1, %v12079_v58, %v10368_v9  ;;  %v4514_v45 = vmul.f32 %v4452_v34, %v4407_v32  ;;  %v6761_v27 = vld [vmem:[%s11594_s1 + $0x20] sm:$0xff] }
 0x4ef   :  { %v4842_v20 = vpop.permute.xlu0 %4841  ;;  %v6563_v48 = vpack.c.bf16 %v4780_v50, %v4764_v56  ;;  %v6519_v30 = vpack.c.bf16 %v6760_v1, %v12080_v43  ;;  %v6521_v11 = vpack.c.bf16 %v6761_v27, %v12081_v4  ;;  %v4696_v52 = vrot.slane %v9929_v2, %v12058_v60  ;;  %v12083_v50 = vld [vmem:[#allocation89_spill] sm:$0xff]  ;;  %v12090_v1 = vld [vmem:[#allocation62_spill] sm:$0xff] }
 0x4f0   :  { %v4700_v36 = vrot.slane %v9929_v2, %v12059_v51  ;;  %v4655_v9 = vsel %vm2001_vm6, %v10486_v6, %v10518_v28  ;;  %v4410_v62 = vsel %vm379_vm1, %v12082_v3, %v12078_v22  ;;  %v4530_v8 = vmul.f32 %v4452_v34, %v4408_v19  ;;  %v10662_v34 = vpop.permute.xlu1 %4367 }
 0x4f1   :  { %4861 = vrot.lane.b32.xlu0 %v9787_v23, %s6775_s26  ;;  %6514 = vmatpush1.bf16.msra.mxu0 %v6513_v49  ;;  %v4658_v2 = vsel %vm2001_vm6, %v12084_v61, %v12083_v50  ;;  %v4944_v56 = vrot.slane %v9959_v53, %v12058_v60  ;;  %v4656_v28 = vsel %vm2001_vm6, %v12083_v50, %v12074_v10 }
 0x4f2   :  { %6564 = vmatprep.subr.bf16.mxu1 %v6563_v48  ;;  %6516 = vmatprep.subr.bf16.mxu0 %v6515_v40  ;;  %v4948_v63 = vrot.slane %v9959_v53, %v12059_v51  ;;  %v4952_v42 = vrot.slane %v9959_v53, %v11991_v24  ;;  %v4513_v55 = vmul.f32 %v4448_v29, %v4409_v12  ;;  %v12085_v48 = vld [vmem:[#allocation97_spill] sm:$0xff]  ;;  %v12089_v12 = vld [vmem:[#allocation54_spill] sm:$0xff] }
 0x4f3   :  { %6566 = vmatpush1.bf16.msra.mxu1 %v6565_v17  ;;  %v4846_v25 = vpop.permute.xlu0 %4845  ;;  %v4956_v44 = vrot.slane %v9959_v53, %v11989_v46  ;;  %v4657_v40 = vsel %vm2001_vm6, %v12085_v48, %v10486_v6  ;;  %v4762_v15 = vmul.f32 %v4700_v36, %v4655_v9  ;;  %v6523_v32 = vpack.c.bf16 %v4530_v8, %v4514_v45  ;;  %v12086_v53 = vld [vmem:[#allocation96_spill] sm:$0xff]  ;;  %v12088_v6 = vld [vmem:[#allocation66_spill] sm:$0xff] }
 0x4f4   :  { %v4529_v17 = vmul.f32 %v4448_v29, %v4410_v62  ;;  %v4777_v10 = vmul.f32 %v4696_v52, %v4658_v2  ;;  %v4903_v22 = vsel %vm827_vm3, %v4842_v20, %v4846_v25  ;;  %v4778_v19 = vmul.f32 %v4700_v36, %v4656_v28  ;;  %v12091_v36 = vld [vmem:[#allocation98_spill] sm:$0xff] }
 0x4f5   :  { %4865 = vrot.lane.b32.xlu0 %v9811_v37, %s6775_s26  ;;  %6518 = vmatpush1.bf16.msra.mxu0 %v6517_v21  ;;  %v12087_v21 = vld [vmem:[#allocation48_spill] sm:$0xff]  ;;  %v4900_v29 = vsel %vm827_vm3, %v12089_v12, %v12088_v6  ;;  %v4904_v43 = vsel %vm827_vm3, %v12086_v53, %v12090_v1  ;;  %v4761_v4 = vmul.f32 %v4696_v52, %v4657_v40 }
 0x4f6   :  { %6520 = vmatprep.subr.bf16.mxu0 %v6519_v30  ;;  %v4906_v58 = vsel %vm827_vm3, %v12087_v21, %v12086_v53  ;;  %v4902_v30 = vsel %vm827_vm3, %v12090_v1, %v12089_v12  ;;  %v6525_v27 = vpack.c.bf16 %v4529_v17, %v4513_v55  ;;  %v4905_v9 = vsel %vm827_vm3, %v12091_v36, %v4842_v20  ;;  %v6329_v8 = vld [vmem:[%s11592_s3 + $0x40] ss:$8 sm:$0xf]  ;;  %v10702_v55 = vpop.permute.xlu1 %4371 }
 0x4f7   :  { %v4850_v49 = vpop.permute.xlu0 %4849  ;;  %v6527_v62 = vpack.c.bf16 %v4778_v19, %v4762_v15  ;;  %v6330_v52 = vld [vmem:[%s11592_s3 + $0x40] ss:$8 sm:$0xf0]  ;;  %v5028_v50 = vmul.f32 %v4956_v44, %v4900_v29  ;;  %v5026_v20 = vmul.f32 %v4948_v63, %v4904_v43  ;;  %v5027_v28 = vmul.f32 %v4952_v42, %v4902_v30 }
 0x4f8   :  { %v4901_v45 = vsel %vm827_vm3, %v4846_v25, %v4850_v49  ;;  %v5010_v25 = vmul.f32 %v4948_v63, %v4903_v22  ;;  %v5009_v48 = vmul.f32 %v4944_v56, %v4905_v9  ;;  %v5025_v17 = vmul.f32 %v4944_v56, %v4906_v58  ;;  %v12092_v19 = vld [vmem:[#allocation100_spill] sm:$0xff]  ;;  %v12093_v53 = vld [vmem:[#allocation99_spill] sm:$0xff]  ;;  %v12095_v58 = vld [vmem:[#allocation101_spill] sm:$0xff] }
 0x4f9   :  { %4869 = vrot.lane.b32.xlu0 %v12051_v18, %s6775_s26  ;;  %6522 = vmatpush1.bf16.msra.mxu0 %v6521_v11  ;;  %v5011_v61 = vmul.f32 %v4952_v42, %v4901_v45  ;;  %v5196_v22 = vrot.slane %v9989_v16, %v12059_v51  ;;  %v5152_v63 = vsel %vm2390_vm7, %v12093_v53, %v12092_v19  ;;  %v12094_v42 = vld [vmem:[#allocation56_spill] sm:$0xff]  ;;  %v12096_v12 = vld [vmem:[#allocation17_spill] sm:$0xff] }
 0x4fa   :  { %6524 = vmatprep.subr.bf16.mxu0 %v6523_v32  ;;  %v10704_v32 = vor.u32 %v6330_v52, %v6329_v8  ;;  %v5192_v56 = vrot.slane %v9989_v16, %v12058_v60  ;;  %v3377_v29 = vsel %vm990_vm4, %v12096_v12, %v12095_v58  ;;  %v12097_v1 = vld [vmem:[#allocation57_spill] sm:$0xff]  ;;  %v6533_v30 = vpack.c.bf16 %v5025_v17, %v5009_v48  ;;  %v12099_v36 = vld [vmem:[#allocation24_spill] sm:$0xff]  ;;  %v10735_v8 = vpop.permute.xlu1 %4375  ;;  %v12100_v52 = vld [vmem:[#allocation15_spill] sm:$0xff] }
 0x4fb   :  { %v10686_v11 = vpop.permute.xlu0 %4853  ;;  %v6569_v21 = vpack.c.bf16 %v5027_v28, %v5011_v61  ;;  %v5154_v43 = vsel %vm2390_vm7, %v12097_v1, %v12093_v53  ;;  %v12105_v1 = vld [vmem:[#allocation71_spill] sm:$0xff] }
 0x4fc   :  { %v4899_v3 = vsel %vm827_vm3, %v4850_v49, %v10686_v11  ;;  %v6529_v49 = vpack.c.bf16 %v4777_v10, %v4761_v4  ;;  %v3444_v45 = vrot.slane %v10704_v32, %v12022_v7  ;;  %v12098_v4 = vld [vmem:[#allocation28_spill] sm:$0xff]  ;;  %v5273_v28 = vmul.f32 %v5192_v56, %v5154_v43 }
 0x4fd   :  { %v5012_v2 = vmul.f32 %v4956_v44, %v4899_v3  ;;  %5105 = vrot.lane.b32.xlu0 %v9797_v5, %s6779_s13  ;;  %6526 = vmatpush1.bf16.msra.mxu0 %v6525_v27  ;;  %v6531_v44 = vpack.c.bf16 %v5026_v20, %v5010_v25  ;;  %v3378_v9 = vsel %vm990_vm4, %v12099_v36, %v12098_v4 }
 0x4fe   :  { %6528 = vmatprep.subr.bf16.mxu0 %v6527_v62  ;;  %v5274_v25 = vmul.f32 %v5196_v22, %v5152_v63  ;;  %v3494_v61 = vmul.f32 %v3444_v45, %v3377_v29  ;;  %v3440_v20 = vrot.slane %v10704_v32, %v12017_v54  ;;  %v12102_v63 = vld [vmem:[#allocation14_spill] sm:$0xff]  ;;  %v5200_v29 = vrot.slane %v9989_v16, %v11991_v24 }
 0x4ff   :  { %v5090_v40 = vpop.permute.xlu0 %5089  ;;  %v6567_v15 = vpack.c.bf16 %v5028_v50, %v5012_v2  ;;  %v3379_v50 = vsel %vm990_vm4, %v12100_v52, %v12096_v12  ;;  %v10781_v52 = vpop.permute.xlu1 %4611 }
 0x500   :  { %v5153_v10 = vsel %vm2390_vm7, %v12094_v42, %v5090_v40 }
 0x501   :  { %5109 = vrot.lane.b32.xlu0 %v9787_v23, %s6779_s13  ;;  %6530 = vmatpush1.bf16.msra.mxu0 %v6529_v49  ;;  %v5257_v3 = vmul.f32 %v5192_v56, %v5153_v10  ;;  %v12101_v49 = vld [vmem:[#allocation33_spill] sm:$0xff] }
 0x502   :  { %6568 = vmatprep.subr.bf16.mxu1 %v6567_v15  ;;  %6532 = vmatprep.subr.bf16.mxu0 %v6531_v44  ;;  %v3380_v48 = vsel %vm990_vm4, %v12101_v49, %v12099_v36  ;;  %v5204_v44 = vrot.slane %v9989_v16, %v11989_v46  ;;  %v6333_v16 = vld [vmem:[%s11592_s3 + $0x41] ss:$8 sm:$0xf] }
 0x503   :  { %6570 = vmatpush1.bf16.msra.mxu1 %v6569_v21  ;;  %v5094_v27 = vpop.permute.xlu0 %5093  ;;  %v6537_v53 = vpack.c.bf16 %v5273_v28, %v5257_v3  ;;  %v12103_v21 = vld [vmem:[#allocation67_spill] sm:$0xff]  ;;  %v3509_v12 = vmul.f32 %v3440_v20, %v3380_v48  ;;  %v3375_v28 = vsel %vm990_vm4, %v12095_v58, %v12105_v1 }
 0x504   :  { %v5151_v62 = vsel %vm2390_vm7, %v5090_v40, %v5094_v27  ;;  %v3510_v40 = vmul.f32 %v3444_v45, %v3378_v9  ;;  %v5148_v42 = vsel %vm2390_vm7, %v12103_v21, %v12102_v63  ;;  %v12104_v45 = vld [vmem:[#allocation102_spill] sm:$0xff]  ;;  %v12107_v9 = vld [vmem:[#allocation31_spill] sm:$0xff]  ;;  %v5150_v3 = vsel %vm2390_vm7, %v12092_v19, %v12103_v21 }
 0x505   :  { %v5258_v2 = vmul.f32 %v5196_v22, %v5151_v62  ;;  %5113 = vrot.lane.b32.xlu0 %v9811_v37, %s6779_s13  ;;  %6534 = vmatpush1.bf16.msra.mxu0 %v6533_v30  ;;  %v3493_v22 = vmul.f32 %v3440_v20, %v3379_v50  ;;  %v3373_v43 = vsel %vm990_vm4, %v12105_v1, %v12104_v45  ;;  %v12106_v30 = vld [vmem:[#allocation11_spill] sm:$0xff] }
 0x506   :  { %v6575_v56 = vpack.c.bf16 %v3510_v40, %v3494_v61  ;;  %v3452_v36 = vrot.slane %v10704_v32, %v12106_v30  ;;  %v6334_v62 = vld [vmem:[%s11592_s3 + $0x41] ss:$8 sm:$0xf0]  ;;  %v5276_v61 = vmul.f32 %v5204_v44, %v5148_v42 }
 0x507   :  { %v5098_v15 = vpop.permute.xlu0 %5097  ;;  %v6535_v17 = vpack.c.bf16 %v5274_v25, %v5258_v2  ;;  %v6577_v2 = vpack.c.bf16 %v3509_v12, %v3493_v22  ;;  %v12109_v40 = vld [vmem:[#allocation8_spill] sm:$0xff]  ;;  %v5275_v22 = vmul.f32 %v5200_v29, %v5150_v3  ;;  %v10807_v12 = vpop.permute.xlu1 %4615 }
 0x508   :  { %v5149_v10 = vsel %vm2390_vm7, %v5094_v27, %v5098_v15  ;;  %v12108_v27 = vld [vmem:[#allocation43_spill] sm:$0xff]  ;;  %v3496_v49 = vmul.f32 %v3452_v36, %v3373_v43  ;;  %v12111_v43 = vld [vmem:[#allocation86_spill] sm:$0xff] }
 0x509   :  { %5117 = vrot.lane.b32.xlu0 %v12051_v18, %s6779_s13  ;;  %6536 = vmatprep.subr.bf16.mxu0 %v6535_v17  ;;  %v3374_v25 = vsel %vm990_vm4, %v12108_v27, %v12107_v9  ;;  %v5259_v20 = vmul.f32 %v5200_v29, %v5149_v10  ;;  %v3448_v17 = vrot.slane %v10704_v32, %v12109_v40  ;;  %v12110_v29 = vld [vmem:[#allocation20_spill] sm:$0xff] }
 0x50a   :  { %6538 = vmatpush1.bf16.msra.mxu0 %v6537_v53  ;;  %v10797_v53 = vor.u32 %v6334_v62, %v6333_v16  ;;  %v3376_v58 = vsel %vm990_vm4, %v12098_v4, %v12108_v27  ;;  %v12112_v27 = vld [vmem:[#allocation103_spill] sm:$0xff]  ;;  %v12114_v62 = vld [vmem:[#allocation32_spill] sm:$0xff] }
 0x50b   :  { %v10783_v50 = vpop.permute.xlu0 %5101  ;;  %6576 = vmatprep.subr.bf16.mxu0 %v6575_v56  ;;  %v3495_v42 = vmul.f32 %v3448_v17, %v3375_v28  ;;  %v6573_v10 = vpack.c.bf16 %v5275_v22, %v5259_v20  ;;  %v3511_v4 = vmul.f32 %v3448_v17, %v3376_v58  ;;  %v12115_v17 = vld [vmem:[#allocation84_spill] sm:$0xff]  ;;  %v10831_v58 = vpop.permute.xlu1 %4619 }
 0x50c   :  { %v5147_v19 = vsel %vm2390_vm7, %v5098_v15, %v10783_v50  ;;  %v3512_v15 = vmul.f32 %v3452_v36, %v3374_v25  ;;  %v3692_v56 = vrot.slane %v10797_v53, %v12022_v7  ;;  %v3688_v36 = vrot.slane %v10797_v53, %v12017_v54  ;;  %v12113_v25 = vld [vmem:[#allocation65_spill] sm:$0xff] }
 0x50d   :  { %v5260_v48 = vmul.f32 %v5204_v44, %v5147_v19  ;;  %3597 = vrot.lane.b32.xlu0 %v12051_v18, %s6774_s25  ;;  %5824 = vmatmul.mubr.f32.vlgmr.msra.gmra.mrb[10].mxu0 %v10065_v31  ;;  %v3626_v16 = vsel %vm550_vm2, %v12113_v25, %v12112_v27  ;;  %v6613_v20 = vpack.c.bf16 %v3511_v4, %v3495_v42  ;;  %v6337_v4 = vld [vmem:[%s11592_s3 + $0x42] ss:$8 sm:$0xf] }
 0x50e   :  { %6578 = vmatpush1.bf16.msra.mxu0 %v6577_v2  ;;  %6363 = vmatprep.mubr.msk.f32.mxu0 %vm5613_vm9, %v10575_v13  ;;  %v6611_v3 = vpack.c.bf16 %v3512_v15, %v3496_v49  ;;  %v3758_v49 = vmul.f32 %v3692_v56, %v3626_v16 }
 0x50f   :  { %v3582_v44 = vpop.permute.xlu0 %3581  ;;  %v6571_v21 = vpack.c.bf16 %v5276_v61, %v5260_v48  ;;  %v3628_v61 = vsel %vm550_vm2, %v12114_v62, %v12113_v25 }
 0x510   :  { %v3627_v1 = vsel %vm550_vm2, %v12110_v29, %v3582_v44  ;;  %v3757_v22 = vmul.f32 %v3688_v36, %v3628_v61  ;;  %v12117_v29 = vld [vmem:[#allocation105_spill] sm:$0xff] }
 0x511   :  { %3601 = vrot.lane.b32.xlu0 %v12111_v43, %s6774_s25  ;;  %6572 = vmatprep.subr.bf16.mxu1 %v6571_v21  ;;  %v3741_v19 = vmul.f32 %v3688_v36, %v3627_v1  ;;  %v6338_v36 = vld [vmem:[%s11592_s3 + $0x42] ss:$8 sm:$0xf0] }
 0x512   :  { %6574 = vmatpush1.bf16.msra.mxu1 %v6573_v10 }
 0x513   :  { %v3586_v2 = vpop.permute.xlu0 %3585  ;;  %6612 = vmatprep.subr.bf16.mxu1 %v6611_v3  ;;  %v6581_v42 = vpack.c.bf16 %v3757_v22, %v3741_v19  ;;  %v3624_v3 = vsel %vm550_vm2, %v12112_v27, %v12117_v29  ;;  %v10864_v19 = vor.u32 %v6338_v36, %v6337_v4 }
 0x514   :  { %v3625_v28 = vsel %vm550_vm2, %v3582_v44, %v3586_v2  ;;  %v3700_v44 = vrot.slane %v10797_v53, %v12106_v30 }
 0x515   :  { %v3742_v48 = vmul.f32 %v3692_v56, %v3625_v28  ;;  %3605 = vrot.lane.b32.xlu0 %v12115_v17, %s6774_s25  ;;  %5895 = vmatmul.mubr.f32.vlgmr.msra.gmra.mrb[10].mxu1 %v10065_v31  ;;  %v3696_v31 = vrot.slane %v10797_v53, %v12109_v40  ;;  %v12116_v56 = vld [vmem:[#allocation9_spill] sm:$0xff]  ;;  %v3940_v22 = vrot.slane %v10864_v19, %v12022_v7 }
 0x516   :  { %6614 = vmatpush1.bf16.msra.mxu1 %v6613_v20  ;;  %6364 = vmatprep.mubr.msk.f32.mxu1 %vm5613_vm9, %v10575_v13  ;;  %v3622_v1 = vsel %vm550_vm2, %v12117_v29, %v12116_v56 }
 0x517   :  { %v3590_v15 = vpop.permute.xlu0 %3589  ;;  %v6579_v21 = vpack.c.bf16 %v3758_v49, %v3742_v48  ;;  %v3760_v61 = vmul.f32 %v3700_v44, %v3622_v1  ;;  %v3759_v27 = vmul.f32 %v3696_v31, %v3624_v3 }
 0x518   :  { %v3623_v10 = vsel %vm550_vm2, %v3586_v2, %v3590_v15  ;;  %v10860_v2 = vpop.permute.xlu1 %4623 }
 0x519   :  { %3845 = vrot.lane.b32.xlu0 %v12051_v18, %s6777_s11  ;;  %6580 = vmatprep.subr.bf16.mxu0 %v6579_v21  ;;  %v3743_v16 = vmul.f32 %v3696_v31, %v3623_v10  ;;  %v12118_v21 = vld [vmem:[#allocation6_spill] sm:$0xff]  ;;  %v12119_v10 = vld [vmem:[#allocation72_spill] sm:$0xff] }
 0x51a   :  { %6582 = vmatpush1.bf16.msra.mxu0 %v6581_v42  ;;  %v3936_v42 = vrot.slane %v10864_v19, %v12017_v54  ;;  %v3876_v31 = vsel %vm1378_vm5, %v12119_v10, %v10302_v47 }
 0x51b   :  { %v10855_v25 = vpop.permute.xlu0 %3593  ;;  %v6617_v48 = vpack.c.bf16 %v3759_v27, %v3743_v16 }
 0x51c   :  { %v3621_v62 = vsel %vm550_vm2, %v3590_v15, %v10855_v25  ;;  %v10883_v29 = vpop.permute.xlu1 %4859 }
 0x51d   :  { %v3744_v20 = vmul.f32 %v3700_v44, %v3621_v62  ;;  %3849 = vrot.lane.b32.xlu0 %v12111_v43, %s6777_s11  ;;  %v3874_v44 = vsel %vm1378_vm5, %v10302_v47, %v10336_v59  ;;  %v4005_v62 = vmul.f32 %v3936_v42, %v3876_v31 }
 0x51e   :  { %v4006_v36 = vmul.f32 %v3940_v22, %v3874_v44 }
 0x51f   :  { %v3830_v28 = vpop.permute.xlu0 %3829  ;;  %v6615_v49 = vpack.c.bf16 %v3760_v61, %v3744_v20 }
 0x520   :  { %v3875_v15 = vsel %vm1378_vm5, %v12118_v21, %v3830_v28  ;;  %v10891_v47 = vpop.permute.xlu1 %4863  ;;  %v3872_v21 = vsel %vm1378_vm5, %v10336_v59, %v10366_v0 }
 0x521   :  { %3853 = vrot.lane.b32.xlu0 %v12115_v17, %s6777_s11  ;;  %6616 = vmatprep.subr.bf16.mxu1 %v6615_v49  ;;  %v3989_v3 = vmul.f32 %v3936_v42, %v3875_v15  ;;  %v3948_v49 = vrot.slane %v10864_v19, %v12106_v30  ;;  %v6341_v15 = vld [vmem:[%s11592_s3 + $0x43] ss:$8 sm:$0xf] }
 0x522   :  { %6618 = vmatpush1.bf16.msra.mxu1 %v6617_v48  ;;  %v6342_v42 = vld [vmem:[%s11592_s3 + $0x43] ss:$8 sm:$0xf0] }
 0x523   :  { %v3834_v1 = vpop.permute.xlu0 %3833  ;;  %v6585_v27 = vpack.c.bf16 %v4005_v62, %v3989_v3 }
 0x524   :  { %v3873_v4 = vsel %vm1378_vm5, %v3830_v28, %v3834_v1  ;;  %v3944_v28 = vrot.slane %v10864_v19, %v12109_v40 }
 0x525   :  { %v3990_v16 = vmul.f32 %v3940_v22, %v3873_v4  ;;  %4093 = vrot.lane.b32.xlu0 %v12051_v18, %s6772_s9  ;;  %v3870_v22 = vsel %vm1378_vm5, %v10366_v0, %v10416_v35  ;;  %v10920_v0 = vor.u32 %v6342_v42, %v6341_v15  ;;  %v10922_v4 = vpop.permute.xlu1 %4867 }
 0x526   :  { %v4007_v59 = vmul.f32 %v3944_v28, %v3872_v21 }
 0x527   :  { %v3838_v61 = vpop.permute.xlu0 %3837  ;;  %v6583_v20 = vpack.c.bf16 %v4006_v36, %v3990_v16  ;;  %12120 = vst [vmem:[#allocation22_spill] sm:$0xff] %v10920_v0  ;;  %v4196_v18 = vrot.slane %v10920_v0, %v12106_v30 }
 0x528   :  { %v3871_v48 = vsel %vm1378_vm5, %v3834_v1, %v3838_v61  ;;  %v4008_v1 = vmul.f32 %v3948_v49, %v3870_v22  ;;  %v12123_v22 = vld [vmem:[#allocation77_spill] sm:$0xff] }
 0x529   :  { %4097 = vrot.lane.b32.xlu0 %v12111_v43, %s6772_s9  ;;  %6584 = vmatprep.subr.bf16.mxu0 %v6583_v20  ;;  %v3991_v10 = vmul.f32 %v3944_v28, %v3871_v48  ;;  %v4188_v20 = vrot.slane %v10920_v0, %v12022_v7  ;;  %v12122_v48 = vld [vmem:[#allocation60_spill] sm:$0xff] }
 0x52a   :  { %6586 = vmatpush1.bf16.msra.mxu0 %v6585_v27  ;;  %v12121_v27 = vld [vmem:[#allocation38_spill] sm:$0xff]  ;;  %v4122_v28 = vsel %vm102_vm0, %v12122_v48, %v10496_v38  ;;  %v4124_v21 = vsel %vm102_vm0, %v12123_v22, %v12122_v48  ;;  %v12125_v48 = vld [vmem:[#allocation88_spill] sm:$0xff]  ;;  %v4120_v22 = vsel %vm102_vm0, %v10496_v38, %v10544_v26 }
 0x52b   :  { %v10913_v44 = vpop.permute.xlu0 %3841  ;;  %v6621_v62 = vpack.c.bf16 %v4007_v59, %v3991_v10  ;;  %v6763_v38 = vld [vmem:[%s11594_s1 + $0x40] sm:$0xff] }
 0x52c   :  { %v3869_v31 = vsel %vm1378_vm5, %v3838_v61, %v10913_v44 }
 0x52d   :  { %v3992_v3 = vmul.f32 %v3948_v49, %v3869_v31  ;;  %4101 = vrot.lane.b32.xlu0 %v12115_v17, %s6772_s9  ;;  %v4184_v49 = vrot.slane %v10920_v0, %v12017_v54  ;;  %v4254_v31 = vmul.f32 %v4188_v20, %v4122_v28  ;;  %v4118_v28 = vsel %vm102_vm0, %v10544_v26, %v10592_v14  ;;  %v12127_v26 = vld [vmem:[#allocation79_spill] sm:$0xff] }
 0x52f   :  { %v4078_v36 = vpop.permute.xlu0 %4077  ;;  %v6619_v16 = vpack.c.bf16 %v4008_v1, %v3992_v3  ;;  %v10943_v1 = vpop.permute.xlu1 %4871  ;;  %v4253_v59 = vmul.f32 %v4184_v49, %v4124_v21  ;;  %v6345_v21 = vld [vmem:[%s11592_s3 + $0x45] ss:$8 sm:$0xf] }
 0x530   :  { %v4123_v61 = vsel %vm102_vm0, %v12121_v27, %v4078_v36  ;;  %12124 = vst [vmem:[#allocation55_spill] sm:$0xff] %v10943_v1 }
 0x531   :  { %4377 = vrot.lane.b32.xlu0 %v12111_v43, %s6773_s18  ;;  %6620 = vmatprep.subr.bf16.mxu1 %v6619_v16  ;;  %v4237_v42 = vmul.f32 %v4184_v49, %v4123_v61  ;;  %v4192_v49 = vrot.slane %v10920_v0, %v12109_v40  ;;  %v12128_v0 = vld [vmem:[#allocation42_spill] sm:$0xff] }
 0x532   :  { %6622 = vmatpush1.bf16.msra.mxu1 %v6621_v62 }
 0x533   :  { %v4082_v15 = vpop.permute.xlu0 %4081  ;;  %v6589_v27 = vpack.c.bf16 %v4253_v59, %v4237_v42  ;;  %v4256_v59 = vmul.f32 %v4196_v18, %v4118_v28 }
 0x534   :  { %v4121_v10 = vsel %vm102_vm0, %v4078_v36, %v4082_v15  ;;  %v6762_v36 = vld [vmem:[%s11594_s1 + $0x48] sm:$0xff] }
 0x535   :  { %v4238_v3 = vmul.f32 %v4188_v20, %v4121_v10  ;;  %4381 = vrot.lane.b32.xlu0 %v12115_v17, %s6773_s18  ;;  %v6591_v20 = vpack.c.bf16 %v6762_v36, %v9797_v5  ;;  %v6346_v5 = vld [vmem:[%s11592_s3 + $0x45] ss:$8 sm:$0xf0] }
 0x536   :  { %v10986_v36 = vor.u32 %v6346_v5, %v6345_v21  ;;  %v4400_v21 = vsel %vm379_vm1, %v10614_v57, %v10662_v34 }
 0x537   :  { %v4086_v16 = vpop.permute.xlu0 %4085  ;;  %v6587_v62 = vpack.c.bf16 %v4254_v31, %v4238_v3  ;;  %v6593_v3 = vpack.c.bf16 %v6763_v38, %v12127_v26  ;;  %v6765_v38 = vld [vmem:[%s11594_s1 + $0x50] sm:$0xff] }
 0x538   :  { %v4119_v61 = vsel %vm102_vm0, %v4082_v15, %v4086_v16  ;;  %v10973_v15 = vpop.permute.xlu1 %5107  ;;  %v6629_v26 = vpack.c.bf16 %v6765_v38, %v9787_v23  ;;  %v4472_v23 = vrot.slane %v10986_v36, %v12109_v40 }
 0x539   :  { %4385 = vrot.lane.b32.xlu0 %v12125_v48, %s6773_s18  ;;  %6588 = vmatprep.subr.bf16.mxu0 %v6587_v62  ;;  %v4239_v10 = vmul.f32 %v4192_v49, %v4119_v61 }
 0x53a   :  { %6590 = vmatpush1.bf16.msra.mxu0 %v6589_v27  ;;  %v4255_v27 = vmul.f32 %v4192_v49, %v4120_v22  ;;  %v4464_v22 = vrot.slane %v10986_v36, %v12017_v54 }
 0x53b   :  { %v10975_v42 = vpop.permute.xlu0 %4089  ;;  %6592 = vmatprep.subr.bf16.mxu0 %v6591_v20 }
 0x53c   :  { %12126 = vst [vmem:[#allocation37_spill] sm:$0xff] %v10975_v42  ;;  %v4117_v31 = vsel %vm102_vm0, %v4086_v16, %v10975_v42  ;;  %v6625_v14 = vpack.c.bf16 %v4255_v27, %v4239_v10  ;;  %v4468_v16 = vrot.slane %v10986_v36, %v12022_v7  ;;  %v10990_v42 = vpop.permute.xlu1 %5111 }
 0x53d   :  { %v4240_v62 = vmul.f32 %v4196_v18, %v4117_v31  ;;  %4625 = vrot.lane.b32.xlu0 %v12111_v43, %s6778_s12  ;;  %v6764_v18 = vld [vmem:[%s11594_s1 + $0x58] sm:$0xff] }
 0x53e   :  { %6594 = vmatpush1.bf16.msra.mxu0 %v6593_v3  ;;  %v6627_v49 = vpack.c.bf16 %v6764_v18, %v9811_v37  ;;  %v4534_v3 = vmul.f32 %v4468_v16, %v4400_v21  ;;  %v4398_v18 = vsel %vm379_vm1, %v10662_v34, %v10702_v55  ;;  %v6350_v21 = vld [vmem:[%s11592_s3 + $0x46] ss:$8 sm:$0xf0] }
 0x53f   :  { %v4362_v61 = vpop.permute.xlu0 %4361  ;;  %v6623_v20 = vpack.c.bf16 %v4256_v59, %v4240_v62  ;;  %v4535_v34 = vmul.f32 %v4472_v23, %v4398_v18 }
 0x540   :  { %v4401_v28 = vsel %vm379_vm1, %v12128_v0, %v4362_v61  ;;  %v12129_v0 = vld [vmem:[#allocation85_spill] sm:$0xff] }
 0x541   :  { %4629 = vrot.lane.b32.xlu0 %v12115_v17, %s6778_s12  ;;  %6624 = vmatprep.subr.bf16.mxu1 %v6623_v20  ;;  %v4402_v5 = vsel %vm379_vm1, %v12129_v0, %v10614_v57  ;;  %v4517_v31 = vmul.f32 %v4464_v22, %v4401_v28  ;;  %v11019_v57 = vpop.permute.xlu1 %5115 }
 0x542   :  { %6626 = vmatpush1.bf16.msra.mxu1 %v6625_v14  ;;  %v4533_v14 = vmul.f32 %v4464_v22, %v4402_v5  ;;  %v6349_v22 = vld [vmem:[%s11592_s3 + $0x46] ss:$8 sm:$0xf] }
 0x543   :  { %v4366_v10 = vpop.permute.xlu0 %4365  ;;  %6628 = vmatprep.subr.bf16.mxu1 %v6627_v49 }
 0x544   :  { %v4399_v37 = vsel %vm379_vm1, %v4362_v61, %v4366_v10  ;;  %v6597_v20 = vpack.c.bf16 %v4533_v14, %v4517_v31  ;;  %v4476_v61 = vrot.slane %v10986_v36, %v12106_v30 }
 0x545   :  { %v4518_v59 = vmul.f32 %v4468_v16, %v4399_v37  ;;  %4633 = vrot.lane.b32.xlu0 %v12125_v48, %s6778_s12  ;;  %v4396_v16 = vsel %vm379_vm1, %v10702_v55, %v10735_v8  ;;  %v11048_v31 = vpop.permute.xlu1 %5119  ;;  %v11052_v55 = vor.u32 %v6350_v21, %v6349_v22 }
 0x546   :  { %6630 = vmatpush1.bf16.msra.mxu1 %v6629_v26 }
 0x547   :  { %v4370_v62 = vpop.permute.xlu0 %4369  ;;  %v6595_v27 = vpack.c.bf16 %v4534_v3, %v4518_v59  ;;  %v4716_v59 = vrot.slane %v11052_v55, %v12022_v7 }
 0x548   :  { %v4397_v28 = vsel %vm379_vm1, %v4366_v10, %v4370_v62  ;;  %v4536_v10 = vmul.f32 %v4476_v61, %v4396_v16 }
 0x549   :  { %4873 = vrot.lane.b32.xlu0 %v12111_v43, %s6775_s26  ;;  %6596 = vmatprep.subr.bf16.mxu0 %v6595_v27  ;;  %v4519_v0 = vmul.f32 %v4472_v23, %v4397_v28  ;;  %v4648_v27 = vsel %vm2001_vm6, %v10781_v52, %v10807_v12 }
 0x54a   :  { %6598 = vmatpush1.bf16.msra.mxu0 %v6597_v20  ;;  %v4650_v20 = vsel %vm2001_vm6, %v12072_v41, %v10781_v52  ;;  %v4782_v16 = vmul.f32 %v4716_v59, %v4648_v27 }
 0x54b   :  { %v11037_v49 = vpop.permute.xlu0 %4373  ;;  %v6633_v3 = vpack.c.bf16 %v4535_v34, %v4519_v0  ;;  %v4720_v34 = vrot.slane %v11052_v55, %v12109_v40 }
 0x54c   :  { %v4395_v5 = vsel %vm379_vm1, %v4370_v62, %v11037_v49  ;;  %v4712_v62 = vrot.slane %v11052_v55, %v12017_v54 }
 0x54d   :  { %v4520_v37 = vmul.f32 %v4476_v61, %v4395_v5  ;;  %4877 = vrot.lane.b32.xlu0 %v12115_v17, %s6775_s26  ;;  %v11071_v61 = vpop.permute.xlu1 %3599 }
 0x54e   :  { %v4781_v22 = vmul.f32 %v4712_v62, %v4650_v20 }
 0x54f   :  { %v4610_v38 = vpop.permute.xlu0 %4609  ;;  %v6631_v26 = vpack.c.bf16 %v4536_v10, %v4520_v37  ;;  %v4724_v10 = vrot.slane %v11052_v55, %v12106_v30  ;;  %v11085_v37 = vpop.f32.mrb[8].mxu1 }
 0x550   :  { %v4649_v14 = vsel %vm2001_vm6, %v10583_v39, %v4610_v38  ;;  %12130 = vst [vmem:[#allocation36_spill] sm:$0xff] %v11085_v37 }
 0x551   :  { %4881 = vrot.lane.b32.xlu0 %v12125_v48, %s6775_s26  ;;  %6632 = vmatprep.subr.bf16.mxu1 %v6631_v26  ;;  %v4765_v28 = vmul.f32 %v4712_v62, %v4649_v14  ;;  %v11079_v41 = vpop.permute.xlu1 %3603  ;;  %v11093_v26 = vpop.f32.mrb[9].mxu1  ;;  %v6353_v14 = vld [vmem:[%s11592_s3 + $0x47] ss:$8 sm:$0xf] }
 0x552   :  { %6634 = vmatpush1.bf16.msra.mxu1 %v6633_v3  ;;  %12131 = vst [vmem:[#allocation41_spill] sm:$0xff] %v11093_v26  ;;  %v4646_v3 = vsel %vm2001_vm6, %v10807_v12, %v10831_v58  ;;  %v6354_v62 = vld [vmem:[%s11592_s3 + $0x47] ss:$8 sm:$0xf0] }
 0x553   :  { %v4614_v39 = vpop.permute.xlu0 %4613  ;;  %v6601_v5 = vpack.c.bf16 %v4781_v22, %v4765_v28  ;;  %v4783_v12 = vmul.f32 %v4720_v34, %v4646_v3 }
 0x554   :  { %v4647_v23 = vsel %vm2001_vm6, %v4610_v38, %v4614_v39  ;;  %v4644_v38 = vsel %vm2001_vm6, %v10831_v58, %v10860_v2  ;;  %v5607_v58 = vld [vmem:[%s11597_s7] sm:$0xff] }
 0x555   :  { %v4766_v18 = vmul.f32 %v4716_v59, %v4647_v23  ;;  %5121 = vrot.lane.b32.xlu0 %v12111_v43, %s6779_s13  ;;  %v11115_v23 = vor.u32 %v6354_v62, %v6353_v14 }
 0x557   :  { %v4618_v21 = vpop.permute.xlu0 %4617  ;;  %v6599_v0 = vpack.c.bf16 %v4782_v16, %v4766_v18  ;;  %v11117_v16 = vpop.permute.xlu1 %3607 }
 0x558   :  { %v4645_v52 = vsel %vm2001_vm6, %v4614_v39, %v4618_v21  ;;  %v4784_v39 = vmul.f32 %v4724_v10, %v4644_v38 }
 0x559   :  { %5125 = vrot.lane.b32.xlu0 %v12115_v17, %s6779_s13  ;;  %6600 = vmatprep.subr.bf16.mxu0 %v6599_v0  ;;  %v4767_v27 = vmul.f32 %v4720_v34, %v4645_v52  ;;  %v4896_v52 = vsel %vm827_vm3, %v10883_v29, %v10891_v47  ;;  %v4898_v34 = vsel %vm827_vm3, %v12088_v6, %v10883_v29 }
 0x55a   :  { %6602 = vmatpush1.bf16.msra.mxu0 %v6601_v5  ;;  %v4968_v6 = vrot.slane %v11115_v23, %v12109_v40  ;;  %v4892_v29 = vsel %vm827_vm3, %v10922_v4, %v10943_v1 }
 0x55b   :  { %v11099_v59 = vpop.permute.xlu0 %4621  ;;  %v6637_v0 = vpack.c.bf16 %v4783_v12, %v4767_v27  ;;  %v11136_v62 = vpop.permute.xlu1 %3847 }
 0x55c   :  { %v4643_v20 = vsel %vm2001_vm6, %v4618_v21, %v11099_v59  ;;  %v4964_v21 = vrot.slane %v11115_v23, %v12022_v7 }
 0x55d   :  { %v4768_v28 = vmul.f32 %v4724_v10, %v4643_v20  ;;  %5129 = vrot.lane.b32.xlu0 %v12125_v48, %s6779_s13  ;;  %v4960_v10 = vrot.slane %v11115_v23, %v12017_v54 }
 0x55e   :  { %v5030_v14 = vmul.f32 %v4964_v21, %v4896_v52 }
 0x55f   :  { %v4858_v18 = vpop.permute.xlu0 %4857  ;;  %v6635_v22 = vpack.c.bf16 %v4784_v39, %v4768_v28  ;;  %v5029_v20 = vmul.f32 %v4960_v10, %v4898_v34 }
 0x560   :  { %v4897_v5 = vsel %vm827_vm3, %v10686_v11, %v4858_v18 }
 0x561   :  { %5610 = vperm.xlu0 %6729, %v5607_v58   ;;  %6636 = vmatprep.subr.bf16.mxu1 %v6635_v22  ;;  %v5013_v3 = vmul.f32 %v4960_v10, %v4897_v5  ;;  %v4972_v58 = vrot.slane %v11115_v23, %v12106_v30  ;;  %v6357_v5 = vld [vmem:[%s11592_s3 + $0xc0] ss:$8 sm:$0xf] }
 0x562   :  { %6638 = vmatpush1.bf16.msra.mxu1 %v6637_v0  ;;  %v11152_v0 = vpop.permute.xlu1 %3851  ;;  %v6358_v10 = vld [vmem:[%s11592_s3 + $0xc0] ss:$8 sm:$0xf0] }
 0x563   :  { %v4862_v38 = vpop.permute.xlu0 %4861  ;;  %v6605_v12 = vpack.c.bf16 %v5029_v20, %v5013_v3 }
 0x564   :  { %v4895_v11 = vsel %vm827_vm3, %v4858_v18, %v4862_v38  ;;  %v4894_v18 = vsel %vm827_vm3, %v10891_v47, %v10922_v4  ;;  %v11165_v4 = vor.u32 %v6358_v10, %v6357_v5  ;;  %v12135_v5 = vld [vmem:[#allocation45_spill] sm:$0xff] }
 0x565   :  { %v5014_v27 = vmul.f32 %v4964_v21, %v4895_v11  ;;  %v5031_v47 = vmul.f32 %v4968_v6, %v4894_v18  ;;  %v12134_v18 = vld [vmem:[#allocation7_spill] sm:$0xff] }
 0x566   :  { %v5212_v20 = vrot.slane %v11165_v4, %v12022_v7  ;;  %v3370_v10 = vsel %vm990_vm4, %v12135_v5, %v12134_v18 }
 0x567   :  { %v4866_v39 = vpop.permute.xlu0 %4865  ;;  %v6603_v28 = vpack.c.bf16 %v5030_v14, %v5014_v27 }
 0x568   :  { %v4893_v22 = vsel %vm827_vm3, %v4862_v38, %v4866_v39  ;;  %v5032_v38 = vmul.f32 %v4972_v58, %v4892_v29  ;;  %v3460_v29 = vrot.slane %v10704_v32, %v12059_v51 }
 0x569   :  { %6604 = vmatprep.subr.bf16.mxu0 %v6603_v28  ;;  %v5015_v52 = vmul.f32 %v4968_v6, %v4893_v22  ;;  %v11169_v28 = vpop.permute.xlu1 %3855  ;;  %v12132_v22 = vld [vmem:[#allocation107_spill] sm:$0xff]  ;;  %v12133_v6 = vld [vmem:[#allocation104_spill] sm:$0xff] }
 0x56a   :  { %6606 = vmatpush1.bf16.msra.mxu0 %v6605_v12  ;;  %v3369_v7 = vsel %vm990_vm4, %v12133_v6, %v12132_v22 }
 0x56b   :  { %v11154_v21 = vpop.permute.xlu0 %4869  ;;  %v6641_v27 = vpack.c.bf16 %v5031_v47, %v5015_v52  ;;  %v3498_v47 = vmul.f32 %v3460_v29, %v3369_v7  ;;  %v5216_v7 = vrot.slane %v11165_v4, %v12109_v40 }
 0x56c   :  { %v4891_v34 = vsel %vm827_vm3, %v4866_v39, %v11154_v21  ;;  %v5208_v39 = vrot.slane %v11165_v4, %v12017_v54 }
 0x56d   :  { %v5016_v3 = vmul.f32 %v4972_v58, %v4891_v34  ;;  %v5144_v58 = vsel %vm2390_vm7, %v10973_v15, %v10990_v42  ;;  %v11206_v26 = vpop.permute.xlu1 %4095 }
 0x56f   :  { %v5106_v11 = vpop.permute.xlu0 %5105  ;;  %v6639_v14 = vpack.c.bf16 %v5032_v38, %v5016_v3  ;;  %v5278_v38 = vmul.f32 %v5212_v20, %v5144_v58  ;;  %v3371_v3 = vsel %vm990_vm4, %v12104_v45, %v12133_v6  ;;  %v5220_v45 = vrot.slane %v11165_v4, %v12106_v30 }
 0x570   :  { %v5145_v12 = vsel %vm2390_vm7, %v10783_v50, %v5106_v11  ;;  %v5146_v50 = vsel %vm2390_vm7, %v12102_v63, %v10973_v15  ;;  %v3456_v63 = vrot.slane %v10704_v32, %v12058_v60  ;;  %v3468_v30 = vrot.slane %v10704_v32, %v11989_v46 }
 0x571   :  { %6640 = vmatprep.subr.bf16.mxu1 %v6639_v14  ;;  %v5261_v52 = vmul.f32 %v5208_v39, %v5145_v12  ;;  %v5277_v15 = vmul.f32 %v5208_v39, %v5146_v50  ;;  %v3514_v12 = vmul.f32 %v3460_v29, %v3370_v10  ;;  %v12136_v29 = vld [vmem:[#allocation50_spill] sm:$0xff] }
 0x572   :  { %6642 = vmatpush1.bf16.msra.mxu1 %v6641_v27  ;;  %v3372_v27 = vsel %vm990_vm4, %v12107_v9, %v12135_v5  ;;  %v3497_v37 = vmul.f32 %v3456_v63, %v3371_v3  ;;  %v5140_v9 = vsel %vm2390_vm7, %v11019_v57, %v11048_v31  ;;  %v12137_v50 = vld [vmem:[#allocation106_spill] sm:$0xff] }
 0x573   :  { %v5110_v54 = vpop.permute.xlu0 %5109  ;;  %v6609_v1 = vpack.c.bf16 %v5277_v15, %v5261_v52  ;;  %v6647_v39 = vpack.c.bf16 %v3514_v12, %v3498_v47  ;;  %v3513_v6 = vmul.f32 %v3456_v63, %v3372_v27  ;;  %v3365_v5 = vsel %vm990_vm4, %v12137_v50, %v12136_v29  ;;  %v12138_v10 = vld [vmem:[#allocation18_spill] sm:$0xff]  ;;  %v12139_v52 = vld [vmem:[#allocation39_spill] sm:$0xff]  ;;  %v11246_v15 = vld [vmem:[%s11596_s6] sm:$0xff] }
 0x574   :  { %v5143_v34 = vsel %vm2390_vm7, %v5106_v11, %v5110_v54  ;;  %v5280_v47 = vmul.f32 %v5220_v45, %v5140_v9  ;;  %v3620_v9 = vsel %vm550_vm2, %v12116_v56, %v11071_v61 }
 0x575   :  { %v5262_v14 = vmul.f32 %v5212_v20, %v5143_v34  ;;  %v3366_v34 = vsel %vm990_vm4, %v12139_v52, %v12138_v10  ;;  %v3712_v10 = vrot.slane %v10797_v53, %v11991_v24 }
 0x576   :  { %v3516_v12 = vmul.f32 %v3468_v30, %v3366_v34 }
 0x577   :  { %v5114_v11 = vpop.permute.xlu0 %5113  ;;  %v6607_v58 = vpack.c.bf16 %v5278_v38, %v5262_v14  ;;  %v6649_v38 = vpack.c.bf16 %v3513_v6, %v3497_v37  ;;  %v11241_v14 = vpop.permute.xlu1 %4099  ;;  %v3464_v37 = vrot.slane %v10704_v32, %v11991_v24 }
 0x578   :  { %v5141_v20 = vsel %vm2390_vm7, %v5110_v54, %v5114_v11  ;;  %v5142_v54 = vsel %vm2390_vm7, %v10990_v42, %v11019_v57  ;;  %v3367_v42 = vsel %vm990_vm4, %v12132_v22, %v12137_v50  ;;  %v3500_v57 = vmul.f32 %v3468_v30, %v3365_v5 }
 0x579   :  { %6608 = vmatprep.subr.bf16.mxu0 %v6607_v58  ;;  %v5263_v3 = vmul.f32 %v5216_v7, %v5141_v20  ;;  %v5279_v27 = vmul.f32 %v5216_v7, %v5142_v54  ;;  %v3368_v22 = vsel %vm990_vm4, %v12134_v18, %v12139_v52  ;;  %v3704_v7 = vrot.slane %v10797_v53, %v12058_v60 }
 0x57a   :  { %6610 = vmatpush1.bf16.msra.mxu0 %v6609_v1  ;;  %v6683_v6 = vpack.c.bf16 %v3516_v12, %v3500_v57  ;;  %v3618_v18 = vsel %vm550_vm2, %v11071_v61, %v11079_v41  ;;  %v3716_v52 = vrot.slane %v10797_v53, %v11989_v46  ;;  %v12140_v61 = vld [vmem:[#allocation5_spill] sm:$0xff] }
 0x57b   :  { %v11228_v40 = vpop.permute.xlu0 %5117  ;;  %6648 = vmatprep.subr.bf16.mxu0 %v6647_v39  ;;  %v6645_v20 = vpack.c.bf16 %v5279_v27, %v5263_v3  ;;  %v3708_v39 = vrot.slane %v10797_v53, %v12059_v51  ;;  %v11272_v29 = vpop.permute.xlu1 %4103  ;;  %v3761_v56 = vmul.f32 %v3704_v7, %v3620_v9  ;;  %v3616_v3 = vsel %vm550_vm2, %v11079_v41, %v11117_v16  ;;  %v12141_v57 = vld [vmem:[#allocation21_spill] sm:$0xff] }
 0x57c   :  { %v5139_v1 = vsel %vm2390_vm7, %v5114_v11, %v11228_v40  ;;  %v3763_v27 = vmul.f32 %v3712_v10, %v3616_v3 }
 0x57d   :  { %v5264_v63 = vmul.f32 %v5220_v45, %v5139_v1  ;;  %5966 = vmatmul.mubr.f32.vlgmr.msra.gmra.mrb[12].mxu0 %v11246_v15  ;;  %v3499_v45 = vmul.f32 %v3464_v37, %v3367_v42  ;;  %v3762_v54 = vmul.f32 %v3708_v39, %v3618_v18  ;;  %v6767_v1 = vld [vmem:[%s11596_s6 + $0x8] sm:$0xff] }
 0x57e   :  { %6650 = vmatpush1.bf16.msra.mxu0 %v6649_v38  ;;  %6365 = vmatprep.mubr.msk.f32.mxu0 %vm5613_vm9, %v10575_v13  ;;  %v3515_v13 = vmul.f32 %v3464_v37, %v3368_v22  ;;  %v3614_v38 = vsel %vm550_vm2, %v11117_v16, %v12140_v61  ;;  %v12143_v61 = vld [vmem:[#allocation12_spill] sm:$0xff] }
 0x57f   :  { %v3598_v11 = vpop.permute.xlu0 %3597  ;;  %v6643_v58 = vpack.c.bf16 %v5280_v47, %v5264_v63  ;;  %v3764_v22 = vmul.f32 %v3716_v52, %v3614_v38  ;;  %v11298_v41 = vpop.permute.xlu1 %4379 }
 0x580   :  { %v3619_v32 = vsel %vm550_vm2, %v10855_v25, %v3598_v11  ;;  %v6685_v50 = vpack.c.bf16 %v3515_v13, %v3499_v45  ;;  %v3868_v13 = vsel %vm1378_vm5, %v10416_v35, %v11136_v62 }
 0x581   :  { %6644 = vmatprep.subr.bf16.mxu1 %v6643_v58  ;;  %v3745_v5 = vmul.f32 %v3704_v7, %v3619_v32  ;;  %v3952_v32 = vrot.slane %v10864_v19, %v12058_v60 }
 0x582   :  { %6646 = vmatpush1.bf16.msra.mxu1 %v6645_v20  ;;  %v3956_v20 = vrot.slane %v10864_v19, %v12059_v51 }
 0x583   :  { %v3602_v25 = vpop.permute.xlu0 %3601  ;;  %6684 = vmatprep.subr.bf16.mxu1 %v6683_v6  ;;  %v6653_v42 = vpack.c.bf16 %v3761_v56, %v3745_v5  ;;  %v3866_v6 = vsel %vm1378_vm5, %v11136_v62, %v11152_v0  ;;  %v11315_v7 = vpop.permute.xlu1 %4383  ;;  %v3964_v5 = vrot.slane %v10864_v19, %v11989_v46  ;;  %v3864_v62 = vsel %vm1378_vm5, %v11152_v0, %v11169_v28 }
 0x584   :  { %v3617_v30 = vsel %vm550_vm2, %v3598_v11, %v3602_v25 }
 0x585   :  { %v3746_v34 = vmul.f32 %v3708_v39, %v3617_v30  ;;  %6037 = vmatmul.mubr.f32.vlgmr.msra.gmra.mrb[12].mxu1 %v11246_v15 }
 0x586   :  { %6686 = vmatpush1.bf16.msra.mxu1 %v6685_v50  ;;  %6366 = vmatprep.mubr.msk.f32.mxu1 %vm5613_vm9, %v6767_v1  ;;  %v3960_v50 = vrot.slane %v10864_v19, %v11991_v24 }
 0x587   :  { %v3606_v53 = vpop.permute.xlu0 %3605  ;;  %v6651_v47 = vpack.c.bf16 %v3762_v54, %v3746_v34  ;;  %v4009_v54 = vmul.f32 %v3952_v32, %v3868_v13 }
 0x588   :  { %v3613_v63 = vsel %vm550_vm2, %v3606_v53, %v12141_v57  ;;  %v3615_v37 = vsel %vm550_vm2, %v3602_v25, %v3606_v53  ;;  %v4010_v25 = vmul.f32 %v3956_v20, %v3866_v6  ;;  %v4011_v3 = vmul.f32 %v3960_v50, %v3864_v62  ;;  %v11336_v53 = vpop.permute.xlu1 %4387 }
 0x589   :  { %v3747_v16 = vmul.f32 %v3712_v10, %v3615_v37  ;;  %v3748_v12 = vmul.f32 %v3716_v52, %v3613_v63  ;;  %6652 = vmatprep.subr.bf16.mxu0 %v6651_v47  ;;  %v12142_v10 = vld [vmem:[#allocation26_spill] sm:$0xff] }
 0x58a   :  { %6654 = vmatpush1.bf16.msra.mxu0 %v6653_v42  ;;  %v3862_v35 = vsel %vm1378_vm5, %v11169_v28, %v12142_v10  ;;  %v12144_v63 = vld [vmem:[#allocation22_spill] sm:$0xff]  ;;  %v12148_v10 = vld [vmem:[#allocation4_spill] sm:$0xff] }
 0x58b   :  { %v6689_v11 = vpack.c.bf16 %v3763_v27, %v3747_v16  ;;  %v3846_v58 = vpop.permute.xlu0 %3845  ;;  %v6687_v45 = vpack.c.bf16 %v3764_v22, %v3748_v12  ;;  %v4012_v1 = vmul.f32 %v3964_v5, %v3862_v35  ;;  %v4204_v37 = vrot.slane %v12144_v63, %v12059_v51  ;;  %v12145_v27 = vld [vmem:[#allocation37_spill] sm:$0xff] }
 0x58c   :  { %v3867_v39 = vsel %vm1378_vm5, %v10913_v44, %v3846_v58  ;;  %v4200_v16 = vrot.slane %v12144_v63, %v12058_v60  ;;  %v4114_v12 = vsel %vm102_vm0, %v11206_v26, %v11241_v14  ;;  %v4208_v13 = vrot.slane %v12144_v63, %v11991_v24 }
 0x58d   :  { %6688 = vmatprep.subr.bf16.mxu1 %v6687_v45  ;;  %v3993_v9 = vmul.f32 %v3952_v32, %v3867_v39  ;;  %v11353_v45 = vpop.permute.xlu1 %4627  ;;  %v4258_v6 = vmul.f32 %v4204_v37, %v4114_v12 }
 0x58e   :  { %6690 = vmatpush1.bf16.msra.mxu1 %v6689_v11  ;;  %v12146_v11 = vld [vmem:[#allocation53_spill] sm:$0xff] }
 0x58f   :  { %v3850_v18 = vpop.permute.xlu0 %3849  ;;  %v6657_v56 = vpack.c.bf16 %v4009_v54, %v3993_v9 }
 0x590   :  { %v3865_v44 = vsel %vm1378_vm5, %v3846_v58, %v3850_v18  ;;  %v4116_v58 = vsel %vm102_vm0, %v12146_v11, %v11206_v26  ;;  %v6771_v11 = vld [vmem:[%s11594_s1 + $0x70] sm:$0xff] }
 0x591   :  { %v3994_v30 = vmul.f32 %v3956_v20, %v3865_v44  ;;  %v4257_v44 = vmul.f32 %v4200_v16, %v4116_v58  ;;  %v6701_v58 = vpack.c.bf16 %v6771_v11, %v12115_v17 }
 0x593   :  { %v3854_v52 = vpop.permute.xlu0 %3853  ;;  %v6655_v34 = vpack.c.bf16 %v4010_v25, %v3994_v30  ;;  %v12147_v25 = vld [vmem:[#allocation30_spill] sm:$0xff] }
 0x594   :  { %v3861_v38 = vsel %vm1378_vm5, %v3854_v52, %v12143_v61  ;;  %v3863_v19 = vsel %vm1378_vm5, %v3850_v18, %v3854_v52  ;;  %v4212_v18 = vrot.slane %v12144_v63, %v11989_v46  ;;  %v4110_v26 = vsel %vm102_vm0, %v11272_v29, %v12147_v25  ;;  %v6768_v52 = vld [vmem:[%s11594_s1 + $0x68] sm:$0xff] }
 0x595   :  { %v3995_v47 = vmul.f32 %v3960_v50, %v3863_v19  ;;  %v3996_v42 = vmul.f32 %v3964_v5, %v3861_v38  ;;  %6656 = vmatprep.subr.bf16.mxu0 %v6655_v34  ;;  %v4112_v50 = vsel %vm102_vm0, %v11241_v14, %v11272_v29  ;;  %v6663_v34 = vpack.c.bf16 %v6768_v52, %v12111_v43  ;;  %v11378_v38 = vpop.permute.xlu1 %4631 }
 0x596   :  { %6658 = vmatpush1.bf16.msra.mxu0 %v6657_v56  ;;  %v4259_v56 = vmul.f32 %v4208_v13, %v4112_v50  ;;  %v4260_v61 = vmul.f32 %v4212_v18, %v4110_v26  ;;  %v4484_v43 = vrot.slane %v10986_v36, %v12059_v51 }
 0x597   :  { %v6693_v57 = vpack.c.bf16 %v4011_v3, %v3995_v47  ;;  %v4094_v0 = vpop.permute.xlu0 %4093  ;;  %v6691_v28 = vpack.c.bf16 %v4012_v1, %v3996_v42  ;;  %v6769_v47 = vld [vmem:[%s11594_s1 + $0x60] sm:$0xff]  ;;  %v12149_v42 = vld [vmem:[#allocation82_spill] sm:$0xff] }
 0x598   :  { %v4115_v22 = vsel %vm102_vm0, %v12145_v27, %v4094_v0  ;;  %v4392_v27 = vsel %vm379_vm1, %v11298_v41, %v11315_v7 }
 0x599   :  { %6692 = vmatprep.subr.bf16.mxu1 %v6691_v28  ;;  %v4241_v39 = vmul.f32 %v4200_v16, %v4115_v22  ;;  %v6770_v28 = vld [vmem:[%s11594_s1 + $0x78] sm:$0xff]  ;;  %v4636_v22 = vpop.permute.xlu1 %4635 }
 0x59a   :  { %6694 = vmatpush1.bf16.msra.mxu1 %v6693_v57  ;;  %v6665_v57 = vpack.c.bf16 %v6769_v47, %v12149_v42  ;;  %v6699_v63 = vpack.c.bf16 %v6770_v28, %v12125_v48  ;;  %v4740_v47 = vrot.slane %v11052_v55, %v11989_v46 }
 0x59b   :  { %v4098_v20 = vpop.permute.xlu0 %4097  ;;  %v6661_v54 = vpack.c.bf16 %v4257_v44, %v4241_v39  ;;  %v4488_v39 = vrot.slane %v10986_v36, %v11991_v24 }
 0x59c   :  { %v4113_v32 = vsel %vm102_vm0, %v4094_v0, %v4098_v20 }
 0x59d   :  { %v4242_v9 = vmul.f32 %v4204_v37, %v4113_v32  ;;  %v4480_v37 = vrot.slane %v10986_v36, %v12058_v60 }
 0x59f   :  { %v4102_v5 = vpop.permute.xlu0 %4101  ;;  %v6659_v30 = vpack.c.bf16 %v4258_v6, %v4242_v9  ;;  %v4390_v6 = vsel %vm379_vm1, %v11315_v7, %v11336_v53 }
 0x5a0   :  { %v4109_v35 = vsel %vm102_vm0, %v4102_v5, %v12148_v10  ;;  %v4111_v62 = vsel %vm102_vm0, %v4098_v20, %v4102_v5  ;;  %v4538_v20 = vmul.f32 %v4484_v43, %v4392_v27  ;;  %v4539_v50 = vmul.f32 %v4488_v39, %v4390_v6  ;;  %v12153_v27 = vld [vmem:[#allocation61_spill] sm:$0xff] }
 0x5a1   :  { %v4243_v14 = vmul.f32 %v4208_v13, %v4111_v62  ;;  %v4244_v29 = vmul.f32 %v4212_v18, %v4109_v35  ;;  %6660 = vmatprep.subr.bf16.mxu0 %v6659_v30  ;;  %v12150_v13 = vld [vmem:[#allocation25_spill] sm:$0xff]  ;;  %v4876_v30 = vpop.permute.xlu1 %4875  ;;  %v4732_v62 = vrot.slane %v11052_v55, %v12059_v51 }
 0x5a2   :  { %6662 = vmatpush1.bf16.msra.mxu0 %v6661_v54  ;;  %v4420_v18 = vsel %vm379_vm1, %v11336_v53, %v12150_v13  ;;  %v12154_v13 = vld [vmem:[#allocation55_spill] sm:$0xff] }
 0x5a3   :  { %v6697_v19 = vpack.c.bf16 %v4259_v56, %v4243_v14  ;;  %v4378_v3 = vpop.permute.xlu0 %4377  ;;  %6664 = vmatprep.subr.bf16.mxu0 %v6663_v34  ;;  %v6695_v1 = vpack.c.bf16 %v4260_v61, %v4244_v29  ;;  %v4728_v34 = vrot.slane %v11052_v55, %v12058_v60  ;;  %v4640_v56 = vsel %vm2001_vm6, %v11353_v45, %v11378_v38 }
 0x5a4   :  { %v4393_v0 = vsel %vm379_vm1, %v11037_v49, %v4378_v3  ;;  %v4394_v49 = vsel %vm379_vm1, %v10735_v8, %v11298_v41  ;;  %v4492_v8 = vrot.slane %v10986_v36, %v11989_v46  ;;  %v12151_v36 = vld [vmem:[#allocation58_spill] sm:$0xff]  ;;  %v4642_v61 = vsel %vm2001_vm6, %v10860_v2, %v11353_v45 }
 0x5a5   :  { %6696 = vmatprep.subr.bf16.mxu1 %v6695_v1  ;;  %v4521_v12 = vmul.f32 %v4480_v37, %v4393_v0  ;;  %v4537_v32 = vmul.f32 %v4480_v37, %v4394_v49  ;;  %v4880_v14 = vpop.permute.xlu1 %4879  ;;  %v4736_v1 = vrot.slane %v11052_v55, %v11991_v24  ;;  %v12152_v2 = vld [vmem:[#allocation46_spill] sm:$0xff] }
 0x5a6   :  { %6666 = vmatpush1.bf16.msra.mxu0 %v6665_v57  ;;  %6698 = vmatpush1.bf16.msra.mxu1 %v6697_v19  ;;  %v4540_v5 = vmul.f32 %v4492_v8, %v4420_v18  ;;  %v4785_v57 = vmul.f32 %v4728_v34, %v4642_v61  ;;  %v4668_v45 = vsel %vm2001_vm6, %v4636_v22, %v12152_v2 }
 0x5a7   :  { %v4382_v16 = vpop.permute.xlu0 %4381  ;;  %6700 = vmatprep.subr.bf16.mxu1 %v6699_v63  ;;  %v6669_v44 = vpack.c.bf16 %v4537_v32, %v4521_v12  ;;  %v4976_v32 = vrot.slane %v11115_v23, %v12058_v60  ;;  %v4888_v6 = vsel %vm827_vm3, %v4876_v30, %v4880_v14  ;;  %v4890_v18 = vsel %vm827_vm3, %v12154_v13, %v4876_v30  ;;  %v12159_v13 = vld [vmem:[#allocation36_spill] sm:$0xff] }
 0x5a8   :  { %v4391_v48 = vsel %vm379_vm1, %v4378_v3, %v4382_v16  ;;  %v4786_v3 = vmul.f32 %v4732_v62, %v4640_v56 }
 0x5a9   :  { %v4522_v41 = vmul.f32 %v4484_v43, %v4391_v48  ;;  %v4638_v43 = vsel %vm2001_vm6, %v11378_v38, %v4636_v22  ;;  %v4884_v12 = vpop.permute.xlu1 %4883 }
 0x5aa   :  { %6702 = vmatpush1.bf16.msra.mxu1 %v6701_v58  ;;  %v4787_v49 = vmul.f32 %v4736_v1, %v4638_v43 }
 0x5ab   :  { %v4386_v17 = vpop.permute.xlu0 %4385  ;;  %v6667_v9 = vpack.c.bf16 %v4538_v20, %v4522_v41 }
 0x5ac   :  { %v4389_v25 = vsel %vm379_vm1, %v4382_v16, %v4386_v17  ;;  %v4419_v26 = vsel %vm379_vm1, %v4386_v17, %v12151_v36  ;;  %v4788_v16 = vmul.f32 %v4740_v47, %v4668_v45 }
 0x5ad   :  { %v4523_v7 = vmul.f32 %v4488_v39, %v4389_v25  ;;  %v4524_v54 = vmul.f32 %v4492_v8, %v4419_v26  ;;  %6668 = vmatprep.subr.bf16.mxu0 %v6667_v9  ;;  %v4980_v8 = vrot.slane %v11115_v23, %v12059_v51  ;;  %v5124_v17 = vpop.permute.xlu1 %5123  ;;  %v4988_v26 = vrot.slane %v11115_v23, %v11989_v46 }
 0x5ae   :  { %6670 = vmatpush1.bf16.msra.mxu0 %v6669_v44  ;;  %v5138_v43 = vsel %vm2390_vm7, %v11048_v31, %v5124_v17 }
 0x5af   :  { %v6705_v10 = vpack.c.bf16 %v4539_v50, %v4523_v7  ;;  %v4626_v53 = vpop.permute.xlu0 %4625  ;;  %v6703_v35 = vpack.c.bf16 %v4540_v5, %v4524_v54  ;;  %v5034_v36 = vmul.f32 %v4980_v8, %v4888_v6  ;;  %v5033_v5 = vmul.f32 %v4976_v32, %v4890_v18  ;;  %v12155_v54 = vld [vmem:[#allocation49_spill] sm:$0xff] }
 0x5b0   :  { %v4641_v52 = vsel %vm2001_vm6, %v11099_v59, %v4626_v53  ;;  %v4886_v7 = vsel %vm827_vm3, %v4880_v14, %v4884_v12  ;;  %v4916_v30 = vsel %vm827_vm3, %v4884_v12, %v12155_v54 }
 0x5b1   :  { %6704 = vmatprep.subr.bf16.mxu1 %v6703_v35  ;;  %v4769_v19 = vmul.f32 %v4728_v34, %v4641_v52  ;;  %v12156_v52 = vld [vmem:[#allocation64_spill] sm:$0xff]  ;;  %v5036_v56 = vmul.f32 %v4988_v26, %v4916_v30  ;;  %v5128_v61 = vpop.permute.xlu1 %5127 }
 0x5b2   :  { %6706 = vmatpush1.bf16.msra.mxu1 %v6705_v10 }
 0x5b3   :  { %v4630_v29 = vpop.permute.xlu0 %4629  ;;  %v6673_v63 = vpack.c.bf16 %v4785_v57, %v4769_v19  ;;  %v5136_v57 = vsel %vm2390_vm7, %v5124_v17, %v5128_v61  ;;  %v12160_v17 = vld [vmem:[#allocation41_spill] sm:$0xff] }
 0x5b4   :  { %v4639_v59 = vsel %vm2001_vm6, %v4626_v53, %v4630_v29 }
 0x5b5   :  { %v4770_v42 = vmul.f32 %v4732_v62, %v4639_v59  ;;  %v5132_v2 = vpop.permute.xlu1 %5131 }
 0x5b7   :  { %v4634_v0 = vpop.permute.xlu0 %4633  ;;  %v6671_v28 = vpack.c.bf16 %v4786_v3, %v4770_v42  ;;  %v5224_v42 = vrot.slane %v11165_v4, %v12058_v60  ;;  %v5236_v60 = vrot.slane %v11165_v4, %v11989_v46 }
 0x5b8   :  { %v4637_v37 = vsel %vm2001_vm6, %v4630_v29, %v4634_v0  ;;  %v4667_v55 = vsel %vm2001_vm6, %v4634_v0, %v12153_v27  ;;  %v5134_v27 = vsel %vm2390_vm7, %v5128_v61, %v5132_v2 }
 0x5b9   :  { %v4771_v48 = vmul.f32 %v4736_v1, %v4637_v37  ;;  %v4772_v11 = vmul.f32 %v4740_v47, %v4667_v55  ;;  %6672 = vmatprep.subr.bf16.mxu0 %v6671_v28  ;;  %v5228_v1 = vrot.slane %v11165_v4, %v12059_v51  ;;  %v5281_v37 = vmul.f32 %v5224_v42, %v5138_v43  ;;  %v12157_v55 = vld [vmem:[#allocation59_spill] sm:$0xff] }
 0x5ba   :  { %6674 = vmatpush1.bf16.msra.mxu0 %v6673_v63  ;;  %v5164_v31 = vsel %vm2390_vm7, %v5132_v2, %v12157_v55 }
 0x5bb   :  { %v6709_v38 = vpack.c.bf16 %v4787_v49, %v4771_v48  ;;  %v4874_v58 = vpop.permute.xlu0 %4873  ;;  %v6707_v22 = vpack.c.bf16 %v4788_v16, %v4772_v11  ;;  %v11458_v20 = vpop.f32.mrb[8].mxu0  ;;  %v5282_v28 = vmul.f32 %v5228_v1, %v5136_v57  ;;  %v12158_v11 = vld [vmem:[#allocation69_spill] sm:$0xff] }
 0x5bc   :  { %v11460_v39 = vpop.f32.mrb[9].mxu0  ;;  %v4889_v41 = vsel %vm827_vm3, %v11154_v21, %v4874_v58  ;;  %v4984_v21 = vrot.slane %v11115_v23, %v11991_v24 }
 0x5bd   :  { %6708 = vmatprep.subr.bf16.mxu1 %v6707_v22  ;;  %v5017_v44 = vmul.f32 %v4976_v32, %v4889_v41 }
 0x5be   :  { %6710 = vmatpush1.bf16.msra.mxu1 %v6709_v38  ;;  %v5035_v23 = vmul.f32 %v4984_v21, %v4886_v7 }
 0x5bf   :  { %v4878_v9 = vpop.permute.xlu0 %4877  ;;  %v6677_v35 = vpack.c.bf16 %v5033_v5, %v5017_v44 }
 0x5c0   :  { %v4887_v25 = vsel %vm827_vm3, %v4874_v58, %v4878_v9 }
 0x5c1   :  { %v5018_v50 = vmul.f32 %v4980_v8, %v4887_v25 }
 0x5c3   :  { %v4882_v10 = vpop.permute.xlu0 %4881  ;;  %v6675_v53 = vpack.c.bf16 %v5034_v36, %v5018_v50 }
 0x5c4   :  { %v4885_v62 = vsel %vm827_vm3, %v4878_v9, %v4882_v10  ;;  %v4915_v34 = vsel %vm827_vm3, %v4882_v10, %v12156_v52 }
 0x5c5   :  { %v5019_v29 = vmul.f32 %v4984_v21, %v4885_v62  ;;  %v5020_v19 = vmul.f32 %v4988_v26, %v4915_v34  ;;  %6676 = vmatprep.subr.bf16.mxu0 %v6675_v53 }
 0x5c6   :  { %6678 = vmatpush1.bf16.msra.mxu0 %v6677_v35 }
 0x5c7   :  { %v6713_v14 = vpack.c.bf16 %v5035_v23, %v5019_v29  ;;  %v5122_v59 = vpop.permute.xlu0 %5121  ;;  %v6711_v3 = vpack.c.bf16 %v5036_v56, %v5020_v19 }
 0x5c8   :  { %v5137_v47 = vsel %vm2390_vm7, %v11228_v40, %v5122_v59  ;;  %v5232_v40 = vrot.slane %v11165_v4, %v11991_v24  ;;  %v5284_v4 = vmul.f32 %v5236_v60, %v5164_v31 }
 0x5c9   :  { %6712 = vmatprep.subr.bf16.mxu1 %v6711_v3  ;;  %v5265_v0 = vmul.f32 %v5224_v42, %v5137_v47 }
 0x5ca   :  { %6714 = vmatpush1.bf16.msra.mxu1 %v6713_v14  ;;  %v5283_v46 = vmul.f32 %v5232_v40, %v5134_v27 }
 0x5cb   :  { %v5126_v45 = vpop.permute.xlu0 %5125  ;;  %v6681_v12 = vpack.c.bf16 %v5281_v37, %v5265_v0 }
 0x5cc   :  { %v5135_v51 = vsel %vm2390_vm7, %v5122_v59, %v5126_v45 }
 0x5cd   :  { %v5266_v63 = vmul.f32 %v5228_v1, %v5135_v51 }
 0x5cf   :  { %v5130_v49 = vpop.permute.xlu0 %5129  ;;  %v6679_v16 = vpack.c.bf16 %v5282_v28, %v5266_v63 }
 0x5d0   :  { %v5133_v48 = vsel %vm2390_vm7, %v5126_v45, %v5130_v49  ;;  %v5163_v24 = vsel %vm2390_vm7, %v5130_v49, %v12158_v11 }
 0x5d1   :  { %v5267_v38 = vmul.f32 %v5232_v40, %v5133_v48  ;;  %v5268_v58 = vmul.f32 %v5236_v60, %v5163_v24  ;;  %6680 = vmatprep.subr.bf16.mxu0 %v6679_v16 }
 0x5d2   :  { %6682 = vmatpush1.bf16.msra.mxu0 %v6681_v12 }
 0x5d3   :  { %v6717_v22 = vpack.c.bf16 %v5283_v46, %v5267_v38  ;;  %v6715_v8 = vpack.c.bf16 %v5284_v4, %v5268_v58 }
 0x5d5   :  { %6108 = vmatmul.mubr.f32.vlgmr.msra.gmra.mrb[14].mxu0 %v11246_v15  ;;  %6716 = vmatprep.subr.bf16.mxu1 %v6715_v8 }
 0x5d6   :  { %6718 = vmatpush1.bf16.msra.mxu1 %v6717_v22 }
 0x5d9   :  { %6179 = vmatmul.mubr.f32.vlgmr.msra.gmra.mrb[14].mxu1 %v11246_v15 }
 0x5e0   :  { %v11520_v41 = vpop.permute.xlu0 %5610  ;;  %v5825_v32 = vpop.f32.mrb[10].mxu0 }
 0x5e1   :  { %v5684_v33 = vadd.f32 %v11458_v20, %v11520_v41  ;;  %v5686_v6 = vadd.f32 %v11460_v39, %v11520_v41  ;;  %v5755_v18 = vadd.f32 %v12159_v13, %v11520_v41  ;;  %v5757_v9 = vadd.f32 %v12160_v17, %v11520_v41  ;;  %v5827_v44 = vpop.f32.mrb[11].mxu0 }
 0x5e2   :  { %v5826_v25 = vadd.f32 %v5825_v32, %v11520_v41  ;;  %v5828_v15 = vadd.f32 %v5827_v44, %v11520_v41 }
 0x5e3   :  { %vm6185_vm0 = vcmp.ge.f32.partialorder %v5684_v33, 0.0  ;;  %vm6186_vm1 = vcmp.ge.f32.partialorder %v5686_v6, 0.0  ;;  %vm6187_vm2 = vcmp.ge.f32.partialorder %v5755_v18, 0.0  ;;  %vm6188_vm3 = vcmp.ge.f32.partialorder %v5757_v9, 0.0 }
 0x5e4   :  { %v6201_v36 = vmul.f32 0.1, %v5684_v33  ;;  %v6202_v20 = vmul.f32 0.1, %v5686_v6  ;;  %v6203_v21 = vmul.f32 0.1, %v5755_v18 }
 0x5e5   :  { %v6204_v26 = vmul.f32 0.1, %v5757_v9  ;;  %vm6189_vm4 = vcmp.ge.f32.partialorder %v5826_v25, 0.0  ;;  %v6205_v39 = vmul.f32 0.1, %v5826_v25  ;;  %vm6190_vm5 = vcmp.ge.f32.partialorder %v5828_v15, 0.0 }
 0x5e6   :  { %v6217_v50 = vsel %vm6185_vm0, %v5684_v33, %v6201_v36  ;;  %v6218_v5 = vsel %vm6186_vm1, %v5686_v6, %v6202_v20  ;;  %v6219_v7 = vsel %vm6187_vm2, %v5755_v18, %v6203_v21  ;;  %v6206_v54 = vmul.f32 0.1, %v5828_v15 }
 0x5e7   :  { %v6220_v30 = vsel %vm6188_vm3, %v5757_v9, %v6204_v26  ;;  %6233 = vst [vmem:[%s11598_s8] sm:$0xff] %v6217_v50  ;;  %6234 = vst [vmem:[%s11598_s8 + $0x8] sm:$0xff] %v6218_v5  ;;  %v6221_v10 = vsel %vm6189_vm4, %v5826_v25, %v6205_v39 }
 0x5e8   :  { %6235 = vst [vmem:[%s11598_s8 + $0x10] sm:$0xff] %v6219_v7  ;;  %6236 = vst [vmem:[%s11598_s8 + $0x18] sm:$0xff] %v6220_v30  ;;  %v6222_v53 = vsel %vm6190_vm5, %v5828_v15, %v6206_v54  ;;  %v5896_v35 = vpop.f32.mrb[10].mxu1 }
 0x5e9   :  { %6237 = vst [vmem:[%s11598_s8 + $0x20] sm:$0xff] %v6221_v10  ;;  %6238 = vst [vmem:[%s11598_s8 + $0x28] sm:$0xff] %v6222_v53  ;;  %v5897_v62 = vadd.f32 %v5896_v35, %v11520_v41  ;;  %v5898_v52 = vpop.f32.mrb[11].mxu1 }
 0x5ea   :  { %v5899_v34 = vadd.f32 %v5898_v52, %v11520_v41 }
 0x5eb   :  { %vm6191_vm6 = vcmp.ge.f32.partialorder %v5897_v62, 0.0  ;;  %v6207_v23 = vmul.f32 0.1, %v5897_v62 }
 0x5ec   :  { %vm6192_vm7 = vcmp.ge.f32.partialorder %v5899_v34, 0.0  ;;  %v6208_v56 = vmul.f32 0.1, %v5899_v34 }
 0x5ed   :  { %v6223_v61 = vsel %vm6191_vm6, %v5897_v62, %v6207_v23 }
 0x5ee   :  { %6239 = vst [vmem:[%s11598_s8 + $0x30] sm:$0xff] %v6223_v61  ;;  %v6224_v29 = vsel %vm6192_vm7, %v5899_v34, %v6208_v56 }
 0x5ef   :  { %6240 = vst [vmem:[%s11598_s8 + $0x38] sm:$0xff] %v6224_v29 }
 0x650   :  { %v5967_v19 = vpop.f32.mrb[12].mxu0 }
 0x651   :  { %v5968_v14 = vadd.f32 %v5967_v19, %v11520_v41  ;;  %v5969_v59 = vpop.f32.mrb[13].mxu0 }
 0x652   :  { %v5970_v3 = vadd.f32 %v5969_v59, %v11520_v41 }
 0x653   :  { %vm6193_vm9 = vcmp.ge.f32.partialorder %v5968_v14, 0.0  ;;  %v6209_v1 = vmul.f32 0.1, %v5968_v14 }
 0x654   :  { %vm6194_vm12 = vcmp.ge.f32.partialorder %v5970_v3, 0.0  ;;  %v6210_v47 = vmul.f32 0.1, %v5970_v3 }
 0x655   :  { %v6225_v42 = vsel %vm6193_vm9, %v5968_v14, %v6209_v1 }
 0x656   :  { %6241 = vst [vmem:[%s11598_s8 + $0x40] sm:$0xff] %v6225_v42  ;;  %v6226_v57 = vsel %vm6194_vm12, %v5970_v3, %v6210_v47 }
 0x657   :  { %6242 = vst [vmem:[%s11598_s8 + $0x48] sm:$0xff] %v6226_v57 }
 0x658   :  { %v6038_v43 = vpop.f32.mrb[12].mxu1 }
 0x659   :  { %v6039_v2 = vadd.f32 %v6038_v43, %v11520_v41  ;;  %v6040_v45 = vpop.f32.mrb[13].mxu1 }
 0x65a   :  { %v6041_v0 = vadd.f32 %v6040_v45, %v11520_v41 }
 0x65b   :  { %vm6195_vm13 = vcmp.ge.f32.partialorder %v6039_v2, 0.0  ;;  %v6211_v51 = vmul.f32 0.1, %v6039_v2 }
 0x65c   :  { %vm6196_vm14 = vcmp.ge.f32.partialorder %v6041_v0, 0.0  ;;  %v6212_v28 = vmul.f32 0.1, %v6041_v0 }
 0x65d   :  { %v6227_v40 = vsel %vm6195_vm13, %v6039_v2, %v6211_v51 }
 0x65e   :  { %6243 = vst [vmem:[%s11598_s8 + $0x50] sm:$0xff] %v6227_v40  ;;  %v6228_v60 = vsel %vm6196_vm14, %v6041_v0, %v6212_v28 }
 0x65f   :  { %6244 = vst [vmem:[%s11598_s8 + $0x58] sm:$0xff] %v6228_v60 }
 0x6a8   :  { %v6109_v63 = vpop.f32.mrb[14].mxu0 }
 0x6a9   :  { %v6110_v37 = vadd.f32 %v6109_v63, %v11520_v41  ;;  %v6111_v27 = vpop.f32.mrb[15].mxu0 }
 0x6aa   :  { %v6112_v55 = vadd.f32 %v6111_v27, %v11520_v41 }
 0x6ab   :  { %vm6197_vm15 = vcmp.ge.f32.partialorder %v6110_v37, 0.0  ;;  %v6213_v31 = vmul.f32 0.1, %v6110_v37 }
 0x6ac   :  { %vm6198_vm8 = vcmp.ge.f32.partialorder %v6112_v55, 0.0  ;;  %v6214_v49 = vmul.f32 0.1, %v6112_v55  ;;  %v6180_v16 = vpop.f32.mrb[14].mxu1 }
 0x6ad   :  { %v6229_v12 = vsel %vm6197_vm15, %v6110_v37, %v6213_v31  ;;  %v6181_v48 = vadd.f32 %v6180_v16, %v11520_v41  ;;  %v6182_v11 = vpop.f32.mrb[15].mxu1 }
 0x6ae   :  { %6245 = vst [vmem:[%s11598_s8 + $0x60] sm:$0xff] %v6229_v12  ;;  %v6230_v24 = vsel %vm6198_vm8, %v6112_v55, %v6214_v49  ;;  %v6183_v46 = vadd.f32 %v6182_v11, %v11520_v41 }
 0x6af   :  { %6246 = vst [vmem:[%s11598_s8 + $0x68] sm:$0xff] %v6230_v24  ;;  %vm6199_vm10 = vcmp.ge.f32.partialorder %v6181_v48, 0.0  ;;  %v6215_v4 = vmul.f32 0.1, %v6181_v48 }
 0x6b0   :  { %vm6200_vm11 = vcmp.ge.f32.partialorder %v6183_v46, 0.0  ;;  %v6216_v38 = vmul.f32 0.1, %v6183_v46 }
 0x6b1   :  { %v6231_v58 = vsel %vm6199_vm10, %v6181_v48, %v6215_v4 }
 0x6b2   :  { %6247 = vst [vmem:[%s11598_s8 + $0x70] sm:$0xff] %v6231_v58  ;;  %v6232_v22 = vsel %vm6200_vm11, %v6183_v46, %v6216_v38 }
 0x6b3   :  { %6248 = vst [vmem:[%s11598_s8 + $0x78] sm:$0xff] %v6232_v22 }

</bundles_post_ra>
